<compile_context>
chip_gen: v7x
topology: tpu7x:2x2x1
jax: 0.10.0
libtpu: 0.0.40
codegen_flags: <defaults>
</compile_context>

<pallas_src>
import math

import jax
import jax.numpy as jnp
from jax.experimental import pallas as pl
from jax.experimental.pallas import tpu as pltpu

# ------------------------- config (small, synthetic) -------------------------
VOCAB = 64
VOCAB_PAD = 128          # lane-dense lm_head output (unmasked vst)
HIDDEN = 32
NUM_HEADS = 4
HEAD_DIM = HIDDEN // NUM_HEADS
FFN = 64
NUM_LAYERS = 2
MAX_DEC = 8              # decoder self-attn KV cache length
ENC_LEN = 16             # encoder sequence length (cross-attn KV cache length)
BATCH = 2
TGT_LEN = 1              # single-token decode step
NEG_INF = -1e9

_N_PARAMS = 23           # must match the ordering built in seq2seq_decoder_wrapper_forward


# ------------------------------ in-kernel helpers -----------------------------
def _layer_norm(x, g, b, eps=1e-5):
    mu = jnp.mean(x, axis=-1, keepdims=True)
    var = jnp.mean(jnp.square(x - mu), axis=-1, keepdims=True)
    return (x - mu) * jax.lax.rsqrt(var + eps) * g + b


def _attend_all_heads(q_b, k_b, v_b, bias_b, pool, unpool):
    """All-heads attention for one sequence, everything 2-D.

    q_b: (1, E) pre-scaled query; k_b / v_b: (S, E); bias_b: (S, 1) additive.
    pool (E, H) / unpool (H, E) are constant head-segment selector matrices, so the
    per-head dot products and the per-head probability broadcast are single matmuls.
    """
    s = jnp.dot(k_b * q_b, pool, preferred_element_type=jnp.float32) + bias_b   # (S, H)
    s = s - jnp.max(s, axis=0, keepdims=True)
    p = jnp.exp(s)
    denom = jnp.sum(p, axis=0, keepdims=True)                                   # (1, H)
    p = p * pl.reciprocal(denom, approx=True)                                   # EUP slot
    pe = jnp.dot(p, unpool, preferred_element_type=jnp.float32)                 # (S, E)
    return jnp.sum(pe * v_b, axis=0, keepdims=True)                             # (1, E)


# ------------------------------- fused kernel --------------------------------
def _fused_decode_kernel(ids_ref, cp_ref, *refs):
    E = HIDDEN
    scale = 1.0 / math.sqrt(HEAD_DIM)

    (embed_tokens, embed_positions, emb_ln,
     qkv_w, qkv_b, self_o_w, self_o_b,
     cross_q_w, cross_q_b, cross_o_w, cross_o_b,
     fc1_w, fc1_b, fc2_w, fc2_b, ln_g, ln_b,
     lm_w, lm_b, head_pool, head_unpool,
     self_bias_ref, enc_bias_ref) = refs[:_N_PARAMS]
    cross_refs = refs[_N_PARAMS:_N_PARAMS + 2 * NUM_LAYERS]          # (B, ENC_LEN, E) each
    self_refs = refs[_N_PARAMS + 2 * NUM_LAYERS:_N_PARAMS + 4 * NUM_LAYERS]  # (S, B, E)
    out_refs = refs[_N_PARAMS + 4 * NUM_LAYERS:]
    logits_ref = out_refs[0]                                         # (B, VOCAB_PAD)
    self_out_refs = out_refs[1:]                                     # (1, B, E) row blocks

    pos = cp_ref[0]
    pool = head_pool[...]                                            # (E, H)
    unpool = head_unpool[...]                                        # (H, E)
    self_bias = self_bias_ref[...]                                   # (MAX_DEC, B)
    enc_bias = enc_bias_ref[...]                                     # (ENC_LEN, B)

    # --- embedding: token gather + learned positional row + embedding LayerNorm ---
    rows = [embed_tokens[pl.ds(ids_ref[b, 0], 1), :] for b in range(BATCH)]
    hs = jnp.concatenate(rows, axis=0)                               # (B, E)
    # TODO(synk): per-sequence cache positions (continuous batching) and BART's "+2"
    # positional offset are not modeled; a single shared cache_position is used.
    hs = hs + embed_positions[pl.ds(pos, 1), :]
    hs = _layer_norm(hs, emb_ln[0:1, :], emb_ln[1:2, :])

    # compute-side selector for the freshly-produced KV row (the HBM cache itself is
    # updated with a single-row DMA through the pos-indexed output BlockSpec).
    row_sel = jax.lax.broadcasted_iota(jnp.int32, (MAX_DEC, 1), 0) == pos       # (S, 1)

    def self_mha(q, k_new, v_new, k_ref, v_ref):
        outs = []
        for b in range(BATCH):                                       # tiny static unroll
            k_b = jnp.where(row_sel, k_new[b:b + 1, :], k_ref[:, b, :])          # (S, E)
            v_b = jnp.where(row_sel, v_new[b:b + 1, :], v_ref[:, b, :])
            outs.append(_attend_all_heads(q[b:b + 1, :], k_b, v_b,
                                          self_bias[:, b:b + 1], pool, unpool))
        return jnp.concatenate(outs, axis=0)                         # (B, E)

    def cross_mha(q, k_ref, v_ref):
        outs = []
        for b in range(BATCH):
            outs.append(_attend_all_heads(q[b:b + 1, :], k_ref[b], v_ref[b],
                                          enc_bias[:, b:b + 1], pool, unpool))
        return jnp.concatenate(outs, axis=0)

    for l in range(NUM_LAYERS):   # TODO(synk): switch to lax.fori_loop at real layer counts
        lg = ln_g[l]                                                  # (3, E)
        lb = ln_b[l]

        # ---- self-attention (fused QKV, single-row in-kernel cache update) ----
        residual = hs
        qkv = jnp.dot(hs, qkv_w[l], preferred_element_type=jnp.float32) + qkv_b[l]
        q = qkv[:, 0:E] * scale
        k_new = qkv[:, E:2 * E]
        v_new = qkv[:, 2 * E:3 * E]
        self_out_refs[2 * l][...] = k_new[None]                      # (1, B, E) row store
        self_out_refs[2 * l + 1][...] = v_new[None]
        attn = self_mha(q, k_new, v_new, self_refs[2 * l], self_refs[2 * l + 1])
        attn = jnp.dot(attn, self_o_w[l], preferred_element_type=jnp.float32) + self_o_b[l]
        hs = _layer_norm(residual + attn, lg[0:1, :], lb[0:1, :])    # post_self_attn_layer_norm

        # ---- cross-attention (precomputed encoder K/V caches) ----
        residual = hs
        qc = (jnp.dot(hs, cross_q_w[l], preferred_element_type=jnp.float32)
              + cross_q_b[l]) * scale
        attn = cross_mha(qc, cross_refs[2 * l], cross_refs[2 * l + 1])
        attn = jnp.dot(attn, cross_o_w[l], preferred_element_type=jnp.float32) + cross_o_b[l]
        hs = _layer_norm(residual + attn, lg[1:2, :], lb[1:2, :])    # post_cross_attn_layer_norm

        # ---- ff_layer (fc1 -> gelu -> fc2, residual, post-LN) ----
        residual = hs
        x = jnp.dot(hs, fc1_w[l], preferred_element_type=jnp.float32) + fc1_b[l]
        x = jax.nn.gelu(x, approximate=True)
        x = jnp.dot(x, fc2_w[l], preferred_element_type=jnp.float32) + fc2_b[l]
        hs = _layer_norm(residual + x, lg[2:3, :], lb[2:3, :])

    # final_layer_norm is None for BART-style decoders; lm_head (vocab padded to 128 lanes)
    logits = jnp.dot(hs, lm_w[...], preferred_element_type=jnp.float32) + lm_b[...]
    logits_ref[...] = logits                                         # (B, VOCAB_PAD)


# -------------------- Seq2SeqDecoderWrapper.forward (jax) ---------------------
def seq2seq_decoder_wrapper_forward(params, *args):
    """use_attention_mask=True arg order, mirroring the torch wrapper.

    Returns (lm_logits, updated_self_kv_caches).  The torch module updates the
    self-attention caches in place; here the caches are updated in-kernel (single
    row DMA) and returned, aliased onto the inputs.
    """
    (input_ids, attention_mask, encoder_attention_mask,
     cache_position, block_tables, *kv_cache) = args
    # TODO(synk): block_tables-based paged-KV addressing is not implemented; a
    # contiguous per-batch self-attention cache (single block per sequence) is assumed.
    del block_tables

    L = NUM_LAYERS
    cross_kv = list(kv_cache[:2 * L])     # wrapper ordering: cross caches first
    self_kv = list(kv_cache[2 * L:])

    B, T = input_ids.shape
    ids = input_ids.astype(jnp.int32)
    cache_pos = jnp.asarray(cache_position, jnp.int32).reshape(1)

    # host-precomputed additive biases, (S, B)-oriented (kept off the kernel critical path)
    self_bias = jnp.where(attention_mask > 0, 0.0, NEG_INF).astype(jnp.float32).T
    enc_bias = jnp.where(encoder_attention_mask > 0, 0.0, NEG_INF).astype(jnp.float32).T

    param_inputs = [
        params["embed_tokens"], params["embed_positions"], params["emb_ln"],
        params["qkv_w"], params["qkv_b"], params["self_o_w"], params["self_o_b"],
        params["cross_q_w"], params["cross_q_b"], params["cross_o_w"], params["cross_o_b"],
        params["fc1_w"], params["fc1_b"], params["fc2_w"], params["fc2_b"],
        params["ln_g"], params["ln_b"], params["lm_head_w"], params["lm_head_b"],
        params["head_pool"], params["head_unpool"],
        self_bias, enc_bias,
    ]
    assert len(param_inputs) == _N_PARAMS

    def full_spec(shape):
        zeros = (0,) * len(shape)
        return pl.BlockSpec(shape, lambda i, ids_s, cp_s, _z=zeros: _z)

    in_specs = ([full_spec(a.shape) for a in param_inputs]
                + [full_spec(a.shape) for a in cross_kv]
                + [full_spec(a.shape) for a in self_kv])

    # self-KV outputs: only the row at cache_position is written (data-dependent index_map
    # on the scalar-prefetched cache_position); untouched rows persist via aliasing.
    row_spec = pl.BlockSpec((1, B, HIDDEN), lambda i, ids_s, cp_s: (cp_s[0], 0, 0))
    out_shape = ([jax.ShapeDtypeStruct((B, VOCAB_PAD), jnp.float32)]
                 + [jax.ShapeDtypeStruct(a.shape, a.dtype) for a in self_kv])
    out_specs = [full_spec((B, VOCAB_PAD))] + [row_spec for _ in self_kv]

    # Operand indices include the two scalar-prefetch arrays (ids, cache_pos).
    first_self = 2 + len(param_inputs) + len(cross_kv)
    io_aliases = {first_self + i: 1 + i for i in range(len(self_kv))}

    outs = pl.pallas_call(
        _fused_decode_kernel,
        out_shape=out_shape,
        grid_spec=pltpu.PrefetchScalarGridSpec(
            num_scalar_prefetch=2,
            grid=(1,),                      # single program; batch lives on sublanes
            in_specs=in_specs,
            out_specs=out_specs,
        ),
        input_output_aliases=io_aliases,
        compiler_params=pltpu.CompilerParams(
            dimension_semantics=("arbitrary",)),
    )(ids, cache_pos, *param_inputs, *cross_kv, *self_kv)

    logits = outs[0].reshape(B, TGT_LEN, VOCAB_PAD)[..., :VOCAB]
    new_self_kv = tuple(outs[1:])
    return logits, new_self_kv


# ----------------------------- pure-JAX reference ----------------------------
def _ref_ln(x, g, b, eps=1e-5):
    mu = jnp.mean(x, -1, keepdims=True)
    var = jnp.mean(jnp.square(x - mu), -1, keepdims=True)
    return (x - mu) * jax.lax.rsqrt(var + eps) * g + b


def _ref_attn(q, k, v, bias):
    # q (B,E) pre-scaled; k, v (S,B,E); bias (S,B) additive
    S = k.shape[0]
    qh = q.reshape(BATCH, NUM_HEADS, HEAD_DIM)
    kh = k.reshape(S, BATCH, NUM_HEADS, HEAD_DIM)
    vh = v.reshape(S, BATCH, NUM_HEADS, HEAD_DIM)
    s = jnp.einsum("bhd,sbhd->sbh", qh, kh) + bias[:, :, None]
    p = jax.nn.softmax(s, axis=0)
    o = jnp.einsum("sbh,sbhd->bhd", p, vh)
    return o.reshape(BATCH, HIDDEN)


def reference_forward(params, input_ids, attention_mask, encoder_attention_mask,
                      cache_position, kv_cache):
    E = HIDDEN
    scale = 1.0 / math.sqrt(HEAD_DIM)
    L = NUM_LAYERS
    cross_kv = kv_cache[:2 * L]                     # (B, ENC_LEN, E) each
    self_kv = list(kv_cache[2 * L:])                # (MAX_DEC, B, E) each
    pos = jnp.asarray(cache_position, jnp.int32)

    self_bias = jnp.where(attention_mask > 0, 0.0, NEG_INF).astype(jnp.float32).T
    enc_bias = jnp.where(encoder_attention_mask > 0, 0.0, NEG_INF).astype(jnp.float32).T

    hs = params["embed_tokens"][input_ids[:, 0]]
    hs = hs + params["embed_positions"][pos][None, :]
    hs = _ref_ln(hs, params["emb_ln"][0:1], params["emb_ln"][1:2])

    new_self = []
    for l in range(L):
        lg, lb = params["ln_g"][l], params["ln_b"][l]

        residual = hs
        qkv = hs @ params["qkv_w"][l] + params["qkv_b"][l]
        q = qkv[:, :E] * scale
        k_new = qkv[:, E:2 * E]
        v_new = qkv[:, 2 * E:]
        k_full = self_kv[2 * l].at[pos].set(k_new)
        v_full = self_kv[2 * l + 1].at[pos].set(v_new)
        new_self += [k_full, v_full]
        attn = _ref_attn(q, k_full, v_full, self_bias)
        attn = attn @ params["self_o_w"][l] + params["self_o_b"][l]
        hs = _ref_ln(residual + attn, lg[0:1], lb[0:1])

        residual = hs
        qc = (hs @ params["cross_q_w"][l] + params["cross_q_b"][l]) * scale
        ck = jnp.transpose(cross_kv[2 * l], (1, 0, 2))      # (ENC_LEN, B, E)
        cv = jnp.transpose(cross_kv[2 * l + 1], (1, 0, 2))
        attn = _ref_attn(qc, ck, cv, enc_bias)
        attn = attn @ params["cross_o_w"][l] + params["cross_o_b"][l]
        hs = _ref_ln(residual + attn, lg[1:2], lb[1:2])

        residual = hs
        x = hs @ params["fc1_w"][l] + params["fc1_b"][l]
        x = jax.nn.gelu(x, approximate=True)
        x = x @ params["fc2_w"][l] + params["fc2_b"][l]
        hs = _ref_ln(residual + x, lg[2:3], lb[2:3])

    logits = hs @ params["lm_head_w"] + params["lm_head_b"]
    return logits[:, None, :VOCAB], new_self


# ------------------------------ parameter init -------------------------------
def init_params(key):
    keys = iter(jax.random.split(key, 24))

    def w(shape, scale=0.05):
        return (scale * jax.random.normal(next(keys), shape)).astype(jnp.float32)

    L, E, F = NUM_LAYERS, HIDDEN, FFN
    lm_w = w((E, VOCAB), scale=0.3)
    lm_w_pad = jnp.zeros((E, VOCAB_PAD), jnp.float32).at[:, :VOCAB].set(lm_w)
    head_ids = jnp.arange(E) // HEAD_DIM
    pool = (head_ids[:, None] == jnp.arange(NUM_HEADS)[None, :]).astype(jnp.float32)
    return {
        "embed_tokens": w((VOCAB, E), scale=0.5),
        "embed_positions": w((MAX_DEC, E), scale=0.5),
        "emb_ln": jnp.stack([jnp.ones((E,)), jnp.zeros((E,))]).astype(jnp.float32),
        "qkv_w": w((L, E, 3 * E)),            # fused Q/K/V projection per layer
        "qkv_b": w((L, 1, 3 * E), scale=0.02),
        "self_o_w": w((L, E, E)),
        "self_o_b": w((L, 1, E), scale=0.02),
        "cross_q_w": w((L, E, E)),
        "cross_q_b": w((L, 1, E), scale=0.02),
        "cross_o_w": w((L, E, E)),
        "cross_o_b": w((L, 1, E), scale=0.02),
        "fc1_w": w((L, E, F)),
        "fc1_b": w((L, 1, F), scale=0.02),
        "fc2_w": w((L, F, E)),
        "fc2_b": w((L, 1, E), scale=0.02),
        "ln_g": jnp.ones((L, 3, E), jnp.float32),   # [self, cross, ff] post-LN gammas
        "ln_b": jnp.zeros((L, 3, E), jnp.float32),
        "lm_head_w": lm_w_pad,                      # (E, VOCAB_PAD), lane-dense output
        "lm_head_b": jnp.zeros((1, VOCAB_PAD), jnp.float32),
        "head_pool": pool,                          # (E, H) head-segment selector
        "head_unpool": pool.T,                      # (H, E)
    }


# ----------------------------------- main ------------------------------------
if __name__ == "__main__":
    key = jax.random.PRNGKey(0)
    pkey, dkey = jax.random.split(key)
    params = init_params(pkey)

    ks = jax.random.split(dkey, 2 + 4 * NUM_LAYERS)
    input_ids = jax.random.randint(ks[0], (BATCH, TGT_LEN), 0, VOCAB)
    cache_position = jnp.array(3, dtype=jnp.int32)
    attention_mask = (jnp.arange(MAX_DEC)[None, :] <= cache_position).astype(jnp.float32)
    attention_mask = jnp.broadcast_to(attention_mask, (BATCH, MAX_DEC))
    encoder_attention_mask = jnp.ones((BATCH, ENC_LEN), jnp.float32)
    block_tables = jnp.zeros((BATCH, 1), jnp.int32)

    def rand(k, shape):
        return (0.3 * jax.random.normal(k, shape)).astype(jnp.float32)

    # kv_cache ordering matches the wrapper: cross caches first, then self caches.
    # cross: (B, ENC_LEN, E) (read-only); self: (MAX_DEC, B, E) (sequence-major so the
    # decode-step update is a single lane-dense row DMA).
    kv_list = []
    i = 1
    for _ in range(NUM_LAYERS):
        kv_list.append(rand(ks[i], (BATCH, ENC_LEN, HIDDEN))); i += 1
        kv_list.append(rand(ks[i], (BATCH, ENC_LEN, HIDDEN))); i += 1
    for _ in range(NUM_LAYERS):
        kv_list.append(rand(ks[i], (MAX_DEC, BATCH, HIDDEN))); i += 1
        kv_list.append(rand(ks[i], (MAX_DEC, BATCH, HIDDEN))); i += 1

    fwd = jax.jit(seq2seq_decoder_wrapper_forward)
    logits, new_self_kv = fwd(params, input_ids, attention_mask,
                              encoder_attention_mask, cache_position,
                              block_tables, *kv_list)
    jax.block_until_ready(logits)

    with jax.default_matmul_precision("highest"):
        ref_logits, ref_self = reference_forward(
            params, input_ids, attention_mask, encoder_attention_mask,
            cache_position, kv_list)

    assert logits.shape == (BATCH, TGT_LEN, VOCAB)
    assert bool(jnp.all(jnp.isfinite(logits)))
    assert bool(jnp.allclose(logits, ref_logits, atol=5e-2, rtol=5e-2)), (
        float(jnp.max(jnp.abs(logits - ref_logits))))
    assert len(new_self_kv) == 2 * NUM_LAYERS

    pos = int(cache_position)
    for l in range(2 * NUM_LAYERS):
        old = kv_list[2 * NUM_LAYERS + l]
        new = new_self_kv[l]
        # rows other than cache_position must be preserved (aliased, never DMA'd)
        old_rest = jnp.concatenate([old[:pos], old[pos + 1:]], axis=0)
        new_rest = jnp.concatenate([new[:pos], new[pos + 1:]], axis=0)
        assert bool(jnp.array_equal(new_rest, old_rest))
        # row at cache_position must hold the freshly projected K/V
        assert bool(jnp.allclose(new[pos], ref_self[l][pos], atol=5e-2, rtol=5e-2))

    print("KERNEL_OK")
</pallas_src>

<mosaic_0001>
module attributes {stable_mosaic.version = 11 : i64} {
  func.func @_fused_decode_kernel(%arg0: i32, %arg1: memref<2x1xi32, #tpu.memory_space<smem>>, %arg2: memref<1xi32, #tpu.memory_space<smem>>, %arg3: memref<64x32xf32, #tpu.memory_space<vmem>>, %arg4: memref<8x32xf32, #tpu.memory_space<vmem>>, %arg5: memref<2x32xf32, #tpu.memory_space<vmem>>, %arg6: memref<2x32x96xf32, #tpu.memory_space<vmem>>, %arg7: memref<2x1x96xf32, #tpu.memory_space<vmem>>, %arg8: memref<2x32x32xf32, #tpu.memory_space<vmem>>, %arg9: memref<2x1x32xf32, #tpu.memory_space<vmem>>, %arg10: memref<2x32x32xf32, #tpu.memory_space<vmem>>, %arg11: memref<2x1x32xf32, #tpu.memory_space<vmem>>, %arg12: memref<2x32x32xf32, #tpu.memory_space<vmem>>, %arg13: memref<2x1x32xf32, #tpu.memory_space<vmem>>, %arg14: memref<2x32x64xf32, #tpu.memory_space<vmem>>, %arg15: memref<2x1x64xf32, #tpu.memory_space<vmem>>, %arg16: memref<2x64x32xf32, #tpu.memory_space<vmem>>, %arg17: memref<2x1x32xf32, #tpu.memory_space<vmem>>, %arg18: memref<2x3x32xf32, #tpu.memory_space<vmem>>, %arg19: memref<2x3x32xf32, #tpu.memory_space<vmem>>, %arg20: memref<32x128xf32, #tpu.memory_space<vmem>>, %arg21: memref<1x128xf32, #tpu.memory_space<vmem>>, %arg22: memref<32x4xf32, #tpu.memory_space<vmem>>, %arg23: memref<4x32xf32, #tpu.memory_space<vmem>>, %arg24: memref<8x2xf32, #tpu.memory_space<vmem>>, %arg25: memref<16x2xf32, #tpu.memory_space<vmem>>, %arg26: memref<2x16x32xf32, #tpu.memory_space<vmem>>, %arg27: memref<2x16x32xf32, #tpu.memory_space<vmem>>, %arg28: memref<2x16x32xf32, #tpu.memory_space<vmem>>, %arg29: memref<2x16x32xf32, #tpu.memory_space<vmem>>, %arg30: memref<8x2x32xf32, #tpu.memory_space<vmem>>, %arg31: memref<8x2x32xf32, #tpu.memory_space<vmem>>, %arg32: memref<8x2x32xf32, #tpu.memory_space<vmem>>, %arg33: memref<8x2x32xf32, #tpu.memory_space<vmem>>, %arg34: memref<2x128xf32, #tpu.memory_space<vmem>>, %arg35: memref<1x2x32xf32, #tpu.memory_space<vmem>>, %arg36: memref<1x2x32xf32, #tpu.memory_space<vmem>>, %arg37: memref<1x2x32xf32, #tpu.memory_space<vmem>>, %arg38: memref<1x2x32xf32, #tpu.memory_space<vmem>>) attributes {dimension_semantics = [#tpu.dimension_semantics<arbitrary>], iteration_bounds = array<i64: 1>, scalar_prefetch = 2 : i64, scratch_operands = 0 : i64, tpu.core_type = #tpu.core_type<tc>, window_params = [{pipeline_mode = #tpu.pipeline_mode<synchronous>, transform_indices = @transform_0, window_bounds = array<i64: 64, 32>}, {pipeline_mode = #tpu.pipeline_mode<synchronous>, transform_indices = @transform_1, window_bounds = array<i64: 8, 32>}, {pipeline_mode = #tpu.pipeline_mode<synchronous>, transform_indices = @transform_2, window_bounds = array<i64: 2, 32>}, {pipeline_mode = #tpu.pipeline_mode<synchronous>, transform_indices = @transform_3, window_bounds = array<i64: 2, 32, 96>}, {pipeline_mode = #tpu.pipeline_mode<synchronous>, transform_indices = @transform_4, window_bounds = array<i64: 2, 1, 96>}, {pipeline_mode = #tpu.pipeline_mode<synchronous>, transform_indices = @transform_5, window_bounds = array<i64: 2, 32, 32>}, {pipeline_mode = #tpu.pipeline_mode<synchronous>, transform_indices = @transform_6, window_bounds = array<i64: 2, 1, 32>}, {pipeline_mode = #tpu.pipeline_mode<synchronous>, transform_indices = @transform_7, window_bounds = array<i64: 2, 32, 32>}, {pipeline_mode = #tpu.pipeline_mode<synchronous>, transform_indices = @transform_8, window_bounds = array<i64: 2, 1, 32>}, {pipeline_mode = #tpu.pipeline_mode<synchronous>, transform_indices = @transform_9, window_bounds = array<i64: 2, 32, 32>}, {pipeline_mode = #tpu.pipeline_mode<synchronous>, transform_indices = @transform_10, window_bounds = array<i64: 2, 1, 32>}, {pipeline_mode = #tpu.pipeline_mode<synchronous>, transform_indices = @transform_11, window_bounds = array<i64: 2, 32, 64>}, {pipeline_mode = #tpu.pipeline_mode<synchronous>, transform_indices = @transform_12, window_bounds = array<i64: 2, 1, 64>}, {pipeline_mode = #tpu.pipeline_mode<synchronous>, transform_indices = @transform_13, window_bounds = array<i64: 2, 64, 32>}, {pipeline_mode = #tpu.pipeline_mode<synchronous>, transform_indices = @transform_14, window_bounds = array<i64: 2, 1, 32>}, {pipeline_mode = #tpu.pipeline_mode<synchronous>, transform_indices = @transform_15, window_bounds = array<i64: 2, 3, 32>}, {pipeline_mode = #tpu.pipeline_mode<synchronous>, transform_indices = @transform_16, window_bounds = array<i64: 2, 3, 32>}, {pipeline_mode = #tpu.pipeline_mode<synchronous>, transform_indices = @transform_17, window_bounds = array<i64: 32, 128>}, {pipeline_mode = #tpu.pipeline_mode<synchronous>, transform_indices = @transform_18, window_bounds = array<i64: 1, 128>}, {pipeline_mode = #tpu.pipeline_mode<synchronous>, transform_indices = @transform_19, window_bounds = array<i64: 32, 4>}, {pipeline_mode = #tpu.pipeline_mode<synchronous>, transform_indices = @transform_20, window_bounds = array<i64: 4, 32>}, {pipeline_mode = #tpu.pipeline_mode<synchronous>, transform_indices = @transform_21, window_bounds = array<i64: 8, 2>}, {pipeline_mode = #tpu.pipeline_mode<synchronous>, transform_indices = @transform_22, window_bounds = array<i64: 16, 2>}, {pipeline_mode = #tpu.pipeline_mode<synchronous>, transform_indices = @transform_23, window_bounds = array<i64: 2, 16, 32>}, {pipeline_mode = #tpu.pipeline_mode<synchronous>, transform_indices = @transform_24, window_bounds = array<i64: 2, 16, 32>}, {pipeline_mode = #tpu.pipeline_mode<synchronous>, transform_indices = @transform_25, window_bounds = array<i64: 2, 16, 32>}, {pipeline_mode = #tpu.pipeline_mode<synchronous>, transform_indices = @transform_26, window_bounds = array<i64: 2, 16, 32>}, {pipeline_mode = #tpu.pipeline_mode<synchronous>, transform_indices = @transform_27, window_bounds = array<i64: 8, 2, 32>}, {pipeline_mode = #tpu.pipeline_mode<synchronous>, transform_indices = @transform_28, window_bounds = array<i64: 8, 2, 32>}, {pipeline_mode = #tpu.pipeline_mode<synchronous>, transform_indices = @transform_29, window_bounds = array<i64: 8, 2, 32>}, {pipeline_mode = #tpu.pipeline_mode<synchronous>, transform_indices = @transform_30, window_bounds = array<i64: 8, 2, 32>}, {pipeline_mode = #tpu.pipeline_mode<synchronous>, transform_indices = @transform_31, window_bounds = array<i64: 2, 128>}, {transform_indices = @transform_32, window_bounds = array<i64: 1, 2, 32>}, {transform_indices = @transform_33, window_bounds = array<i64: 1, 2, 32>}, {transform_indices = @transform_34, window_bounds = array<i64: 1, 2, 32>}, {transform_indices = @transform_35, window_bounds = array<i64: 1, 2, 32>}]} {
    %c0 = arith.constant 0 : index
    %0 = memref.load %arg2[%c0] : memref<1xi32, #tpu.memory_space<smem>>
    %c0_0 = arith.constant 0 : index
    %c0_1 = arith.constant 0 : index
    %1 = vector.load %arg22[%c0_0, %c0_1] : memref<32x4xf32, #tpu.memory_space<vmem>>, vector<32x4xf32>
    %c0_2 = arith.constant 0 : index
    %c0_3 = arith.constant 0 : index
    %2 = vector.load %arg23[%c0_2, %c0_3] : memref<4x32xf32, #tpu.memory_space<vmem>>, vector<4x32xf32>
    %c0_4 = arith.constant 0 : index
    %c0_5 = arith.constant 0 : index
    %3 = vector.load %arg24[%c0_4, %c0_5] : memref<8x2xf32, #tpu.memory_space<vmem>>, vector<8x2xf32>
    %c0_6 = arith.constant 0 : index
    %c0_7 = arith.constant 0 : index
    %4 = vector.load %arg25[%c0_6, %c0_7] : memref<16x2xf32, #tpu.memory_space<vmem>>, vector<16x2xf32>
    %c0_8 = arith.constant 0 : index
    %c0_9 = arith.constant 0 : index
    %5 = memref.load %arg1[%c0_8, %c0_9] : memref<2x1xi32, #tpu.memory_space<smem>>
    %6 = arith.index_cast %5 : i32 to index
    %c0_10 = arith.constant 0 : index
    %7 = vector.load %arg3[%6, %c0_10] : memref<64x32xf32, #tpu.memory_space<vmem>>, vector<1x32xf32>
    %c1 = arith.constant 1 : index
    %c0_11 = arith.constant 0 : index
    %8 = memref.load %arg1[%c1, %c0_11] : memref<2x1xi32, #tpu.memory_space<smem>>
    %9 = arith.index_cast %8 : i32 to index
    %c0_12 = arith.constant 0 : index
    %10 = vector.load %arg3[%9, %c0_12] : memref<64x32xf32, #tpu.memory_space<vmem>>, vector<1x32xf32>
    %11 = tpu.concatenate %7, %10 in 0 : vector<1x32xf32>, vector<1x32xf32> -> vector<2x32xf32>
    %12 = arith.index_cast %0 : i32 to index
    %c0_13 = arith.constant 0 : index
    %13 = vector.load %arg4[%12, %c0_13] : memref<8x32xf32, #tpu.memory_space<vmem>>, vector<1x32xf32>
    %14 = vector.broadcast %13 : vector<1x32xf32> to vector<2x32xf32>
    %15 = arith.addf %11, %14 : vector<2x32xf32>
    %c0_14 = arith.constant 0 : index
    %c0_15 = arith.constant 0 : index
    %16 = vector.load %arg5[%c0_14, %c0_15] : memref<2x32xf32, #tpu.memory_space<vmem>>, vector<1x32xf32>
    %c1_16 = arith.constant 1 : index
    %c0_17 = arith.constant 0 : index
    %17 = vector.load %arg5[%c1_16, %c0_17] : memref<2x32xf32, #tpu.memory_space<vmem>>, vector<1x32xf32>
    %cst = arith.constant dense<0.000000e+00> : vector<2xf32>
    %18 = vector.multi_reduction <add>, %15, %cst [1] : vector<2x32xf32> to vector<2xf32>
    %19 = vector.shape_cast %18 : vector<2xf32> to vector<2x1xf32>
    %cst_18 = arith.constant 3.200000e+01 : f32
    %20 = vector.broadcast %cst_18 : f32 to vector<2x1xf32>
    %21 = arith.divf %19, %20 : vector<2x1xf32>
    %22 = vector.broadcast %21 : vector<2x1xf32> to vector<2x32xf32>
    %23 = arith.subf %15, %22 : vector<2x32xf32>
    %24 = arith.mulf %23, %23 : vector<2x32xf32>
    %cst_19 = arith.constant dense<0.000000e+00> : vector<2xf32>
    %25 = vector.multi_reduction <add>, %24, %cst_19 [1] : vector<2x32xf32> to vector<2xf32>
    %26 = vector.shape_cast %25 : vector<2xf32> to vector<2x1xf32>
    %cst_20 = arith.constant 3.200000e+01 : f32
    %27 = vector.broadcast %cst_20 : f32 to vector<2x1xf32>
    %28 = arith.divf %26, %27 : vector<2x1xf32>
    %29 = vector.broadcast %21 : vector<2x1xf32> to vector<2x32xf32>
    %30 = arith.subf %15, %29 : vector<2x32xf32>
    %cst_21 = arith.constant 9.99999974E-6 : f32
    %31 = vector.broadcast %cst_21 : f32 to vector<2x1xf32>
    %32 = arith.addf %28, %31 : vector<2x1xf32>
    %33 = math.rsqrt %32 : vector<2x1xf32>
    %34 = vector.broadcast %33 : vector<2x1xf32> to vector<2x32xf32>
    %35 = arith.mulf %30, %34 : vector<2x32xf32>
    %36 = vector.broadcast %16 : vector<1x32xf32> to vector<2x32xf32>
    %37 = arith.mulf %35, %36 : vector<2x32xf32>
    %38 = vector.broadcast %17 : vector<1x32xf32> to vector<2x32xf32>
    %39 = arith.addf %37, %38 : vector<2x32xf32>
    %40 = tpu.iota {dimensions = array<i32: 0>} : vector<8x1xi32>
    %41 = vector.broadcast %0 : i32 to vector<8x1xi32>
    %42 = arith.cmpi eq, %40, %41 : vector<8x1xi32>
    %c0_22 = arith.constant 0 : index
    %c0_23 = arith.constant 0 : index
    %c0_24 = arith.constant 0 : index
    %43 = vector.load %arg18[%c0_22, %c0_23, %c0_24] : memref<2x3x32xf32, #tpu.memory_space<vmem>>, vector<1x3x32xf32>
    %44 = vector.shape_cast %43 : vector<1x3x32xf32> to vector<3x32xf32>
    %c0_25 = arith.constant 0 : index
    %c0_26 = arith.constant 0 : index
    %c0_27 = arith.constant 0 : index
    %45 = vector.load %arg19[%c0_25, %c0_26, %c0_27] : memref<2x3x32xf32, #tpu.memory_space<vmem>>, vector<1x3x32xf32>
    %46 = vector.shape_cast %45 : vector<1x3x32xf32> to vector<3x32xf32>
    %c0_28 = arith.constant 0 : index
    %c0_29 = arith.constant 0 : index
    %c0_30 = arith.constant 0 : index
    %47 = vector.load %arg6[%c0_28, %c0_29, %c0_30] : memref<2x32x96xf32, #tpu.memory_space<vmem>>, vector<1x32x96xf32>
    %48 = vector.shape_cast %47 : vector<1x32x96xf32> to vector<32x96xf32>
    %cst_31 = arith.constant dense<0.000000e+00> : vector<2x96xf32>
    %49 = tpu.matmul %39, %48, %cst_31 {dimension_numbers = #tpu.dot_dimension_numbers<[1], [0], [0], [1], [0, 0, 1, 1], [], []>} : vector<2x32xf32>, vector<32x96xf32>, vector<2x96xf32> -> vector<2x96xf32>
    %c0_32 = arith.constant 0 : index
    %c0_33 = arith.constant 0 : index
    %c0_34 = arith.constant 0 : index
    %50 = vector.load %arg7[%c0_32, %c0_33, %c0_34] : memref<2x1x96xf32, #tpu.memory_space<vmem>>, vector<1x1x96xf32>
    %51 = vector.shape_cast %50 : vector<1x1x96xf32> to vector<1x96xf32>
    %52 = vector.broadcast %51 : vector<1x96xf32> to vector<2x96xf32>
    %53 = arith.addf %49, %52 : vector<2x96xf32>
    %54 = vector.extract_strided_slice %53 {offsets = [0, 0], sizes = [2, 32], strides = [1, 1]} : vector<2x96xf32> to vector<2x32xf32>
    %cst_35 = arith.constant 0.353553385 : f32
    %55 = vector.broadcast %cst_35 : f32 to vector<2x32xf32>
    %56 = arith.mulf %54, %55 : vector<2x32xf32>
    %57 = vector.extract_strided_slice %53 {offsets = [0, 32], sizes = [2, 32], strides = [1, 1]} : vector<2x96xf32> to vector<2x32xf32>
    %58 = vector.extract_strided_slice %53 {offsets = [0, 64], sizes = [2, 32], strides = [1, 1]} : vector<2x96xf32> to vector<2x32xf32>
    %59 = vector.shape_cast %57 : vector<2x32xf32> to vector<1x2x32xf32>
    %c0_36 = arith.constant 0 : index
    %c0_37 = arith.constant 0 : index
    %c0_38 = arith.constant 0 : index
    %60 = vector.load %arg35[%c0_36, %c0_37, %c0_38] : memref<1x2x32xf32, #tpu.memory_space<vmem>>, vector<1x2x32xf32>
    tpu.vector_store %arg35[%c0_36, %c0_37, %c0_38], %59 {strides = array<i32>} : memref<1x2x32xf32, #tpu.memory_space<vmem>>, vector<1x2x32xf32>,
    %61 = vector.shape_cast %58 : vector<2x32xf32> to vector<1x2x32xf32>
    %c0_39 = arith.constant 0 : index
    %c0_40 = arith.constant 0 : index
    %c0_41 = arith.constant 0 : index
    %62 = vector.load %arg36[%c0_39, %c0_40, %c0_41] : memref<1x2x32xf32, #tpu.memory_space<vmem>>, vector<1x2x32xf32>
    tpu.vector_store %arg36[%c0_39, %c0_40, %c0_41], %61 {strides = array<i32>} : memref<1x2x32xf32, #tpu.memory_space<vmem>>, vector<1x2x32xf32>,
    %63 = vector.extract_strided_slice %57 {offsets = [0, 0], sizes = [1, 32], strides = [1, 1]} : vector<2x32xf32> to vector<1x32xf32>
    %c0_42 = arith.constant 0 : index
    %c0_43 = arith.constant 0 : index
    %c0_44 = arith.constant 0 : index
    %64 = vector.load %arg30[%c0_42, %c0_43, %c0_44] : memref<8x2x32xf32, #tpu.memory_space<vmem>>, vector<8x1x32xf32>
    %65 = vector.shape_cast %64 : vector<8x1x32xf32> to vector<8x32xf32>
    %66 = vector.shape_cast %42 : vector<8x1xi1> to vector<8x1xi1>
    %67 = vector.broadcast %66 : vector<8x1xi1> to vector<8x32xi1>
    %68 = vector.shape_cast %63 : vector<1x32xf32> to vector<1x32xf32>
    %69 = vector.broadcast %68 : vector<1x32xf32> to vector<8x32xf32>
    %70 = arith.select %67, %69, %65 : vector<8x32xi1>, vector<8x32xf32>
    %71 = vector.extract_strided_slice %58 {offsets = [0, 0], sizes = [1, 32], strides = [1, 1]} : vector<2x32xf32> to vector<1x32xf32>
    %c0_45 = arith.constant 0 : index
    %c0_46 = arith.constant 0 : index
    %c0_47 = arith.constant 0 : index
    %72 = vector.load %arg31[%c0_45, %c0_46, %c0_47] : memref<8x2x32xf32, #tpu.memory_space<vmem>>, vector<8x1x32xf32>
    %73 = vector.shape_cast %72 : vector<8x1x32xf32> to vector<8x32xf32>
    %74 = vector.shape_cast %42 : vector<8x1xi1> to vector<8x1xi1>
    %75 = vector.broadcast %74 : vector<8x1xi1> to vector<8x32xi1>
    %76 = vector.shape_cast %71 : vector<1x32xf32> to vector<1x32xf32>
    %77 = vector.broadcast %76 : vector<1x32xf32> to vector<8x32xf32>
    %78 = arith.select %75, %77, %73 : vector<8x32xi1>, vector<8x32xf32>
    %79 = vector.extract_strided_slice %56 {offsets = [0, 0], sizes = [1, 32], strides = [1, 1]} : vector<2x32xf32> to vector<1x32xf32>
    %80 = vector.extract_strided_slice %3 {offsets = [0, 0], sizes = [8, 1], strides = [1, 1]} : vector<8x2xf32> to vector<8x1xf32>
    %81 = vector.broadcast %79 : vector<1x32xf32> to vector<8x32xf32>
    %82 = arith.mulf %70, %81 : vector<8x32xf32>
    %cst_48 = arith.constant dense<0.000000e+00> : vector<8x4xf32>
    %83 = tpu.matmul %82, %1, %cst_48 {dimension_numbers = #tpu.dot_dimension_numbers<[1], [0], [0], [1], [0, 0, 1, 1], [], []>} : vector<8x32xf32>, vector<32x4xf32>, vector<8x4xf32> -> vector<8x4xf32>
    %84 = vector.broadcast %80 : vector<8x1xf32> to vector<8x4xf32>
    %85 = arith.addf %83, %84 : vector<8x4xf32>
    %cst_49 = arith.constant dense<0xFF800000> : vector<4xf32>
    %86 = vector.multi_reduction <maximumf>, %85, %cst_49 [0] : vector<8x4xf32> to vector<4xf32>
    %87 = vector.shape_cast %86 : vector<4xf32> to vector<1x4xf32>
    %88 = vector.broadcast %87 : vector<1x4xf32> to vector<8x4xf32>
    %89 = arith.subf %85, %88 : vector<8x4xf32>
    %90 = math.exp %89 : vector<8x4xf32>
    %cst_50 = arith.constant dense<0.000000e+00> : vector<4xf32>
    %91 = vector.multi_reduction <add>, %90, %cst_50 [0] : vector<8x4xf32> to vector<4xf32>
    %92 = vector.shape_cast %91 : vector<4xf32> to vector<1x4xf32>
    %93 = tpu.reciprocal %92 {approx = true} : vector<1x4xf32> -> vector<1x4xf32>
    %94 = vector.broadcast %93 : vector<1x4xf32> to vector<8x4xf32>
    %95 = arith.mulf %90, %94 : vector<8x4xf32>
    %cst_51 = arith.constant dense<0.000000e+00> : vector<8x32xf32>
    %96 = tpu.matmul %95, %2, %cst_51 {dimension_numbers = #tpu.dot_dimension_numbers<[1], [0], [0], [1], [0, 0, 1, 1], [], []>} : vector<8x4xf32>, vector<4x32xf32>, vector<8x32xf32> -> vector<8x32xf32>
    %97 = arith.mulf %96, %78 : vector<8x32xf32>
    %cst_52 = arith.constant dense<0.000000e+00> : vector<32xf32>
    %98 = vector.multi_reduction <add>, %97, %cst_52 [0] : vector<8x32xf32> to vector<32xf32>
    %99 = vector.shape_cast %98 : vector<32xf32> to vector<1x32xf32>
    %100 = vector.extract_strided_slice %57 {offsets = [1, 0], sizes = [1, 32], strides = [1, 1]} : vector<2x32xf32> to vector<1x32xf32>
    %c0_53 = arith.constant 0 : index
    %c1_54 = arith.constant 1 : index
    %c0_55 = arith.constant 0 : index
    %101 = vector.load %arg30[%c0_53, %c1_54, %c0_55] : memref<8x2x32xf32, #tpu.memory_space<vmem>>, vector<8x1x32xf32>
    %102 = vector.shape_cast %101 : vector<8x1x32xf32> to vector<8x32xf32>
    %103 = vector.shape_cast %42 : vector<8x1xi1> to vector<8x1xi1>
    %104 = vector.broadcast %103 : vector<8x1xi1> to vector<8x32xi1>
    %105 = vector.shape_cast %100 : vector<1x32xf32> to vector<1x32xf32>
    %106 = vector.broadcast %105 : vector<1x32xf32> to vector<8x32xf32>
    %107 = arith.select %104, %106, %102 : vector<8x32xi1>, vector<8x32xf32>
    %108 = vector.extract_strided_slice %58 {offsets = [1, 0], sizes = [1, 32], strides = [1, 1]} : vector<2x32xf32> to vector<1x32xf32>
    %c0_56 = arith.constant 0 : index
    %c1_57 = arith.constant 1 : index
    %c0_58 = arith.constant 0 : index
    %109 = vector.load %arg31[%c0_56, %c1_57, %c0_58] : memref<8x2x32xf32, #tpu.memory_space<vmem>>, vector<8x1x32xf32>
    %110 = vector.shape_cast %109 : vector<8x1x32xf32> to vector<8x32xf32>
    %111 = vector.shape_cast %42 : vector<8x1xi1> to vector<8x1xi1>
    %112 = vector.broadcast %111 : vector<8x1xi1> to vector<8x32xi1>
    %113 = vector.shape_cast %108 : vector<1x32xf32> to vector<1x32xf32>
    %114 = vector.broadcast %113 : vector<1x32xf32> to vector<8x32xf32>
    %115 = arith.select %112, %114, %110 : vector<8x32xi1>, vector<8x32xf32>
    %116 = vector.extract_strided_slice %56 {offsets = [1, 0], sizes = [1, 32], strides = [1, 1]} : vector<2x32xf32> to vector<1x32xf32>
    %117 = vector.extract_strided_slice %3 {offsets = [0, 1], sizes = [8, 1], strides = [1, 1]} : vector<8x2xf32> to vector<8x1xf32>
    %118 = vector.broadcast %116 : vector<1x32xf32> to vector<8x32xf32>
    %119 = arith.mulf %107, %118 : vector<8x32xf32>
    %cst_59 = arith.constant dense<0.000000e+00> : vector<8x4xf32>
    %120 = tpu.matmul %119, %1, %cst_59 {dimension_numbers = #tpu.dot_dimension_numbers<[1], [0], [0], [1], [0, 0, 1, 1], [], []>} : vector<8x32xf32>, vector<32x4xf32>, vector<8x4xf32> -> vector<8x4xf32>
    %121 = vector.broadcast %117 : vector<8x1xf32> to vector<8x4xf32>
    %122 = arith.addf %120, %121 : vector<8x4xf32>
    %cst_60 = arith.constant dense<0xFF800000> : vector<4xf32>
    %123 = vector.multi_reduction <maximumf>, %122, %cst_60 [0] : vector<8x4xf32> to vector<4xf32>
    %124 = vector.shape_cast %123 : vector<4xf32> to vector<1x4xf32>
    %125 = vector.broadcast %124 : vector<1x4xf32> to vector<8x4xf32>
    %126 = arith.subf %122, %125 : vector<8x4xf32>
    %127 = math.exp %126 : vector<8x4xf32>
    %cst_61 = arith.constant dense<0.000000e+00> : vector<4xf32>
    %128 = vector.multi_reduction <add>, %127, %cst_61 [0] : vector<8x4xf32> to vector<4xf32>
    %129 = vector.shape_cast %128 : vector<4xf32> to vector<1x4xf32>
    %130 = tpu.reciprocal %129 {approx = true} : vector<1x4xf32> -> vector<1x4xf32>
    %131 = vector.broadcast %130 : vector<1x4xf32> to vector<8x4xf32>
    %132 = arith.mulf %127, %131 : vector<8x4xf32>
    %cst_62 = arith.constant dense<0.000000e+00> : vector<8x32xf32>
    %133 = tpu.matmul %132, %2, %cst_62 {dimension_numbers = #tpu.dot_dimension_numbers<[1], [0], [0], [1], [0, 0, 1, 1], [], []>} : vector<8x4xf32>, vector<4x32xf32>, vector<8x32xf32> -> vector<8x32xf32>
    %134 = arith.mulf %133, %115 : vector<8x32xf32>
    %cst_63 = arith.constant dense<0.000000e+00> : vector<32xf32>
    %135 = vector.multi_reduction <add>, %134, %cst_63 [0] : vector<8x32xf32> to vector<32xf32>
    %136 = vector.shape_cast %135 : vector<32xf32> to vector<1x32xf32>
    %137 = tpu.concatenate %99, %136 in 0 : vector<1x32xf32>, vector<1x32xf32> -> vector<2x32xf32>
    %c0_64 = arith.constant 0 : index
    %c0_65 = arith.constant 0 : index
    %c0_66 = arith.constant 0 : index
    %138 = vector.load %arg8[%c0_64, %c0_65, %c0_66] : memref<2x32x32xf32, #tpu.memory_space<vmem>>, vector<1x32x32xf32>
    %139 = vector.shape_cast %138 : vector<1x32x32xf32> to vector<32x32xf32>
    %cst_67 = arith.constant dense<0.000000e+00> : vector<2x32xf32>
    %140 = tpu.matmul %137, %139, %cst_67 {dimension_numbers = #tpu.dot_dimension_numbers<[1], [0], [0], [1], [0, 0, 1, 1], [], []>} : vector<2x32xf32>, vector<32x32xf32>, vector<2x32xf32> -> vector<2x32xf32>
    %c0_68 = arith.constant 0 : index
    %c0_69 = arith.constant 0 : index
    %c0_70 = arith.constant 0 : index
    %141 = vector.load %arg9[%c0_68, %c0_69, %c0_70] : memref<2x1x32xf32, #tpu.memory_space<vmem>>, vector<1x1x32xf32>
    %142 = vector.shape_cast %141 : vector<1x1x32xf32> to vector<1x32xf32>
    %143 = vector.broadcast %142 : vector<1x32xf32> to vector<2x32xf32>
    %144 = arith.addf %140, %143 : vector<2x32xf32>
    %145 = arith.addf %39, %144 : vector<2x32xf32>
    %146 = vector.extract_strided_slice %44 {offsets = [0, 0], sizes = [1, 32], strides = [1, 1]} : vector<3x32xf32> to vector<1x32xf32>
    %147 = vector.extract_strided_slice %46 {offsets = [0, 0], sizes = [1, 32], strides = [1, 1]} : vector<3x32xf32> to vector<1x32xf32>
    %cst_71 = arith.constant dense<0.000000e+00> : vector<2xf32>
    %148 = vector.multi_reduction <add>, %145, %cst_71 [1] : vector<2x32xf32> to vector<2xf32>
    %149 = vector.shape_cast %148 : vector<2xf32> to vector<2x1xf32>
    %cst_72 = arith.constant 3.200000e+01 : f32
    %150 = vector.broadcast %cst_72 : f32 to vector<2x1xf32>
    %151 = arith.divf %149, %150 : vector<2x1xf32>
    %152 = vector.broadcast %151 : vector<2x1xf32> to vector<2x32xf32>
    %153 = arith.subf %145, %152 : vector<2x32xf32>
    %154 = arith.mulf %153, %153 : vector<2x32xf32>
    %cst_73 = arith.constant dense<0.000000e+00> : vector<2xf32>
    %155 = vector.multi_reduction <add>, %154, %cst_73 [1] : vector<2x32xf32> to vector<2xf32>
    %156 = vector.shape_cast %155 : vector<2xf32> to vector<2x1xf32>
    %cst_74 = arith.constant 3.200000e+01 : f32
    %157 = vector.broadcast %cst_74 : f32 to vector<2x1xf32>
    %158 = arith.divf %156, %157 : vector<2x1xf32>
    %159 = vector.broadcast %151 : vector<2x1xf32> to vector<2x32xf32>
    %160 = arith.subf %145, %159 : vector<2x32xf32>
    %cst_75 = arith.constant 9.99999974E-6 : f32
    %161 = vector.broadcast %cst_75 : f32 to vector<2x1xf32>
    %162 = arith.addf %158, %161 : vector<2x1xf32>
    %163 = math.rsqrt %162 : vector<2x1xf32>
    %164 = vector.broadcast %163 : vector<2x1xf32> to vector<2x32xf32>
    %165 = arith.mulf %160, %164 : vector<2x32xf32>
    %166 = vector.broadcast %146 : vector<1x32xf32> to vector<2x32xf32>
    %167 = arith.mulf %165, %166 : vector<2x32xf32>
    %168 = vector.broadcast %147 : vector<1x32xf32> to vector<2x32xf32>
    %169 = arith.addf %167, %168 : vector<2x32xf32>
    %c0_76 = arith.constant 0 : index
    %c0_77 = arith.constant 0 : index
    %c0_78 = arith.constant 0 : index
    %170 = vector.load %arg10[%c0_76, %c0_77, %c0_78] : memref<2x32x32xf32, #tpu.memory_space<vmem>>, vector<1x32x32xf32>
    %171 = vector.shape_cast %170 : vector<1x32x32xf32> to vector<32x32xf32>
    %cst_79 = arith.constant dense<0.000000e+00> : vector<2x32xf32>
    %172 = tpu.matmul %169, %171, %cst_79 {dimension_numbers = #tpu.dot_dimension_numbers<[1], [0], [0], [1], [0, 0, 1, 1], [], []>} : vector<2x32xf32>, vector<32x32xf32>, vector<2x32xf32> -> vector<2x32xf32>
    %c0_80 = arith.constant 0 : index
    %c0_81 = arith.constant 0 : index
    %c0_82 = arith.constant 0 : index
    %173 = vector.load %arg11[%c0_80, %c0_81, %c0_82] : memref<2x1x32xf32, #tpu.memory_space<vmem>>, vector<1x1x32xf32>
    %174 = vector.shape_cast %173 : vector<1x1x32xf32> to vector<1x32xf32>
    %175 = vector.broadcast %174 : vector<1x32xf32> to vector<2x32xf32>
    %176 = arith.addf %172, %175 : vector<2x32xf32>
    %cst_83 = arith.constant 0.353553385 : f32
    %177 = vector.broadcast %cst_83 : f32 to vector<2x32xf32>
    %178 = arith.mulf %176, %177 : vector<2x32xf32>
    %179 = vector.extract_strided_slice %178 {offsets = [0, 0], sizes = [1, 32], strides = [1, 1]} : vector<2x32xf32> to vector<1x32xf32>
    %c0_84 = arith.constant 0 : index
    %c0_85 = arith.constant 0 : index
    %c0_86 = arith.constant 0 : index
    %180 = vector.load %arg26[%c0_84, %c0_85, %c0_86] : memref<2x16x32xf32, #tpu.memory_space<vmem>>, vector<1x16x32xf32>
    %181 = vector.shape_cast %180 : vector<1x16x32xf32> to vector<16x32xf32>
    %c0_87 = arith.constant 0 : index
    %c0_88 = arith.constant 0 : index
    %c0_89 = arith.constant 0 : index
    %182 = vector.load %arg27[%c0_87, %c0_88, %c0_89] : memref<2x16x32xf32, #tpu.memory_space<vmem>>, vector<1x16x32xf32>
    %183 = vector.shape_cast %182 : vector<1x16x32xf32> to vector<16x32xf32>
    %184 = vector.extract_strided_slice %4 {offsets = [0, 0], sizes = [16, 1], strides = [1, 1]} : vector<16x2xf32> to vector<16x1xf32>
    %185 = vector.broadcast %179 : vector<1x32xf32> to vector<16x32xf32>
    %186 = arith.mulf %181, %185 : vector<16x32xf32>
    %cst_90 = arith.constant dense<0.000000e+00> : vector<16x4xf32>
    %187 = tpu.matmul %186, %1, %cst_90 {dimension_numbers = #tpu.dot_dimension_numbers<[1], [0], [0], [1], [0, 0, 1, 1], [], []>} : vector<16x32xf32>, vector<32x4xf32>, vector<16x4xf32> -> vector<16x4xf32>
    %188 = vector.broadcast %184 : vector<16x1xf32> to vector<16x4xf32>
    %189 = arith.addf %187, %188 : vector<16x4xf32>
    %cst_91 = arith.constant dense<0xFF800000> : vector<4xf32>
    %190 = vector.multi_reduction <maximumf>, %189, %cst_91 [0] : vector<16x4xf32> to vector<4xf32>
    %191 = vector.shape_cast %190 : vector<4xf32> to vector<1x4xf32>
    %192 = vector.broadcast %191 : vector<1x4xf32> to vector<16x4xf32>
    %193 = arith.subf %189, %192 : vector<16x4xf32>
    %194 = math.exp %193 : vector<16x4xf32>
    %cst_92 = arith.constant dense<0.000000e+00> : vector<4xf32>
    %195 = vector.multi_reduction <add>, %194, %cst_92 [0] : vector<16x4xf32> to vector<4xf32>
    %196 = vector.shape_cast %195 : vector<4xf32> to vector<1x4xf32>
    %197 = tpu.reciprocal %196 {approx = true} : vector<1x4xf32> -> vector<1x4xf32>
    %198 = vector.broadcast %197 : vector<1x4xf32> to vector<16x4xf32>
    %199 = arith.mulf %194, %198 : vector<16x4xf32>
    %cst_93 = arith.constant dense<0.000000e+00> : vector<16x32xf32>
    %200 = tpu.matmul %199, %2, %cst_93 {dimension_numbers = #tpu.dot_dimension_numbers<[1], [0], [0], [1], [0, 0, 1, 1], [], []>} : vector<16x4xf32>, vector<4x32xf32>, vector<16x32xf32> -> vector<16x32xf32>
    %201 = arith.mulf %200, %183 : vector<16x32xf32>
    %cst_94 = arith.constant dense<0.000000e+00> : vector<32xf32>
    %202 = vector.multi_reduction <add>, %201, %cst_94 [0] : vector<16x32xf32> to vector<32xf32>
    %203 = vector.shape_cast %202 : vector<32xf32> to vector<1x32xf32>
    %204 = vector.extract_strided_slice %178 {offsets = [1, 0], sizes = [1, 32], strides = [1, 1]} : vector<2x32xf32> to vector<1x32xf32>
    %c1_95 = arith.constant 1 : index
    %c0_96 = arith.constant 0 : index
    %c0_97 = arith.constant 0 : index
    %205 = vector.load %arg26[%c1_95, %c0_96, %c0_97] : memref<2x16x32xf32, #tpu.memory_space<vmem>>, vector<1x16x32xf32>
    %206 = vector.shape_cast %205 : vector<1x16x32xf32> to vector<16x32xf32>
    %c1_98 = arith.constant 1 : index
    %c0_99 = arith.constant 0 : index
    %c0_100 = arith.constant 0 : index
    %207 = vector.load %arg27[%c1_98, %c0_99, %c0_100] : memref<2x16x32xf32, #tpu.memory_space<vmem>>, vector<1x16x32xf32>
    %208 = vector.shape_cast %207 : vector<1x16x32xf32> to vector<16x32xf32>
    %209 = vector.extract_strided_slice %4 {offsets = [0, 1], sizes = [16, 1], strides = [1, 1]} : vector<16x2xf32> to vector<16x1xf32>
    %210 = vector.broadcast %204 : vector<1x32xf32> to vector<16x32xf32>
    %211 = arith.mulf %206, %210 : vector<16x32xf32>
    %cst_101 = arith.constant dense<0.000000e+00> : vector<16x4xf32>
    %212 = tpu.matmul %211, %1, %cst_101 {dimension_numbers = #tpu.dot_dimension_numbers<[1], [0], [0], [1], [0, 0, 1, 1], [], []>} : vector<16x32xf32>, vector<32x4xf32>, vector<16x4xf32> -> vector<16x4xf32>
    %213 = vector.broadcast %209 : vector<16x1xf32> to vector<16x4xf32>
    %214 = arith.addf %212, %213 : vector<16x4xf32>
    %cst_102 = arith.constant dense<0xFF800000> : vector<4xf32>
    %215 = vector.multi_reduction <maximumf>, %214, %cst_102 [0] : vector<16x4xf32> to vector<4xf32>
    %216 = vector.shape_cast %215 : vector<4xf32> to vector<1x4xf32>
    %217 = vector.broadcast %216 : vector<1x4xf32> to vector<16x4xf32>
    %218 = arith.subf %214, %217 : vector<16x4xf32>
    %219 = math.exp %218 : vector<16x4xf32>
    %cst_103 = arith.constant dense<0.000000e+00> : vector<4xf32>
    %220 = vector.multi_reduction <add>, %219, %cst_103 [0] : vector<16x4xf32> to vector<4xf32>
    %221 = vector.shape_cast %220 : vector<4xf32> to vector<1x4xf32>
    %222 = tpu.reciprocal %221 {approx = true} : vector<1x4xf32> -> vector<1x4xf32>
    %223 = vector.broadcast %222 : vector<1x4xf32> to vector<16x4xf32>
    %224 = arith.mulf %219, %223 : vector<16x4xf32>
    %cst_104 = arith.constant dense<0.000000e+00> : vector<16x32xf32>
    %225 = tpu.matmul %224, %2, %cst_104 {dimension_numbers = #tpu.dot_dimension_numbers<[1], [0], [0], [1], [0, 0, 1, 1], [], []>} : vector<16x4xf32>, vector<4x32xf32>, vector<16x32xf32> -> vector<16x32xf32>
    %226 = arith.mulf %225, %208 : vector<16x32xf32>
    %cst_105 = arith.constant dense<0.000000e+00> : vector<32xf32>
    %227 = vector.multi_reduction <add>, %226, %cst_105 [0] : vector<16x32xf32> to vector<32xf32>
    %228 = vector.shape_cast %227 : vector<32xf32> to vector<1x32xf32>
    %229 = tpu.concatenate %203, %228 in 0 : vector<1x32xf32>, vector<1x32xf32> -> vector<2x32xf32>
    %c0_106 = arith.constant 0 : index
    %c0_107 = arith.constant 0 : index
    %c0_108 = arith.constant 0 : index
    %230 = vector.load %arg12[%c0_106, %c0_107, %c0_108] : memref<2x32x32xf32, #tpu.memory_space<vmem>>, vector<1x32x32xf32>
    %231 = vector.shape_cast %230 : vector<1x32x32xf32> to vector<32x32xf32>
    %cst_109 = arith.constant dense<0.000000e+00> : vector<2x32xf32>
    %232 = tpu.matmul %229, %231, %cst_109 {dimension_numbers = #tpu.dot_dimension_numbers<[1], [0], [0], [1], [0, 0, 1, 1], [], []>} : vector<2x32xf32>, vector<32x32xf32>, vector<2x32xf32> -> vector<2x32xf32>
    %c0_110 = arith.constant 0 : index
    %c0_111 = arith.constant 0 : index
    %c0_112 = arith.constant 0 : index
    %233 = vector.load %arg13[%c0_110, %c0_111, %c0_112] : memref<2x1x32xf32, #tpu.memory_space<vmem>>, vector<1x1x32xf32>
    %234 = vector.shape_cast %233 : vector<1x1x32xf32> to vector<1x32xf32>
    %235 = vector.broadcast %234 : vector<1x32xf32> to vector<2x32xf32>
    %236 = arith.addf %232, %235 : vector<2x32xf32>
    %237 = arith.addf %169, %236 : vector<2x32xf32>
    %238 = vector.extract_strided_slice %44 {offsets = [1, 0], sizes = [1, 32], strides = [1, 1]} : vector<3x32xf32> to vector<1x32xf32>
    %239 = vector.extract_strided_slice %46 {offsets = [1, 0], sizes = [1, 32], strides = [1, 1]} : vector<3x32xf32> to vector<1x32xf32>
    %cst_113 = arith.constant dense<0.000000e+00> : vector<2xf32>
    %240 = vector.multi_reduction <add>, %237, %cst_113 [1] : vector<2x32xf32> to vector<2xf32>
    %241 = vector.shape_cast %240 : vector<2xf32> to vector<2x1xf32>
    %cst_114 = arith.constant 3.200000e+01 : f32
    %242 = vector.broadcast %cst_114 : f32 to vector<2x1xf32>
    %243 = arith.divf %241, %242 : vector<2x1xf32>
    %244 = vector.broadcast %243 : vector<2x1xf32> to vector<2x32xf32>
    %245 = arith.subf %237, %244 : vector<2x32xf32>
    %246 = arith.mulf %245, %245 : vector<2x32xf32>
    %cst_115 = arith.constant dense<0.000000e+00> : vector<2xf32>
    %247 = vector.multi_reduction <add>, %246, %cst_115 [1] : vector<2x32xf32> to vector<2xf32>
    %248 = vector.shape_cast %247 : vector<2xf32> to vector<2x1xf32>
    %cst_116 = arith.constant 3.200000e+01 : f32
    %249 = vector.broadcast %cst_116 : f32 to vector<2x1xf32>
    %250 = arith.divf %248, %249 : vector<2x1xf32>
    %251 = vector.broadcast %243 : vector<2x1xf32> to vector<2x32xf32>
    %252 = arith.subf %237, %251 : vector<2x32xf32>
    %cst_117 = arith.constant 9.99999974E-6 : f32
    %253 = vector.broadcast %cst_117 : f32 to vector<2x1xf32>
    %254 = arith.addf %250, %253 : vector<2x1xf32>
    %255 = math.rsqrt %254 : vector<2x1xf32>
    %256 = vector.broadcast %255 : vector<2x1xf32> to vector<2x32xf32>
    %257 = arith.mulf %252, %256 : vector<2x32xf32>
    %258 = vector.broadcast %238 : vector<1x32xf32> to vector<2x32xf32>
    %259 = arith.mulf %257, %258 : vector<2x32xf32>
    %260 = vector.broadcast %239 : vector<1x32xf32> to vector<2x32xf32>
    %261 = arith.addf %259, %260 : vector<2x32xf32>
    %c0_118 = arith.constant 0 : index
    %c0_119 = arith.constant 0 : index
    %c0_120 = arith.constant 0 : index
    %262 = vector.load %arg14[%c0_118, %c0_119, %c0_120] : memref<2x32x64xf32, #tpu.memory_space<vmem>>, vector<1x32x64xf32>
    %263 = vector.shape_cast %262 : vector<1x32x64xf32> to vector<32x64xf32>
    %cst_121 = arith.constant dense<0.000000e+00> : vector<2x64xf32>
    %264 = tpu.matmul %261, %263, %cst_121 {dimension_numbers = #tpu.dot_dimension_numbers<[1], [0], [0], [1], [0, 0, 1, 1], [], []>} : vector<2x32xf32>, vector<32x64xf32>, vector<2x64xf32> -> vector<2x64xf32>
    %c0_122 = arith.constant 0 : index
    %c0_123 = arith.constant 0 : index
    %c0_124 = arith.constant 0 : index
    %265 = vector.load %arg15[%c0_122, %c0_123, %c0_124] : memref<2x1x64xf32, #tpu.memory_space<vmem>>, vector<1x1x64xf32>
    %266 = vector.shape_cast %265 : vector<1x1x64xf32> to vector<1x64xf32>
    %267 = vector.broadcast %266 : vector<1x64xf32> to vector<2x64xf32>
    %268 = arith.addf %264, %267 : vector<2x64xf32>
    %269 = arith.mulf %268, %268 : vector<2x64xf32>
    %270 = arith.mulf %268, %269 : vector<2x64xf32>
    %cst_125 = arith.constant 4.471500e-02 : f32
    %271 = vector.broadcast %cst_125 : f32 to vector<2x64xf32>
    %272 = arith.mulf %271, %270 : vector<2x64xf32>
    %273 = arith.addf %268, %272 : vector<2x64xf32>
    %cst_126 = arith.constant 0.797884583 : f32
    %274 = vector.broadcast %cst_126 : f32 to vector<2x64xf32>
    %275 = arith.mulf %274, %273 : vector<2x64xf32>
    %276 = math.tanh %275 : vector<2x64xf32>
    %cst_127 = arith.constant 1.000000e+00 : f32
    %277 = vector.broadcast %cst_127 : f32 to vector<2x64xf32>
    %278 = arith.addf %277, %276 : vector<2x64xf32>
    %cst_128 = arith.constant 5.000000e-01 : f32
    %279 = vector.broadcast %cst_128 : f32 to vector<2x64xf32>
    %280 = arith.mulf %279, %278 : vector<2x64xf32>
    %281 = arith.mulf %268, %280 : vector<2x64xf32>
    %c0_129 = arith.constant 0 : index
    %c0_130 = arith.constant 0 : index
    %c0_131 = arith.constant 0 : index
    %282 = vector.load %arg16[%c0_129, %c0_130, %c0_131] : memref<2x64x32xf32, #tpu.memory_space<vmem>>, vector<1x64x32xf32>
    %283 = vector.shape_cast %282 : vector<1x64x32xf32> to vector<64x32xf32>
    %cst_132 = arith.constant dense<0.000000e+00> : vector<2x32xf32>
    %284 = tpu.matmul %281, %283, %cst_132 {dimension_numbers = #tpu.dot_dimension_numbers<[1], [0], [0], [1], [0, 0, 1, 1], [], []>} : vector<2x64xf32>, vector<64x32xf32>, vector<2x32xf32> -> vector<2x32xf32>
    %c0_133 = arith.constant 0 : index
    %c0_134 = arith.constant 0 : index
    %c0_135 = arith.constant 0 : index
    %285 = vector.load %arg17[%c0_133, %c0_134, %c0_135] : memref<2x1x32xf32, #tpu.memory_space<vmem>>, vector<1x1x32xf32>
    %286 = vector.shape_cast %285 : vector<1x1x32xf32> to vector<1x32xf32>
    %287 = vector.broadcast %286 : vector<1x32xf32> to vector<2x32xf32>
    %288 = arith.addf %284, %287 : vector<2x32xf32>
    %289 = arith.addf %261, %288 : vector<2x32xf32>
    %290 = vector.extract_strided_slice %44 {offsets = [2, 0], sizes = [1, 32], strides = [1, 1]} : vector<3x32xf32> to vector<1x32xf32>
    %291 = vector.extract_strided_slice %46 {offsets = [2, 0], sizes = [1, 32], strides = [1, 1]} : vector<3x32xf32> to vector<1x32xf32>
    %cst_136 = arith.constant dense<0.000000e+00> : vector<2xf32>
    %292 = vector.multi_reduction <add>, %289, %cst_136 [1] : vector<2x32xf32> to vector<2xf32>
    %293 = vector.shape_cast %292 : vector<2xf32> to vector<2x1xf32>
    %cst_137 = arith.constant 3.200000e+01 : f32
    %294 = vector.broadcast %cst_137 : f32 to vector<2x1xf32>
    %295 = arith.divf %293, %294 : vector<2x1xf32>
    %296 = vector.broadcast %295 : vector<2x1xf32> to vector<2x32xf32>
    %297 = arith.subf %289, %296 : vector<2x32xf32>
    %298 = arith.mulf %297, %297 : vector<2x32xf32>
    %cst_138 = arith.constant dense<0.000000e+00> : vector<2xf32>
    %299 = vector.multi_reduction <add>, %298, %cst_138 [1] : vector<2x32xf32> to vector<2xf32>
    %300 = vector.shape_cast %299 : vector<2xf32> to vector<2x1xf32>
    %cst_139 = arith.constant 3.200000e+01 : f32
    %301 = vector.broadcast %cst_139 : f32 to vector<2x1xf32>
    %302 = arith.divf %300, %301 : vector<2x1xf32>
    %303 = vector.broadcast %295 : vector<2x1xf32> to vector<2x32xf32>
    %304 = arith.subf %289, %303 : vector<2x32xf32>
    %cst_140 = arith.constant 9.99999974E-6 : f32
    %305 = vector.broadcast %cst_140 : f32 to vector<2x1xf32>
    %306 = arith.addf %302, %305 : vector<2x1xf32>
    %307 = math.rsqrt %306 : vector<2x1xf32>
    %308 = vector.broadcast %307 : vector<2x1xf32> to vector<2x32xf32>
    %309 = arith.mulf %304, %308 : vector<2x32xf32>
    %310 = vector.broadcast %290 : vector<1x32xf32> to vector<2x32xf32>
    %311 = arith.mulf %309, %310 : vector<2x32xf32>
    %312 = vector.broadcast %291 : vector<1x32xf32> to vector<2x32xf32>
    %313 = arith.addf %311, %312 : vector<2x32xf32>
    %c1_141 = arith.constant 1 : index
    %c0_142 = arith.constant 0 : index
    %c0_143 = arith.constant 0 : index
    %314 = vector.load %arg18[%c1_141, %c0_142, %c0_143] : memref<2x3x32xf32, #tpu.memory_space<vmem>>, vector<1x3x32xf32>
    %315 = vector.shape_cast %314 : vector<1x3x32xf32> to vector<3x32xf32>
    %c1_144 = arith.constant 1 : index
    %c0_145 = arith.constant 0 : index
    %c0_146 = arith.constant 0 : index
    %316 = vector.load %arg19[%c1_144, %c0_145, %c0_146] : memref<2x3x32xf32, #tpu.memory_space<vmem>>, vector<1x3x32xf32>
    %317 = vector.shape_cast %316 : vector<1x3x32xf32> to vector<3x32xf32>
    %c1_147 = arith.constant 1 : index
    %c0_148 = arith.constant 0 : index
    %c0_149 = arith.constant 0 : index
    %318 = vector.load %arg6[%c1_147, %c0_148, %c0_149] : memref<2x32x96xf32, #tpu.memory_space<vmem>>, vector<1x32x96xf32>
    %319 = vector.shape_cast %318 : vector<1x32x96xf32> to vector<32x96xf32>
    %cst_150 = arith.constant dense<0.000000e+00> : vector<2x96xf32>
    %320 = tpu.matmul %313, %319, %cst_150 {dimension_numbers = #tpu.dot_dimension_numbers<[1], [0], [0], [1], [0, 0, 1, 1], [], []>} : vector<2x32xf32>, vector<32x96xf32>, vector<2x96xf32> -> vector<2x96xf32>
    %c1_151 = arith.constant 1 : index
    %c0_152 = arith.constant 0 : index
    %c0_153 = arith.constant 0 : index
    %321 = vector.load %arg7[%c1_151, %c0_152, %c0_153] : memref<2x1x96xf32, #tpu.memory_space<vmem>>, vector<1x1x96xf32>
    %322 = vector.shape_cast %321 : vector<1x1x96xf32> to vector<1x96xf32>
    %323 = vector.broadcast %322 : vector<1x96xf32> to vector<2x96xf32>
    %324 = arith.addf %320, %323 : vector<2x96xf32>
    %325 = vector.extract_strided_slice %324 {offsets = [0, 0], sizes = [2, 32], strides = [1, 1]} : vector<2x96xf32> to vector<2x32xf32>
    %cst_154 = arith.constant 0.353553385 : f32
    %326 = vector.broadcast %cst_154 : f32 to vector<2x32xf32>
    %327 = arith.mulf %325, %326 : vector<2x32xf32>
    %328 = vector.extract_strided_slice %324 {offsets = [0, 32], sizes = [2, 32], strides = [1, 1]} : vector<2x96xf32> to vector<2x32xf32>
    %329 = vector.extract_strided_slice %324 {offsets = [0, 64], sizes = [2, 32], strides = [1, 1]} : vector<2x96xf32> to vector<2x32xf32>
    %330 = vector.shape_cast %328 : vector<2x32xf32> to vector<1x2x32xf32>
    %c0_155 = arith.constant 0 : index
    %c0_156 = arith.constant 0 : index
    %c0_157 = arith.constant 0 : index
    %331 = vector.load %arg37[%c0_155, %c0_156, %c0_157] : memref<1x2x32xf32, #tpu.memory_space<vmem>>, vector<1x2x32xf32>
    tpu.vector_store %arg37[%c0_155, %c0_156, %c0_157], %330 {strides = array<i32>} : memref<1x2x32xf32, #tpu.memory_space<vmem>>, vector<1x2x32xf32>,
    %332 = vector.shape_cast %329 : vector<2x32xf32> to vector<1x2x32xf32>
    %c0_158 = arith.constant 0 : index
    %c0_159 = arith.constant 0 : index
    %c0_160 = arith.constant 0 : index
    %333 = vector.load %arg38[%c0_158, %c0_159, %c0_160] : memref<1x2x32xf32, #tpu.memory_space<vmem>>, vector<1x2x32xf32>
    tpu.vector_store %arg38[%c0_158, %c0_159, %c0_160], %332 {strides = array<i32>} : memref<1x2x32xf32, #tpu.memory_space<vmem>>, vector<1x2x32xf32>,
    %334 = vector.extract_strided_slice %328 {offsets = [0, 0], sizes = [1, 32], strides = [1, 1]} : vector<2x32xf32> to vector<1x32xf32>
    %c0_161 = arith.constant 0 : index
    %c0_162 = arith.constant 0 : index
    %c0_163 = arith.constant 0 : index
    %335 = vector.load %arg32[%c0_161, %c0_162, %c0_163] : memref<8x2x32xf32, #tpu.memory_space<vmem>>, vector<8x1x32xf32>
    %336 = vector.shape_cast %335 : vector<8x1x32xf32> to vector<8x32xf32>
    %337 = vector.shape_cast %42 : vector<8x1xi1> to vector<8x1xi1>
    %338 = vector.broadcast %337 : vector<8x1xi1> to vector<8x32xi1>
    %339 = vector.shape_cast %334 : vector<1x32xf32> to vector<1x32xf32>
    %340 = vector.broadcast %339 : vector<1x32xf32> to vector<8x32xf32>
    %341 = arith.select %338, %340, %336 : vector<8x32xi1>, vector<8x32xf32>
    %342 = vector.extract_strided_slice %329 {offsets = [0, 0], sizes = [1, 32], strides = [1, 1]} : vector<2x32xf32> to vector<1x32xf32>
    %c0_164 = arith.constant 0 : index
    %c0_165 = arith.constant 0 : index
    %c0_166 = arith.constant 0 : index
    %343 = vector.load %arg33[%c0_164, %c0_165, %c0_166] : memref<8x2x32xf32, #tpu.memory_space<vmem>>, vector<8x1x32xf32>
    %344 = vector.shape_cast %343 : vector<8x1x32xf32> to vector<8x32xf32>
    %345 = vector.shape_cast %42 : vector<8x1xi1> to vector<8x1xi1>
    %346 = vector.broadcast %345 : vector<8x1xi1> to vector<8x32xi1>
    %347 = vector.shape_cast %342 : vector<1x32xf32> to vector<1x32xf32>
    %348 = vector.broadcast %347 : vector<1x32xf32> to vector<8x32xf32>
    %349 = arith.select %346, %348, %344 : vector<8x32xi1>, vector<8x32xf32>
    %350 = vector.extract_strided_slice %327 {offsets = [0, 0], sizes = [1, 32], strides = [1, 1]} : vector<2x32xf32> to vector<1x32xf32>
    %351 = vector.extract_strided_slice %3 {offsets = [0, 0], sizes = [8, 1], strides = [1, 1]} : vector<8x2xf32> to vector<8x1xf32>
    %352 = vector.broadcast %350 : vector<1x32xf32> to vector<8x32xf32>
    %353 = arith.mulf %341, %352 : vector<8x32xf32>
    %cst_167 = arith.constant dense<0.000000e+00> : vector<8x4xf32>
    %354 = tpu.matmul %353, %1, %cst_167 {dimension_numbers = #tpu.dot_dimension_numbers<[1], [0], [0], [1], [0, 0, 1, 1], [], []>} : vector<8x32xf32>, vector<32x4xf32>, vector<8x4xf32> -> vector<8x4xf32>
    %355 = vector.broadcast %351 : vector<8x1xf32> to vector<8x4xf32>
    %356 = arith.addf %354, %355 : vector<8x4xf32>
    %cst_168 = arith.constant dense<0xFF800000> : vector<4xf32>
    %357 = vector.multi_reduction <maximumf>, %356, %cst_168 [0] : vector<8x4xf32> to vector<4xf32>
    %358 = vector.shape_cast %357 : vector<4xf32> to vector<1x4xf32>
    %359 = vector.broadcast %358 : vector<1x4xf32> to vector<8x4xf32>
    %360 = arith.subf %356, %359 : vector<8x4xf32>
    %361 = math.exp %360 : vector<8x4xf32>
    %cst_169 = arith.constant dense<0.000000e+00> : vector<4xf32>
    %362 = vector.multi_reduction <add>, %361, %cst_169 [0] : vector<8x4xf32> to vector<4xf32>
    %363 = vector.shape_cast %362 : vector<4xf32> to vector<1x4xf32>
    %364 = tpu.reciprocal %363 {approx = true} : vector<1x4xf32> -> vector<1x4xf32>
    %365 = vector.broadcast %364 : vector<1x4xf32> to vector<8x4xf32>
    %366 = arith.mulf %361, %365 : vector<8x4xf32>
    %cst_170 = arith.constant dense<0.000000e+00> : vector<8x32xf32>
    %367 = tpu.matmul %366, %2, %cst_170 {dimension_numbers = #tpu.dot_dimension_numbers<[1], [0], [0], [1], [0, 0, 1, 1], [], []>} : vector<8x4xf32>, vector<4x32xf32>, vector<8x32xf32> -> vector<8x32xf32>
    %368 = arith.mulf %367, %349 : vector<8x32xf32>
    %cst_171 = arith.constant dense<0.000000e+00> : vector<32xf32>
    %369 = vector.multi_reduction <add>, %368, %cst_171 [0] : vector<8x32xf32> to vector<32xf32>
    %370 = vector.shape_cast %369 : vector<32xf32> to vector<1x32xf32>
    %371 = vector.extract_strided_slice %328 {offsets = [1, 0], sizes = [1, 32], strides = [1, 1]} : vector<2x32xf32> to vector<1x32xf32>
    %c0_172 = arith.constant 0 : index
    %c1_173 = arith.constant 1 : index
    %c0_174 = arith.constant 0 : index
    %372 = vector.load %arg32[%c0_172, %c1_173, %c0_174] : memref<8x2x32xf32, #tpu.memory_space<vmem>>, vector<8x1x32xf32>
    %373 = vector.shape_cast %372 : vector<8x1x32xf32> to vector<8x32xf32>
    %374 = vector.shape_cast %42 : vector<8x1xi1> to vector<8x1xi1>
    %375 = vector.broadcast %374 : vector<8x1xi1> to vector<8x32xi1>
    %376 = vector.shape_cast %371 : vector<1x32xf32> to vector<1x32xf32>
    %377 = vector.broadcast %376 : vector<1x32xf32> to vector<8x32xf32>
    %378 = arith.select %375, %377, %373 : vector<8x32xi1>, vector<8x32xf32>
    %379 = vector.extract_strided_slice %329 {offsets = [1, 0], sizes = [1, 32], strides = [1, 1]} : vector<2x32xf32> to vector<1x32xf32>
    %c0_175 = arith.constant 0 : index
    %c1_176 = arith.constant 1 : index
    %c0_177 = arith.constant 0 : index
    %380 = vector.load %arg33[%c0_175, %c1_176, %c0_177] : memref<8x2x32xf32, #tpu.memory_space<vmem>>, vector<8x1x32xf32>
    %381 = vector.shape_cast %380 : vector<8x1x32xf32> to vector<8x32xf32>
    %382 = vector.shape_cast %42 : vector<8x1xi1> to vector<8x1xi1>
    %383 = vector.broadcast %382 : vector<8x1xi1> to vector<8x32xi1>
    %384 = vector.shape_cast %379 : vector<1x32xf32> to vector<1x32xf32>
    %385 = vector.broadcast %384 : vector<1x32xf32> to vector<8x32xf32>
    %386 = arith.select %383, %385, %381 : vector<8x32xi1>, vector<8x32xf32>
    %387 = vector.extract_strided_slice %327 {offsets = [1, 0], sizes = [1, 32], strides = [1, 1]} : vector<2x32xf32> to vector<1x32xf32>
    %388 = vector.extract_strided_slice %3 {offsets = [0, 1], sizes = [8, 1], strides = [1, 1]} : vector<8x2xf32> to vector<8x1xf32>
    %389 = vector.broadcast %387 : vector<1x32xf32> to vector<8x32xf32>
    %390 = arith.mulf %378, %389 : vector<8x32xf32>
    %cst_178 = arith.constant dense<0.000000e+00> : vector<8x4xf32>
    %391 = tpu.matmul %390, %1, %cst_178 {dimension_numbers = #tpu.dot_dimension_numbers<[1], [0], [0], [1], [0, 0, 1, 1], [], []>} : vector<8x32xf32>, vector<32x4xf32>, vector<8x4xf32> -> vector<8x4xf32>
    %392 = vector.broadcast %388 : vector<8x1xf32> to vector<8x4xf32>
    %393 = arith.addf %391, %392 : vector<8x4xf32>
    %cst_179 = arith.constant dense<0xFF800000> : vector<4xf32>
    %394 = vector.multi_reduction <maximumf>, %393, %cst_179 [0] : vector<8x4xf32> to vector<4xf32>
    %395 = vector.shape_cast %394 : vector<4xf32> to vector<1x4xf32>
    %396 = vector.broadcast %395 : vector<1x4xf32> to vector<8x4xf32>
    %397 = arith.subf %393, %396 : vector<8x4xf32>
    %398 = math.exp %397 : vector<8x4xf32>
    %cst_180 = arith.constant dense<0.000000e+00> : vector<4xf32>
    %399 = vector.multi_reduction <add>, %398, %cst_180 [0] : vector<8x4xf32> to vector<4xf32>
    %400 = vector.shape_cast %399 : vector<4xf32> to vector<1x4xf32>
    %401 = tpu.reciprocal %400 {approx = true} : vector<1x4xf32> -> vector<1x4xf32>
    %402 = vector.broadcast %401 : vector<1x4xf32> to vector<8x4xf32>
    %403 = arith.mulf %398, %402 : vector<8x4xf32>
    %cst_181 = arith.constant dense<0.000000e+00> : vector<8x32xf32>
    %404 = tpu.matmul %403, %2, %cst_181 {dimension_numbers = #tpu.dot_dimension_numbers<[1], [0], [0], [1], [0, 0, 1, 1], [], []>} : vector<8x4xf32>, vector<4x32xf32>, vector<8x32xf32> -> vector<8x32xf32>
    %405 = arith.mulf %404, %386 : vector<8x32xf32>
    %cst_182 = arith.constant dense<0.000000e+00> : vector<32xf32>
    %406 = vector.multi_reduction <add>, %405, %cst_182 [0] : vector<8x32xf32> to vector<32xf32>
    %407 = vector.shape_cast %406 : vector<32xf32> to vector<1x32xf32>
    %408 = tpu.concatenate %370, %407 in 0 : vector<1x32xf32>, vector<1x32xf32> -> vector<2x32xf32>
    %c1_183 = arith.constant 1 : index
    %c0_184 = arith.constant 0 : index
    %c0_185 = arith.constant 0 : index
    %409 = vector.load %arg8[%c1_183, %c0_184, %c0_185] : memref<2x32x32xf32, #tpu.memory_space<vmem>>, vector<1x32x32xf32>
    %410 = vector.shape_cast %409 : vector<1x32x32xf32> to vector<32x32xf32>
    %cst_186 = arith.constant dense<0.000000e+00> : vector<2x32xf32>
    %411 = tpu.matmul %408, %410, %cst_186 {dimension_numbers = #tpu.dot_dimension_numbers<[1], [0], [0], [1], [0, 0, 1, 1], [], []>} : vector<2x32xf32>, vector<32x32xf32>, vector<2x32xf32> -> vector<2x32xf32>
    %c1_187 = arith.constant 1 : index
    %c0_188 = arith.constant 0 : index
    %c0_189 = arith.constant 0 : index
    %412 = vector.load %arg9[%c1_187, %c0_188, %c0_189] : memref<2x1x32xf32, #tpu.memory_space<vmem>>, vector<1x1x32xf32>
    %413 = vector.shape_cast %412 : vector<1x1x32xf32> to vector<1x32xf32>
    %414 = vector.broadcast %413 : vector<1x32xf32> to vector<2x32xf32>
    %415 = arith.addf %411, %414 : vector<2x32xf32>
    %416 = arith.addf %313, %415 : vector<2x32xf32>
    %417 = vector.extract_strided_slice %315 {offsets = [0, 0], sizes = [1, 32], strides = [1, 1]} : vector<3x32xf32> to vector<1x32xf32>
    %418 = vector.extract_strided_slice %317 {offsets = [0, 0], sizes = [1, 32], strides = [1, 1]} : vector<3x32xf32> to vector<1x32xf32>
    %cst_190 = arith.constant dense<0.000000e+00> : vector<2xf32>
    %419 = vector.multi_reduction <add>, %416, %cst_190 [1] : vector<2x32xf32> to vector<2xf32>
    %420 = vector.shape_cast %419 : vector<2xf32> to vector<2x1xf32>
    %cst_191 = arith.constant 3.200000e+01 : f32
    %421 = vector.broadcast %cst_191 : f32 to vector<2x1xf32>
    %422 = arith.divf %420, %421 : vector<2x1xf32>
    %423 = vector.broadcast %422 : vector<2x1xf32> to vector<2x32xf32>
    %424 = arith.subf %416, %423 : vector<2x32xf32>
    %425 = arith.mulf %424, %424 : vector<2x32xf32>
    %cst_192 = arith.constant dense<0.000000e+00> : vector<2xf32>
    %426 = vector.multi_reduction <add>, %425, %cst_192 [1] : vector<2x32xf32> to vector<2xf32>
    %427 = vector.shape_cast %426 : vector<2xf32> to vector<2x1xf32>
    %cst_193 = arith.constant 3.200000e+01 : f32
    %428 = vector.broadcast %cst_193 : f32 to vector<2x1xf32>
    %429 = arith.divf %427, %428 : vector<2x1xf32>
    %430 = vector.broadcast %422 : vector<2x1xf32> to vector<2x32xf32>
    %431 = arith.subf %416, %430 : vector<2x32xf32>
    %cst_194 = arith.constant 9.99999974E-6 : f32
    %432 = vector.broadcast %cst_194 : f32 to vector<2x1xf32>
    %433 = arith.addf %429, %432 : vector<2x1xf32>
    %434 = math.rsqrt %433 : vector<2x1xf32>
    %435 = vector.broadcast %434 : vector<2x1xf32> to vector<2x32xf32>
    %436 = arith.mulf %431, %435 : vector<2x32xf32>
    %437 = vector.broadcast %417 : vector<1x32xf32> to vector<2x32xf32>
    %438 = arith.mulf %436, %437 : vector<2x32xf32>
    %439 = vector.broadcast %418 : vector<1x32xf32> to vector<2x32xf32>
    %440 = arith.addf %438, %439 : vector<2x32xf32>
    %c1_195 = arith.constant 1 : index
    %c0_196 = arith.constant 0 : index
    %c0_197 = arith.constant 0 : index
    %441 = vector.load %arg10[%c1_195, %c0_196, %c0_197] : memref<2x32x32xf32, #tpu.memory_space<vmem>>, vector<1x32x32xf32>
    %442 = vector.shape_cast %441 : vector<1x32x32xf32> to vector<32x32xf32>
    %cst_198 = arith.constant dense<0.000000e+00> : vector<2x32xf32>
    %443 = tpu.matmul %440, %442, %cst_198 {dimension_numbers = #tpu.dot_dimension_numbers<[1], [0], [0], [1], [0, 0, 1, 1], [], []>} : vector<2x32xf32>, vector<32x32xf32>, vector<2x32xf32> -> vector<2x32xf32>
    %c1_199 = arith.constant 1 : index
    %c0_200 = arith.constant 0 : index
    %c0_201 = arith.constant 0 : index
    %444 = vector.load %arg11[%c1_199, %c0_200, %c0_201] : memref<2x1x32xf32, #tpu.memory_space<vmem>>, vector<1x1x32xf32>
    %445 = vector.shape_cast %444 : vector<1x1x32xf32> to vector<1x32xf32>
    %446 = vector.broadcast %445 : vector<1x32xf32> to vector<2x32xf32>
    %447 = arith.addf %443, %446 : vector<2x32xf32>
    %cst_202 = arith.constant 0.353553385 : f32
    %448 = vector.broadcast %cst_202 : f32 to vector<2x32xf32>
    %449 = arith.mulf %447, %448 : vector<2x32xf32>
    %450 = vector.extract_strided_slice %449 {offsets = [0, 0], sizes = [1, 32], strides = [1, 1]} : vector<2x32xf32> to vector<1x32xf32>
    %c0_203 = arith.constant 0 : index
    %c0_204 = arith.constant 0 : index
    %c0_205 = arith.constant 0 : index
    %451 = vector.load %arg28[%c0_203, %c0_204, %c0_205] : memref<2x16x32xf32, #tpu.memory_space<vmem>>, vector<1x16x32xf32>
    %452 = vector.shape_cast %451 : vector<1x16x32xf32> to vector<16x32xf32>
    %c0_206 = arith.constant 0 : index
    %c0_207 = arith.constant 0 : index
    %c0_208 = arith.constant 0 : index
    %453 = vector.load %arg29[%c0_206, %c0_207, %c0_208] : memref<2x16x32xf32, #tpu.memory_space<vmem>>, vector<1x16x32xf32>
    %454 = vector.shape_cast %453 : vector<1x16x32xf32> to vector<16x32xf32>
    %455 = vector.extract_strided_slice %4 {offsets = [0, 0], sizes = [16, 1], strides = [1, 1]} : vector<16x2xf32> to vector<16x1xf32>
    %456 = vector.broadcast %450 : vector<1x32xf32> to vector<16x32xf32>
    %457 = arith.mulf %452, %456 : vector<16x32xf32>
    %cst_209 = arith.constant dense<0.000000e+00> : vector<16x4xf32>
    %458 = tpu.matmul %457, %1, %cst_209 {dimension_numbers = #tpu.dot_dimension_numbers<[1], [0], [0], [1], [0, 0, 1, 1], [], []>} : vector<16x32xf32>, vector<32x4xf32>, vector<16x4xf32> -> vector<16x4xf32>
    %459 = vector.broadcast %455 : vector<16x1xf32> to vector<16x4xf32>
    %460 = arith.addf %458, %459 : vector<16x4xf32>
    %cst_210 = arith.constant dense<0xFF800000> : vector<4xf32>
    %461 = vector.multi_reduction <maximumf>, %460, %cst_210 [0] : vector<16x4xf32> to vector<4xf32>
    %462 = vector.shape_cast %461 : vector<4xf32> to vector<1x4xf32>
    %463 = vector.broadcast %462 : vector<1x4xf32> to vector<16x4xf32>
    %464 = arith.subf %460, %463 : vector<16x4xf32>
    %465 = math.exp %464 : vector<16x4xf32>
    %cst_211 = arith.constant dense<0.000000e+00> : vector<4xf32>
    %466 = vector.multi_reduction <add>, %465, %cst_211 [0] : vector<16x4xf32> to vector<4xf32>
    %467 = vector.shape_cast %466 : vector<4xf32> to vector<1x4xf32>
    %468 = tpu.reciprocal %467 {approx = true} : vector<1x4xf32> -> vector<1x4xf32>
    %469 = vector.broadcast %468 : vector<1x4xf32> to vector<16x4xf32>
    %470 = arith.mulf %465, %469 : vector<16x4xf32>
    %cst_212 = arith.constant dense<0.000000e+00> : vector<16x32xf32>
    %471 = tpu.matmul %470, %2, %cst_212 {dimension_numbers = #tpu.dot_dimension_numbers<[1], [0], [0], [1], [0, 0, 1, 1], [], []>} : vector<16x4xf32>, vector<4x32xf32>, vector<16x32xf32> -> vector<16x32xf32>
    %472 = arith.mulf %471, %454 : vector<16x32xf32>
    %cst_213 = arith.constant dense<0.000000e+00> : vector<32xf32>
    %473 = vector.multi_reduction <add>, %472, %cst_213 [0] : vector<16x32xf32> to vector<32xf32>
    %474 = vector.shape_cast %473 : vector<32xf32> to vector<1x32xf32>
    %475 = vector.extract_strided_slice %449 {offsets = [1, 0], sizes = [1, 32], strides = [1, 1]} : vector<2x32xf32> to vector<1x32xf32>
    %c1_214 = arith.constant 1 : index
    %c0_215 = arith.constant 0 : index
    %c0_216 = arith.constant 0 : index
    %476 = vector.load %arg28[%c1_214, %c0_215, %c0_216] : memref<2x16x32xf32, #tpu.memory_space<vmem>>, vector<1x16x32xf32>
    %477 = vector.shape_cast %476 : vector<1x16x32xf32> to vector<16x32xf32>
    %c1_217 = arith.constant 1 : index
    %c0_218 = arith.constant 0 : index
    %c0_219 = arith.constant 0 : index
    %478 = vector.load %arg29[%c1_217, %c0_218, %c0_219] : memref<2x16x32xf32, #tpu.memory_space<vmem>>, vector<1x16x32xf32>
    %479 = vector.shape_cast %478 : vector<1x16x32xf32> to vector<16x32xf32>
    %480 = vector.extract_strided_slice %4 {offsets = [0, 1], sizes = [16, 1], strides = [1, 1]} : vector<16x2xf32> to vector<16x1xf32>
    %481 = vector.broadcast %475 : vector<1x32xf32> to vector<16x32xf32>
    %482 = arith.mulf %477, %481 : vector<16x32xf32>
    %cst_220 = arith.constant dense<0.000000e+00> : vector<16x4xf32>
    %483 = tpu.matmul %482, %1, %cst_220 {dimension_numbers = #tpu.dot_dimension_numbers<[1], [0], [0], [1], [0, 0, 1, 1], [], []>} : vector<16x32xf32>, vector<32x4xf32>, vector<16x4xf32> -> vector<16x4xf32>
    %484 = vector.broadcast %480 : vector<16x1xf32> to vector<16x4xf32>
    %485 = arith.addf %483, %484 : vector<16x4xf32>
    %cst_221 = arith.constant dense<0xFF800000> : vector<4xf32>
    %486 = vector.multi_reduction <maximumf>, %485, %cst_221 [0] : vector<16x4xf32> to vector<4xf32>
    %487 = vector.shape_cast %486 : vector<4xf32> to vector<1x4xf32>
    %488 = vector.broadcast %487 : vector<1x4xf32> to vector<16x4xf32>
    %489 = arith.subf %485, %488 : vector<16x4xf32>
    %490 = math.exp %489 : vector<16x4xf32>
    %cst_222 = arith.constant dense<0.000000e+00> : vector<4xf32>
    %491 = vector.multi_reduction <add>, %490, %cst_222 [0] : vector<16x4xf32> to vector<4xf32>
    %492 = vector.shape_cast %491 : vector<4xf32> to vector<1x4xf32>
    %493 = tpu.reciprocal %492 {approx = true} : vector<1x4xf32> -> vector<1x4xf32>
    %494 = vector.broadcast %493 : vector<1x4xf32> to vector<16x4xf32>
    %495 = arith.mulf %490, %494 : vector<16x4xf32>
    %cst_223 = arith.constant dense<0.000000e+00> : vector<16x32xf32>
    %496 = tpu.matmul %495, %2, %cst_223 {dimension_numbers = #tpu.dot_dimension_numbers<[1], [0], [0], [1], [0, 0, 1, 1], [], []>} : vector<16x4xf32>, vector<4x32xf32>, vector<16x32xf32> -> vector<16x32xf32>
    %497 = arith.mulf %496, %479 : vector<16x32xf32>
    %cst_224 = arith.constant dense<0.000000e+00> : vector<32xf32>
    %498 = vector.multi_reduction <add>, %497, %cst_224 [0] : vector<16x32xf32> to vector<32xf32>
    %499 = vector.shape_cast %498 : vector<32xf32> to vector<1x32xf32>
    %500 = tpu.concatenate %474, %499 in 0 : vector<1x32xf32>, vector<1x32xf32> -> vector<2x32xf32>
    %c1_225 = arith.constant 1 : index
    %c0_226 = arith.constant 0 : index
    %c0_227 = arith.constant 0 : index
    %501 = vector.load %arg12[%c1_225, %c0_226, %c0_227] : memref<2x32x32xf32, #tpu.memory_space<vmem>>, vector<1x32x32xf32>
    %502 = vector.shape_cast %501 : vector<1x32x32xf32> to vector<32x32xf32>
    %cst_228 = arith.constant dense<0.000000e+00> : vector<2x32xf32>
    %503 = tpu.matmul %500, %502, %cst_228 {dimension_numbers = #tpu.dot_dimension_numbers<[1], [0], [0], [1], [0, 0, 1, 1], [], []>} : vector<2x32xf32>, vector<32x32xf32>, vector<2x32xf32> -> vector<2x32xf32>
    %c1_229 = arith.constant 1 : index
    %c0_230 = arith.constant 0 : index
    %c0_231 = arith.constant 0 : index
    %504 = vector.load %arg13[%c1_229, %c0_230, %c0_231] : memref<2x1x32xf32, #tpu.memory_space<vmem>>, vector<1x1x32xf32>
    %505 = vector.shape_cast %504 : vector<1x1x32xf32> to vector<1x32xf32>
    %506 = vector.broadcast %505 : vector<1x32xf32> to vector<2x32xf32>
    %507 = arith.addf %503, %506 : vector<2x32xf32>
    %508 = arith.addf %440, %507 : vector<2x32xf32>
    %509 = vector.extract_strided_slice %315 {offsets = [1, 0], sizes = [1, 32], strides = [1, 1]} : vector<3x32xf32> to vector<1x32xf32>
    %510 = vector.extract_strided_slice %317 {offsets = [1, 0], sizes = [1, 32], strides = [1, 1]} : vector<3x32xf32> to vector<1x32xf32>
    %cst_232 = arith.constant dense<0.000000e+00> : vector<2xf32>
    %511 = vector.multi_reduction <add>, %508, %cst_232 [1] : vector<2x32xf32> to vector<2xf32>
    %512 = vector.shape_cast %511 : vector<2xf32> to vector<2x1xf32>
    %cst_233 = arith.constant 3.200000e+01 : f32
    %513 = vector.broadcast %cst_233 : f32 to vector<2x1xf32>
    %514 = arith.divf %512, %513 : vector<2x1xf32>
    %515 = vector.broadcast %514 : vector<2x1xf32> to vector<2x32xf32>
    %516 = arith.subf %508, %515 : vector<2x32xf32>
    %517 = arith.mulf %516, %516 : vector<2x32xf32>
    %cst_234 = arith.constant dense<0.000000e+00> : vector<2xf32>
    %518 = vector.multi_reduction <add>, %517, %cst_234 [1] : vector<2x32xf32> to vector<2xf32>
    %519 = vector.shape_cast %518 : vector<2xf32> to vector<2x1xf32>
    %cst_235 = arith.constant 3.200000e+01 : f32
    %520 = vector.broadcast %cst_235 : f32 to vector<2x1xf32>
    %521 = arith.divf %519, %520 : vector<2x1xf32>
    %522 = vector.broadcast %514 : vector<2x1xf32> to vector<2x32xf32>
    %523 = arith.subf %508, %522 : vector<2x32xf32>
    %cst_236 = arith.constant 9.99999974E-6 : f32
    %524 = vector.broadcast %cst_236 : f32 to vector<2x1xf32>
    %525 = arith.addf %521, %524 : vector<2x1xf32>
    %526 = math.rsqrt %525 : vector<2x1xf32>
    %527 = vector.broadcast %526 : vector<2x1xf32> to vector<2x32xf32>
    %528 = arith.mulf %523, %527 : vector<2x32xf32>
    %529 = vector.broadcast %509 : vector<1x32xf32> to vector<2x32xf32>
    %530 = arith.mulf %528, %529 : vector<2x32xf32>
    %531 = vector.broadcast %510 : vector<1x32xf32> to vector<2x32xf32>
    %532 = arith.addf %530, %531 : vector<2x32xf32>
    %c1_237 = arith.constant 1 : index
    %c0_238 = arith.constant 0 : index
    %c0_239 = arith.constant 0 : index
    %533 = vector.load %arg14[%c1_237, %c0_238, %c0_239] : memref<2x32x64xf32, #tpu.memory_space<vmem>>, vector<1x32x64xf32>
    %534 = vector.shape_cast %533 : vector<1x32x64xf32> to vector<32x64xf32>
    %cst_240 = arith.constant dense<0.000000e+00> : vector<2x64xf32>
    %535 = tpu.matmul %532, %534, %cst_240 {dimension_numbers = #tpu.dot_dimension_numbers<[1], [0], [0], [1], [0, 0, 1, 1], [], []>} : vector<2x32xf32>, vector<32x64xf32>, vector<2x64xf32> -> vector<2x64xf32>
    %c1_241 = arith.constant 1 : index
    %c0_242 = arith.constant 0 : index
    %c0_243 = arith.constant 0 : index
    %536 = vector.load %arg15[%c1_241, %c0_242, %c0_243] : memref<2x1x64xf32, #tpu.memory_space<vmem>>, vector<1x1x64xf32>
    %537 = vector.shape_cast %536 : vector<1x1x64xf32> to vector<1x64xf32>
    %538 = vector.broadcast %537 : vector<1x64xf32> to vector<2x64xf32>
    %539 = arith.addf %535, %538 : vector<2x64xf32>
    %540 = arith.mulf %539, %539 : vector<2x64xf32>
    %541 = arith.mulf %539, %540 : vector<2x64xf32>
    %cst_244 = arith.constant 4.471500e-02 : f32
    %542 = vector.broadcast %cst_244 : f32 to vector<2x64xf32>
    %543 = arith.mulf %542, %541 : vector<2x64xf32>
    %544 = arith.addf %539, %543 : vector<2x64xf32>
    %cst_245 = arith.constant 0.797884583 : f32
    %545 = vector.broadcast %cst_245 : f32 to vector<2x64xf32>
    %546 = arith.mulf %545, %544 : vector<2x64xf32>
    %547 = math.tanh %546 : vector<2x64xf32>
    %cst_246 = arith.constant 1.000000e+00 : f32
    %548 = vector.broadcast %cst_246 : f32 to vector<2x64xf32>
    %549 = arith.addf %548, %547 : vector<2x64xf32>
    %cst_247 = arith.constant 5.000000e-01 : f32
    %550 = vector.broadcast %cst_247 : f32 to vector<2x64xf32>
    %551 = arith.mulf %550, %549 : vector<2x64xf32>
    %552 = arith.mulf %539, %551 : vector<2x64xf32>
    %c1_248 = arith.constant 1 : index
    %c0_249 = arith.constant 0 : index
    %c0_250 = arith.constant 0 : index
    %553 = vector.load %arg16[%c1_248, %c0_249, %c0_250] : memref<2x64x32xf32, #tpu.memory_space<vmem>>, vector<1x64x32xf32>
    %554 = vector.shape_cast %553 : vector<1x64x32xf32> to vector<64x32xf32>
    %cst_251 = arith.constant dense<0.000000e+00> : vector<2x32xf32>
    %555 = tpu.matmul %552, %554, %cst_251 {dimension_numbers = #tpu.dot_dimension_numbers<[1], [0], [0], [1], [0, 0, 1, 1], [], []>} : vector<2x64xf32>, vector<64x32xf32>, vector<2x32xf32> -> vector<2x32xf32>
    %c1_252 = arith.constant 1 : index
    %c0_253 = arith.constant 0 : index
    %c0_254 = arith.constant 0 : index
    %556 = vector.load %arg17[%c1_252, %c0_253, %c0_254] : memref<2x1x32xf32, #tpu.memory_space<vmem>>, vector<1x1x32xf32>
    %557 = vector.shape_cast %556 : vector<1x1x32xf32> to vector<1x32xf32>
    %558 = vector.broadcast %557 : vector<1x32xf32> to vector<2x32xf32>
    %559 = arith.addf %555, %558 : vector<2x32xf32>
    %560 = arith.addf %532, %559 : vector<2x32xf32>
    %561 = vector.extract_strided_slice %315 {offsets = [2, 0], sizes = [1, 32], strides = [1, 1]} : vector<3x32xf32> to vector<1x32xf32>
    %562 = vector.extract_strided_slice %317 {offsets = [2, 0], sizes = [1, 32], strides = [1, 1]} : vector<3x32xf32> to vector<1x32xf32>
    %cst_255 = arith.constant dense<0.000000e+00> : vector<2xf32>
    %563 = vector.multi_reduction <add>, %560, %cst_255 [1] : vector<2x32xf32> to vector<2xf32>
    %564 = vector.shape_cast %563 : vector<2xf32> to vector<2x1xf32>
    %cst_256 = arith.constant 3.200000e+01 : f32
    %565 = vector.broadcast %cst_256 : f32 to vector<2x1xf32>
    %566 = arith.divf %564, %565 : vector<2x1xf32>
    %567 = vector.broadcast %566 : vector<2x1xf32> to vector<2x32xf32>
    %568 = arith.subf %560, %567 : vector<2x32xf32>
    %569 = arith.mulf %568, %568 : vector<2x32xf32>
    %cst_257 = arith.constant dense<0.000000e+00> : vector<2xf32>
    %570 = vector.multi_reduction <add>, %569, %cst_257 [1] : vector<2x32xf32> to vector<2xf32>
    %571 = vector.shape_cast %570 : vector<2xf32> to vector<2x1xf32>
    %cst_258 = arith.constant 3.200000e+01 : f32
    %572 = vector.broadcast %cst_258 : f32 to vector<2x1xf32>
    %573 = arith.divf %571, %572 : vector<2x1xf32>
    %574 = vector.broadcast %566 : vector<2x1xf32> to vector<2x32xf32>
    %575 = arith.subf %560, %574 : vector<2x32xf32>
    %cst_259 = arith.constant 9.99999974E-6 : f32
    %576 = vector.broadcast %cst_259 : f32 to vector<2x1xf32>
    %577 = arith.addf %573, %576 : vector<2x1xf32>
    %578 = math.rsqrt %577 : vector<2x1xf32>
    %579 = vector.broadcast %578 : vector<2x1xf32> to vector<2x32xf32>
    %580 = arith.mulf %575, %579 : vector<2x32xf32>
    %581 = vector.broadcast %561 : vector<1x32xf32> to vector<2x32xf32>
    %582 = arith.mulf %580, %581 : vector<2x32xf32>
    %583 = vector.broadcast %562 : vector<1x32xf32> to vector<2x32xf32>
    %584 = arith.addf %582, %583 : vector<2x32xf32>
    %c0_260 = arith.constant 0 : index
    %c0_261 = arith.constant 0 : index
    %585 = vector.load %arg20[%c0_260, %c0_261] : memref<32x128xf32, #tpu.memory_space<vmem>>, vector<32x128xf32>
    %cst_262 = arith.constant dense<0.000000e+00> : vector<2x128xf32>
    %586 = tpu.matmul %584, %585, %cst_262 {dimension_numbers = #tpu.dot_dimension_numbers<[1], [0], [0], [1], [0, 0, 1, 1], [], []>} : vector<2x32xf32>, vector<32x128xf32>, vector<2x128xf32> -> vector<2x128xf32>
    %c0_263 = arith.constant 0 : index
    %c0_264 = arith.constant 0 : index
    %587 = vector.load %arg21[%c0_263, %c0_264] : memref<1x128xf32, #tpu.memory_space<vmem>>, vector<1x128xf32>
    %588 = vector.broadcast %587 : vector<1x128xf32> to vector<2x128xf32>
    %589 = arith.addf %586, %588 : vector<2x128xf32>
    %c0_265 = arith.constant 0 : index
    %c0_266 = arith.constant 0 : index
    %590 = vector.load %arg34[%c0_265, %c0_266] : memref<2x128xf32, #tpu.memory_space<vmem>>, vector<2x128xf32>
    tpu.vector_store %arg34[%c0_265, %c0_266], %589 {strides = array<i32>} : memref<2x128xf32, #tpu.memory_space<vmem>>, vector<2x128xf32>,
    return
  }
  func.func @transform_0(%arg0: i32, %arg1: memref<2x1xi32, #tpu.memory_space<smem>>, %arg2: memref<1xi32, #tpu.memory_space<smem>>) -> (i32, i32) {
    %c0_i32 = arith.constant 0 : i32
    %c0_i32_0 = arith.constant 0 : i32
    %c0_i32_1 = arith.constant 0 : i32
    return %c0_i32, %c0_i32_0 : i32, i32
  }
  func.func @transform_1(%arg0: i32, %arg1: memref<2x1xi32, #tpu.memory_space<smem>>, %arg2: memref<1xi32, #tpu.memory_space<smem>>) -> (i32, i32) {
    %c0_i32 = arith.constant 0 : i32
    %c0_i32_0 = arith.constant 0 : i32
    %c0_i32_1 = arith.constant 0 : i32
    return %c0_i32, %c0_i32_0 : i32, i32
  }
  func.func @transform_2(%arg0: i32, %arg1: memref<2x1xi32, #tpu.memory_space<smem>>, %arg2: memref<1xi32, #tpu.memory_space<smem>>) -> (i32, i32) {
    %c0_i32 = arith.constant 0 : i32
    %c0_i32_0 = arith.constant 0 : i32
    %c0_i32_1 = arith.constant 0 : i32
    return %c0_i32, %c0_i32_0 : i32, i32
  }
  func.func @transform_3(%arg0: i32, %arg1: memref<2x1xi32, #tpu.memory_space<smem>>, %arg2: memref<1xi32, #tpu.memory_space<smem>>) -> (i32, i32, i32) {
    %c0_i32 = arith.constant 0 : i32
    %c0_i32_0 = arith.constant 0 : i32
    %c0_i32_1 = arith.constant 0 : i32
    %c0_i32_2 = arith.constant 0 : i32
    return %c0_i32, %c0_i32_0, %c0_i32_1 : i32, i32, i32
  }
  func.func @transform_4(%arg0: i32, %arg1: memref<2x1xi32, #tpu.memory_space<smem>>, %arg2: memref<1xi32, #tpu.memory_space<smem>>) -> (i32, i32, i32) {
    %c0_i32 = arith.constant 0 : i32
    %c0_i32_0 = arith.constant 0 : i32
    %c0_i32_1 = arith.constant 0 : i32
    %c0_i32_2 = arith.constant 0 : i32
    return %c0_i32, %c0_i32_0, %c0_i32_1 : i32, i32, i32
  }
  func.func @transform_5(%arg0: i32, %arg1: memref<2x1xi32, #tpu.memory_space<smem>>, %arg2: memref<1xi32, #tpu.memory_space<smem>>) -> (i32, i32, i32) {
    %c0_i32 = arith.constant 0 : i32
    %c0_i32_0 = arith.constant 0 : i32
    %c0_i32_1 = arith.constant 0 : i32
    %c0_i32_2 = arith.constant 0 : i32
    return %c0_i32, %c0_i32_0, %c0_i32_1 : i32, i32, i32
  }
  func.func @transform_6(%arg0: i32, %arg1: memref<2x1xi32, #tpu.memory_space<smem>>, %arg2: memref<1xi32, #tpu.memory_space<smem>>) -> (i32, i32, i32) {
    %c0_i32 = arith.constant 0 : i32
    %c0_i32_0 = arith.constant 0 : i32
    %c0_i32_1 = arith.constant 0 : i32
    %c0_i32_2 = arith.constant 0 : i32
    return %c0_i32, %c0_i32_0, %c0_i32_1 : i32, i32, i32
  }
  func.func @transform_7(%arg0: i32, %arg1: memref<2x1xi32, #tpu.memory_space<smem>>, %arg2: memref<1xi32, #tpu.memory_space<smem>>) -> (i32, i32, i32) {
    %c0_i32 = arith.constant 0 : i32
    %c0_i32_0 = arith.constant 0 : i32
    %c0_i32_1 = arith.constant 0 : i32
    %c0_i32_2 = arith.constant 0 : i32
    return %c0_i32, %c0_i32_0, %c0_i32_1 : i32, i32, i32
  }
  func.func @transform_8(%arg0: i32, %arg1: memref<2x1xi32, #tpu.memory_space<smem>>, %arg2: memref<1xi32, #tpu.memory_space<smem>>) -> (i32, i32, i32) {
    %c0_i32 = arith.constant 0 : i32
    %c0_i32_0 = arith.constant 0 : i32
    %c0_i32_1 = arith.constant 0 : i32
    %c0_i32_2 = arith.constant 0 : i32
    return %c0_i32, %c0_i32_0, %c0_i32_1 : i32, i32, i32
  }
  func.func @transform_9(%arg0: i32, %arg1: memref<2x1xi32, #tpu.memory_space<smem>>, %arg2: memref<1xi32, #tpu.memory_space<smem>>) -> (i32, i32, i32) {
    %c0_i32 = arith.constant 0 : i32
    %c0_i32_0 = arith.constant 0 : i32
    %c0_i32_1 = arith.constant 0 : i32
    %c0_i32_2 = arith.constant 0 : i32
    return %c0_i32, %c0_i32_0, %c0_i32_1 : i32, i32, i32
  }
  func.func @transform_10(%arg0: i32, %arg1: memref<2x1xi32, #tpu.memory_space<smem>>, %arg2: memref<1xi32, #tpu.memory_space<smem>>) -> (i32, i32, i32) {
    %c0_i32 = arith.constant 0 : i32
    %c0_i32_0 = arith.constant 0 : i32
    %c0_i32_1 = arith.constant 0 : i32
    %c0_i32_2 = arith.constant 0 : i32
    return %c0_i32, %c0_i32_0, %c0_i32_1 : i32, i32, i32
  }
  func.func @transform_11(%arg0: i32, %arg1: memref<2x1xi32, #tpu.memory_space<smem>>, %arg2: memref<1xi32, #tpu.memory_space<smem>>) -> (i32, i32, i32) {
    %c0_i32 = arith.constant 0 : i32
    %c0_i32_0 = arith.constant 0 : i32
    %c0_i32_1 = arith.constant 0 : i32
    %c0_i32_2 = arith.constant 0 : i32
    return %c0_i32, %c0_i32_0, %c0_i32_1 : i32, i32, i32
  }
  func.func @transform_12(%arg0: i32, %arg1: memref<2x1xi32, #tpu.memory_space<smem>>, %arg2: memref<1xi32, #tpu.memory_space<smem>>) -> (i32, i32, i32) {
    %c0_i32 = arith.constant 0 : i32
    %c0_i32_0 = arith.constant 0 : i32
    %c0_i32_1 = arith.constant 0 : i32
    %c0_i32_2 = arith.constant 0 : i32
    return %c0_i32, %c0_i32_0, %c0_i32_1 : i32, i32, i32
  }
  func.func @transform_13(%arg0: i32, %arg1: memref<2x1xi32, #tpu.memory_space<smem>>, %arg2: memref<1xi32, #tpu.memory_space<smem>>) -> (i32, i32, i32) {
    %c0_i32 = arith.constant 0 : i32
    %c0_i32_0 = arith.constant 0 : i32
    %c0_i32_1 = arith.constant 0 : i32
    %c0_i32_2 = arith.constant 0 : i32
    return %c0_i32, %c0_i32_0, %c0_i32_1 : i32, i32, i32
  }
  func.func @transform_14(%arg0: i32, %arg1: memref<2x1xi32, #tpu.memory_space<smem>>, %arg2: memref<1xi32, #tpu.memory_space<smem>>) -> (i32, i32, i32) {
    %c0_i32 = arith.constant 0 : i32
    %c0_i32_0 = arith.constant 0 : i32
    %c0_i32_1 = arith.constant 0 : i32
    %c0_i32_2 = arith.constant 0 : i32
    return %c0_i32, %c0_i32_0, %c0_i32_1 : i32, i32, i32
  }
  func.func @transform_15(%arg0: i32, %arg1: memref<2x1xi32, #tpu.memory_space<smem>>, %arg2: memref<1xi32, #tpu.memory_space<smem>>) -> (i32, i32, i32) {
    %c0_i32 = arith.constant 0 : i32
    %c0_i32_0 = arith.constant 0 : i32
    %c0_i32_1 = arith.constant 0 : i32
    %c0_i32_2 = arith.constant 0 : i32
    return %c0_i32, %c0_i32_0, %c0_i32_1 : i32, i32, i32
  }
  func.func @transform_16(%arg0: i32, %arg1: memref<2x1xi32, #tpu.memory_space<smem>>, %arg2: memref<1xi32, #tpu.memory_space<smem>>) -> (i32, i32, i32) {
    %c0_i32 = arith.constant 0 : i32
    %c0_i32_0 = arith.constant 0 : i32
    %c0_i32_1 = arith.constant 0 : i32
    %c0_i32_2 = arith.constant 0 : i32
    return %c0_i32, %c0_i32_0, %c0_i32_1 : i32, i32, i32
  }
  func.func @transform_17(%arg0: i32, %arg1: memref<2x1xi32, #tpu.memory_space<smem>>, %arg2: memref<1xi32, #tpu.memory_space<smem>>) -> (i32, i32) {
    %c0_i32 = arith.constant 0 : i32
    %c0_i32_0 = arith.constant 0 : i32
    %c0_i32_1 = arith.constant 0 : i32
    return %c0_i32, %c0_i32_0 : i32, i32
  }
  func.func @transform_18(%arg0: i32, %arg1: memref<2x1xi32, #tpu.memory_space<smem>>, %arg2: memref<1xi32, #tpu.memory_space<smem>>) -> (i32, i32) {
    %c0_i32 = arith.constant 0 : i32
    %c0_i32_0 = arith.constant 0 : i32
    %c0_i32_1 = arith.constant 0 : i32
    return %c0_i32, %c0_i32_0 : i32, i32
  }
  func.func @transform_19(%arg0: i32, %arg1: memref<2x1xi32, #tpu.memory_space<smem>>, %arg2: memref<1xi32, #tpu.memory_space<smem>>) -> (i32, i32) {
    %c0_i32 = arith.constant 0 : i32
    %c0_i32_0 = arith.constant 0 : i32
    %c0_i32_1 = arith.constant 0 : i32
    return %c0_i32, %c0_i32_0 : i32, i32
  }
  func.func @transform_20(%arg0: i32, %arg1: memref<2x1xi32, #tpu.memory_space<smem>>, %arg2: memref<1xi32, #tpu.memory_space<smem>>) -> (i32, i32) {
    %c0_i32 = arith.constant 0 : i32
    %c0_i32_0 = arith.constant 0 : i32
    %c0_i32_1 = arith.constant 0 : i32
    return %c0_i32, %c0_i32_0 : i32, i32
  }
  func.func @transform_21(%arg0: i32, %arg1: memref<2x1xi32, #tpu.memory_space<smem>>, %arg2: memref<1xi32, #tpu.memory_space<smem>>) -> (i32, i32) {
    %c0_i32 = arith.constant 0 : i32
    %c0_i32_0 = arith.constant 0 : i32
    %c0_i32_1 = arith.constant 0 : i32
    return %c0_i32, %c0_i32_0 : i32, i32
  }
  func.func @transform_22(%arg0: i32, %arg1: memref<2x1xi32, #tpu.memory_space<smem>>, %arg2: memref<1xi32, #tpu.memory_space<smem>>) -> (i32, i32) {
    %c0_i32 = arith.constant 0 : i32
    %c0_i32_0 = arith.constant 0 : i32
    %c0_i32_1 = arith.constant 0 : i32
    return %c0_i32, %c0_i32_0 : i32, i32
  }
  func.func @transform_23(%arg0: i32, %arg1: memref<2x1xi32, #tpu.memory_space<smem>>, %arg2: memref<1xi32, #tpu.memory_space<smem>>) -> (i32, i32, i32) {
    %c0_i32 = arith.constant 0 : i32
    %c0_i32_0 = arith.constant 0 : i32
    %c0_i32_1 = arith.constant 0 : i32
    %c0_i32_2 = arith.constant 0 : i32
    return %c0_i32, %c0_i32_0, %c0_i32_1 : i32, i32, i32
  }
  func.func @transform_24(%arg0: i32, %arg1: memref<2x1xi32, #tpu.memory_space<smem>>, %arg2: memref<1xi32, #tpu.memory_space<smem>>) -> (i32, i32, i32) {
    %c0_i32 = arith.constant 0 : i32
    %c0_i32_0 = arith.constant 0 : i32
    %c0_i32_1 = arith.constant 0 : i32
    %c0_i32_2 = arith.constant 0 : i32
    return %c0_i32, %c0_i32_0, %c0_i32_1 : i32, i32, i32
  }
  func.func @transform_25(%arg0: i32, %arg1: memref<2x1xi32, #tpu.memory_space<smem>>, %arg2: memref<1xi32, #tpu.memory_space<smem>>) -> (i32, i32, i32) {
    %c0_i32 = arith.constant 0 : i32
    %c0_i32_0 = arith.constant 0 : i32
    %c0_i32_1 = arith.constant 0 : i32
    %c0_i32_2 = arith.constant 0 : i32
    return %c0_i32, %c0_i32_0, %c0_i32_1 : i32, i32, i32
  }
  func.func @transform_26(%arg0: i32, %arg1: memref<2x1xi32, #tpu.memory_space<smem>>, %arg2: memref<1xi32, #tpu.memory_space<smem>>) -> (i32, i32, i32) {
    %c0_i32 = arith.constant 0 : i32
    %c0_i32_0 = arith.constant 0 : i32
    %c0_i32_1 = arith.constant 0 : i32
    %c0_i32_2 = arith.constant 0 : i32
    return %c0_i32, %c0_i32_0, %c0_i32_1 : i32, i32, i32
  }
  func.func @transform_27(%arg0: i32, %arg1: memref<2x1xi32, #tpu.memory_space<smem>>, %arg2: memref<1xi32, #tpu.memory_space<smem>>) -> (i32, i32, i32) {
    %c0_i32 = arith.constant 0 : i32
    %c0_i32_0 = arith.constant 0 : i32
    %c0_i32_1 = arith.constant 0 : i32
    %c0_i32_2 = arith.constant 0 : i32
    return %c0_i32, %c0_i32_0, %c0_i32_1 : i32, i32, i32
  }
  func.func @transform_28(%arg0: i32, %arg1: memref<2x1xi32, #tpu.memory_space<smem>>, %arg2: memref<1xi32, #tpu.memory_space<smem>>) -> (i32, i32, i32) {
    %c0_i32 = arith.constant 0 : i32
    %c0_i32_0 = arith.constant 0 : i32
    %c0_i32_1 = arith.constant 0 : i32
    %c0_i32_2 = arith.constant 0 : i32
    return %c0_i32, %c0_i32_0, %c0_i32_1 : i32, i32, i32
  }
  func.func @transform_29(%arg0: i32, %arg1: memref<2x1xi32, #tpu.memory_space<smem>>, %arg2: memref<1xi32, #tpu.memory_space<smem>>) -> (i32, i32, i32) {
    %c0_i32 = arith.constant 0 : i32
    %c0_i32_0 = arith.constant 0 : i32
    %c0_i32_1 = arith.constant 0 : i32
    %c0_i32_2 = arith.constant 0 : i32
    return %c0_i32, %c0_i32_0, %c0_i32_1 : i32, i32, i32
  }
  func.func @transform_30(%arg0: i32, %arg1: memref<2x1xi32, #tpu.memory_space<smem>>, %arg2: memref<1xi32, #tpu.memory_space<smem>>) -> (i32, i32, i32) {
    %c0_i32 = arith.constant 0 : i32
    %c0_i32_0 = arith.constant 0 : i32
    %c0_i32_1 = arith.constant 0 : i32
    %c0_i32_2 = arith.constant 0 : i32
    return %c0_i32, %c0_i32_0, %c0_i32_1 : i32, i32, i32
  }
  func.func @transform_31(%arg0: i32, %arg1: memref<2x1xi32, #tpu.memory_space<smem>>, %arg2: memref<1xi32, #tpu.memory_space<smem>>) -> (i32, i32) {
    %c0_i32 = arith.constant 0 : i32
    %c0_i32_0 = arith.constant 0 : i32
    %c0_i32_1 = arith.constant 0 : i32
    return %c0_i32, %c0_i32_0 : i32, i32
  }
  func.func @transform_32(%arg0: i32, %arg1: memref<2x1xi32, #tpu.memory_space<smem>>, %arg2: memref<1xi32, #tpu.memory_space<smem>>) -> (i32, i32, i32) {
    %c0 = arith.constant 0 : index
    %0 = memref.load %arg2[%c0] : memref<1xi32, #tpu.memory_space<smem>>
    %c0_i32 = arith.constant 0 : i32
    %c0_i32_0 = arith.constant 0 : i32
    %c0_i32_1 = arith.constant 0 : i32
    return %0, %c0_i32, %c0_i32_0 : i32, i32, i32
  }
  func.func @transform_33(%arg0: i32, %arg1: memref<2x1xi32, #tpu.memory_space<smem>>, %arg2: memref<1xi32, #tpu.memory_space<smem>>) -> (i32, i32, i32) {
    %c0 = arith.constant 0 : index
    %0 = memref.load %arg2[%c0] : memref<1xi32, #tpu.memory_space<smem>>
    %c0_i32 = arith.constant 0 : i32
    %c0_i32_0 = arith.constant 0 : i32
    %c0_i32_1 = arith.constant 0 : i32
    return %0, %c0_i32, %c0_i32_0 : i32, i32, i32
  }
  func.func @transform_34(%arg0: i32, %arg1: memref<2x1xi32, #tpu.memory_space<smem>>, %arg2: memref<1xi32, #tpu.memory_space<smem>>) -> (i32, i32, i32) {
    %c0 = arith.constant 0 : index
    %0 = memref.load %arg2[%c0] : memref<1xi32, #tpu.memory_space<smem>>
    %c0_i32 = arith.constant 0 : i32
    %c0_i32_0 = arith.constant 0 : i32
    %c0_i32_1 = arith.constant 0 : i32
    return %0, %c0_i32, %c0_i32_0 : i32, i32, i32
  }
  func.func @transform_35(%arg0: i32, %arg1: memref<2x1xi32, #tpu.memory_space<smem>>, %arg2: memref<1xi32, #tpu.memory_space<smem>>) -> (i32, i32, i32) {
    %c0 = arith.constant 0 : index
    %0 = memref.load %arg2[%c0] : memref<1xi32, #tpu.memory_space<smem>>
    %c0_i32 = arith.constant 0 : i32
    %c0_i32_0 = arith.constant 0 : i32
    %c0_i32_1 = arith.constant 0 : i32
    return %0, %c0_i32, %c0_i32_0 : i32, i32, i32
  }
}

</mosaic_0001>

<bundles_post_ra>
// kernel: seq2seq_decoder_wrapper_forward.1
= control target key start
LH: loop header
LB: loop body
LE: loop exit
PB: predicated region body
PF: predicated region fallthrough
CT: control target
= control target key end

     0   :  { %s4575_s6 = smov 1   ;;  %s4576_s10 = smov 2   ;;  %s5499_s0 = inlined_call_operand.smem [shape: u32[38], index: -1, kind: input, shape index: {}] }
   0x1   :  { %s4635_s5 = sld [smem:[%s5499_s0]]   ;;  %s4577_s14 = smov 3  }
   0x2   :  { %s4640_s9 = sld [smem:[%s5499_s0 + %s4575_s6]]   ;;  %s4578_s18 = smov 4  }
   0x3   :  { %s4645_s13 = sld [smem:[%s5499_s0 + %s4576_s10]]   ;;  %s4579_s22 = smov 5  }
   0x4   :  { %s4650_s17 = sld [smem:[%s5499_s0 + %s4577_s14]]   ;;  %s4580_s26 = smov 6  }
   0x5   :  { %s4655_s21 = sld [smem:[%s5499_s0 + %s4578_s18]]   ;;  %s4581_s30 = smov 7  }
   0x6   :  { %s4660_s25 = sld [smem:[%s5499_s0 + %s4579_s22]]   ;;  %s4582_s4 = smov 8  }
   0x7   :  { %s4665_s29 = sld [smem:[%s5499_s0 + %s4580_s26]]   ;;  %s4583_s10 = smov 9  }
   0x8   :  { %s4670_s3 = sld [smem:[%s5499_s0 + %s4581_s30]]   ;;  %s4584_s15 = smov 10  }
   0x9   :  { %s4675_s8 = sld [smem:[%s5499_s0 + %s4582_s4]]   ;;  %s4585_s20 = smov 11  }
   0xa   :  { %s4680_s14 = sld [smem:[%s5499_s0 + %s4583_s10]]   ;;  %s4586_s26 = smov 12  }
   0xb   :  { %s4685_s19 = sld [smem:[%s5499_s0 + %s4584_s15]]   ;;  %s4587_s1 = smov 13  }
   0xc   :  { %s4690_s24 = sld [smem:[%s5499_s0 + %s4585_s20]]   ;;  %s4588_s7 = smov 14  }
   0xd   :  { %s4695_s30 = sld [smem:[%s5499_s0 + %s4586_s26]]   ;;  %s4589_s15 = smov 15  }
   0xe   :  { %5519 = sst [smem:[#allocation16_spill]] %s4670_s3  ;;  %s4590_s22 = smov 16  }
   0xf   :  { %5520 = sst [smem:[#allocation17_spill]] %s4675_s8  ;;  %s4591_s28 = smov 17  }
  0x10   :  { %5521 = sst [smem:[#allocation18_spill]] %s4680_s14  ;;  %s4610_s14 = smov 36  }
  0x11   :  { %5522 = sst [smem:[#allocation19_spill]] %s4685_s19  ;;  %s4611_s8 = smov 37  }
  0x12   :  { %5523 = sst [smem:[#allocation20_spill]] %s4690_s24  ;;  %s81_s3 = sshll.u32 %s4635_s5, 4  ;;  %s82_s3 = int_to_ptr.vmem [resolvable:$true] %s81_s3 }
  0x13   :  { %5524 = sst [smem:[#allocation21_spill]] %s4695_s30  ;;  %p4472_p1 = scmp.lt.s32.totalorder %s82_s3, %s82_s3 }
  0x14   :  { %s4700_s6 = sld [smem:[%s5499_s0 + %s4587_s1]]  }
  0x15   :  { %s4705_s12 = sld [smem:[%s5499_s0 + %s4588_s7]]   ;;  %s4592_s7 = smov 18  }
  0x16   :  { %s4710_s20 = sld [smem:[%s5499_s0 + %s4589_s15]]   ;;  %s4593_s15 = smov 19  }
  0x17   :  { %s4715_s27 = sld [smem:[%s5499_s0 + %s4590_s22]]   ;;  %s4594_s22 = smov 20  }
  0x18   :  { %s4720_s4 = sld [smem:[%s5499_s0 + %s4591_s28]]   ;;  %s4595_s28 = smov 21  }
  0x1a   :  { %5525 = sst [smem:[#allocation22_spill]] %s4700_s6 }
  0x1b   :  { %5526 = sst [smem:[#allocation23_spill]] %s4705_s12 }
  0x1c   :  { %5527 = sst [smem:[#allocation24_spill]] %s4710_s20 }
  0x1d   :  { %5528 = sst [smem:[#allocation25_spill]] %s4715_s27 }
  0x1e   :  { %5529 = sst [smem:[#allocation26_spill]] %s4720_s4  ;;  %s4609_s4 = smov 35  }
  0x1f   :  { %s4725_s12 = sld [smem:[%s5499_s0 + %s4592_s7]]   ;;  %s4596_s7 = smov 22  }
  0x20   :  { %s4730_s20 = sld [smem:[%s5499_s0 + %s4593_s15]]   ;;  %s4597_s15 = smov 23  }
  0x21   :  { %s4735_s27 = sld [smem:[%s5499_s0 + %s4594_s22]]   ;;  %s4598_s22 = smov 24  }
  0x22   :  { %s4740_s6 = sld [smem:[%s5499_s0 + %s4595_s28]]   ;;  %s4599_s28 = smov 25  }
  0x23   :  { %s4745_s30 = sld [smem:[%s5499_s0 + %s4596_s7]]   ;;  %s4600_s7 = smov 26  }
  0x24   :  { %s4760_s24 = sld [smem:[%s5499_s0 + %s4599_s28]]   ;;  %s4603_s28 = smov 29  }
  0x25   :  { %5530 = sst [smem:[#allocation27_spill]] %s4725_s12 }
  0x26   :  { %5531 = sst [smem:[#allocation28_spill]] %s4730_s20 }
  0x27   :  { %5532 = sst [smem:[#allocation29_spill]] %s4735_s27 }
  0x28   :  { %s4750_s20 = sld [smem:[%s5499_s0 + %s4597_s15]]   ;;  %s4601_s15 = smov 27  }
  0x29   :  { %5533 = sst [smem:[#allocation30_spill]] %s4745_s30 }
  0x2a   :  { %s4755_s27 = sld [smem:[%s5499_s0 + %s4598_s22]]   ;;  %s4602_s22 = smov 28  }
  0x2b   :  { %5535 = sst [smem:[#allocation32_spill]] %s4760_s24 }
  0x2c   :  { %s4765_s19 = sld [smem:[%s5499_s0 + %s4600_s7]]   ;;  %s4604_s7 = smov 30  }
  0x2d   :  { %s4770_s12 = sld [smem:[%s5499_s0 + %s4601_s15]]   ;;  %s4605_s15 = smov 31  }
  0x2e   :  { %s4780_s24 = sld [smem:[%s5499_s0 + %s4603_s28]]   ;;  %s4607_s28 = smov 33  }
  0x2f   :  { %s4785_s16 = sld [smem:[%s5499_s0 + %s4604_s7]]   ;;  %s4608_s7 = smov 34  }
  0x30   :  { %5534 = sst [smem:[#allocation31_spill]] %s4755_s27 }
  0x31   :  { %s4775_s27 = sld [smem:[%s5499_s0 + %s4602_s22]]   ;;  %s4606_s22 = smov 32  }
  0x32   :  { %s4790_s23 = sld [smem:[%s5499_s0 + %s4605_s15]]  }
  0x33   :  { %s4795_s1 = sld [smem:[%s5499_s0 + %s4606_s22]]  }
  0x34   :  { %s4800_s10 = sld [smem:[%s5499_s0 + %s4607_s28]]  }
  0x35   :  { %s4805_s30 = sld [smem:[%s5499_s0 + %s4608_s7]]   ;;  %s4467_s7 = scalar_lea.vmem %s82_s3, 32 }
  0x36   :  { %p4468_p0 = scmp.ne.s32.totalorder %s82_s3, %s4467_s7  ;;  %p4473_p2 = scmp.lt.s32.totalorder %s4467_s7, %s4467_s7 }
  0x38   :  { %5536 = sst [smem:[#allocation33_spill]] %s4790_s23  ;;  %p4474_p3 = por %p4473_p2, %p4472_p1 }
  0x39   :  { %5537 = sst [smem:[#allocation34_spill]] %s4795_s1 }
  0x3a   :  { %5538 = sst [smem:[#allocation35_spill]] %s4800_s10  ;;  %p4475_p4 = pnand %p4474_p3, %p4468_p0 }
  0x3b   :  { %s4810_s23 = sld [smem:[%s5499_s0 + %s4609_s4]]  }
  0x3c   :  { %s4815_s1 = sld [smem:[%s5499_s0 + %s4610_s14]]  }
  0x3d   :  { %s4820_s10 = sld [smem:[%s5499_s0 + %s4611_s8]]  }
  0x3e   :  { %4478 = shalt.err (!%p4475_p4)  }
  0x3f   :  { %s4612_s11 = smov [#allocation3]  }
  0x40   :  { %84 = dma.vmem_to_smem %s82_s3, 32, %s4612_s11, [#allocation2] }
  0x41   :  { %4567 = dma.done.wait [#allocation2], 32 }
  0x42   :  { %4568 = vsyncadd [#allocation2], 4294967264 }
  0x43   :  { %87 = sfence }
  0x44   :  { %88 = vsyncpa [#allocation6], 0 }
  0x45   :  { %89 = vsyncpa [#allocation9], 0 }
  0x46   :  { %90 = vsyncpa [#allocation7], 0  ;;  %s4613_s0 = smov [#allocation8]   ;;  %s4614_s4 = smov [#allocation5]  }
  0x47   :  { %s156_s5 = sshll.u32 %s4613_s0, 4  ;;  %s144_s15 = sshll.u32 %s4614_s4, 4  ;;  %s157_s5 = int_to_ptr.vmem [resolvable:$true] %s156_s5  ;;  %s4823_s15 = int_to_ptr.vmem [resolvable:$true] %s144_s15 }
  0x48   :  { %s4479_s18 = scalar_lea.hbm %s4770_s12, 512 }
  0x49   :  { %p4480_p5 = scmp.ne.s32.totalorder %s4770_s12, %s4479_s18  ;;  %p4483_p6 = scmp.lt.u32.totalorder %s4479_s18, %s4770_s12 }
  0x4b   :  { %p4485_p7 = pnand %p4483_p6, %p4480_p5 }
  0x4d   :  { %4488 = shalt.err (!%p4485_p7)
}
  0x4e   :  { %s4489_s14 = scalar_lea.vmem %s157_s5, 512  ;;  %p4494_p9 = scmp.lt.s32.totalorder %s157_s5, %s157_s5 }
  0x4f   :  { %p4490_p8 = scmp.ne.s32.totalorder %s157_s5, %s4489_s14  ;;  %p4495_p10 = scmp.lt.s32.totalorder %s4489_s14, %s4489_s14 }
  0x51   :  { %p4496_p11 = por %p4495_p10, %p4494_p9 }
  0x53   :  { %p4497_p12 = pnand %p4496_p11, %p4490_p8 }
  0x55   :  { %4500 = shalt.err (!%p4497_p12)
}
  0x56   :  { %s4615_s22 = smov 128   ;;  %s4616_s26 = smov 8  }
  0x57   :  { %162 = dma.hbm_to_vmem [thread:$0]  %s4770_s12, 512, %s157_s5, [#allocation9], %s4615_s22, %s4615_s22, %s4616_s26  }
  0x58   :  { %s4501_s8 = scalar_lea.hbm %s4765_s19, 512 }
  0x59   :  { %p4502_p13 = scmp.ne.s32.totalorder %s4765_s19, %s4501_s8  ;;  %p4505_p0 = scmp.lt.u32.totalorder %s4501_s8, %s4765_s19 }
  0x5b   :  { %p4507_p1 = pnand %p4505_p0, %p4502_p13 }
  0x5d   :  { %4510 = shalt.err (!%p4507_p1)
}
  0x5e   :  { %s4511_s28 = scalar_lea.vmem %s4823_s15, 512  ;;  %p4516_p3 = scmp.lt.s32.totalorder %s4823_s15, %s4823_s15 }
  0x5f   :  { %p4512_p2 = scmp.ne.s32.totalorder %s4823_s15, %s4511_s28  ;;  %p4517_p4 = scmp.lt.s32.totalorder %s4511_s28, %s4511_s28 }
  0x61   :  { %p4518_p5 = por %p4517_p4, %p4516_p3 }
  0x63   :  { %p4519_p6 = pnand %p4518_p5, %p4512_p2 }
  0x65   :  { %4522 = shalt.err (!%p4519_p6)
}
  0x66   :  { %150 = dma.hbm_to_vmem [thread:$0]  %s4765_s19, 512, %s4823_s15, [#allocation6], %s4615_s22, %s4615_s22, %s4616_s26  }
  0x67   :  { %s4617_s12 = smov [#allocation10]   ;;  %s4523_s3 = scalar_lea.hbm %s4775_s27, 512 }
  0x68   :  { %s168_s2 = sshll.u32 %s4617_s12, 4  ;;  %p4524_p7 = scmp.ne.s32.totalorder %s4775_s27, %s4523_s3  ;;  %s169_s2 = int_to_ptr.vmem [resolvable:$true] %s168_s2 }
  0x69   :  { %p4527_p8 = scmp.lt.u32.totalorder %s4523_s3, %s4775_s27 }
  0x6b   :  { %p4529_p9 = pnand %p4527_p8, %p4524_p7 }
  0x6d   :  { %4532 = shalt.err (!%p4529_p9)
}
  0x6e   :  { %s4533_s7 = scalar_lea.vmem %s169_s2, 512  ;;  %p4538_p11 = scmp.lt.s32.totalorder %s169_s2, %s169_s2 }
  0x6f   :  { %p4534_p10 = scmp.ne.s32.totalorder %s169_s2, %s4533_s7  ;;  %p4539_p12 = scmp.lt.s32.totalorder %s4533_s7, %s4533_s7 }
  0x71   :  { %p4540_p13 = por %p4539_p12, %p4538_p11 }
  0x73   :  { %p4541_p0 = pnand %p4540_p13, %p4534_p10 }
  0x75   :  { %4544 = shalt.err (!%p4541_p0)
}
  0x76   :  { %174 = dma.hbm_to_vmem [thread:$0]  %s4775_s27, 512, %s169_s2, [#allocation9], %s4615_s22, %s4615_s22, %s4616_s26  }
  0x77   :  { %4569 = dma.done.wait [#allocation6], 512  }
  0x78   :  { %4570 = vsyncadd [#allocation6], 4294966784 }
  0x79   :  { %4571 = dma.done.wait [#allocation9], 1024  }
  0x7a   :  { %4572 = vsyncadd [#allocation9], 4294966272  ;;  %s245_s19 = sld [smem:[#allocation3]]  ;;  %s256_s0 = scalar_lea.vmem %s4650_s17, %s4640_s9  ;;  %vm254_vm0 = vcmask 1040384   ;;  %vm265_vm1 = vcmask 254976   ;;  %v296_v12 = vld [vmem:[%s4660_s25] sm:$0xff]  ;;  %v290_v29 = vlaneseq }
  0x7b   :  { %s3680_s11 = sld [smem:[#allocation3 + $0x80]]  ;;  %v3681_v3 = vld [vmem:[%s256_s0] ss:$0 sm:$0xff]  ;;  %v297_v13 = vld [vmem:[%s4660_s25 + $0x8] sm:$0xff]  ;;  %v298_v14 = vld [vmem:[%s4660_s25 + $0x10] sm:$0xff]  ;;  %v4618_v15 = vmov 0.0|0.0  }
  0x7c   :  { %4204 = vmatprep.subr.bf16.mxu0 %v4618_v15  ;;  %v4205_v16 = vpack.c.bf16 %v297_v13, %v296_v12  ;;  %v299_v17 = vld [vmem:[%s4660_s25 + $0x18] sm:$0xff]  ;;  %vm4619_vm2 = vmmov 0   ;;  %v4620_v18 = vmov 0.0   ;;  %4210 = vmatprep.subr.bf16.mxu1 %v4618_v15  ;;  %v3682_v24 = vld [vmem:[%s4655_s21] ss:$0 sm:$0xff]  ;;  %vm307_vm3 = vcmask 261120  }
  0x7d   :  { %3925 = vmatprep.mubr.msk.f32.mxu0 %vm4619_vm2, %v4620_v18  ;;  %3936 = vmatprep.mubr.msk.f32.mxu1 %vm4619_vm2, %v4620_v18  ;;  %v4208_v19 = vpack.c.bf16 %v299_v17, %v298_v14  ;;  %v3683_v26 = vld [vmem:[%s4655_s21 + $0x1] ss:$0 sm:$0xff]  ;;  %v3684_v30 = vld [vmem:[%s4665_s29] ss:$0 sm:$0xff]  ;;  %v4879_v31 = vshrl.u32 %v290_v29, 7  ;;  %s4622_s17 = smov 32  }
  0x7e   :  { %4206 = vmatpush3.bf16.msra.mxu0 %v4205_v16  ;;  %s4623_s21 = smov 64   ;;  %p213_p1 = scmp.lt.s32.totalorder %s4640_s9, 7  ;;  %vm414_vm4 = vcmask 1041409   ;;  %vm417_vm5 = vcmask 1042434   ;;  %vm420_vm6 = vcmask 1043459   ;;  %vm423_vm7 = vcmask 1044484  }
  0x7f   :  { %4207 = vmatprep.subr.bf16.mxu0 %v4618_v15  ;;  %v4889_v36 = vsub.s32 0, %v4879_v31  ;;  %vm426_vm8 = vcmask 1045509   ;;  %v4624_v55 = vmov 0   ;;  %vm429_vm9 = vcmask 1046534   ;;  %v237_v14 = vld [vmem:[%s4740_s6] sm:$0xff]  ;;  %v238_v16 = vld [vmem:[%s4740_s6 + $0x8] sm:$0xff] }
  0x80   :  { %s246_s5 = scalar_lea.vmem %s4645_s13, %s245_s19  ;;  %4402 = vset.pattern.permute.xlu1 %v4624_v55  ;;  %4404 = vset.pattern.permute.xlu0 %v4624_v55  ;;  %vm432_vm10 = vcmask 1047559   ;;  %v239_v17 = vld [vmem:[%s4740_s6 + $0x10] sm:$0xff]  ;;  %vm584_vm12 = vcmask 1043456   ;;  %vm561_vm13 = vcmask 31744   ;;  %s5548_s22 = sld [smem:[#allocation19_spill]]  ;;  %vm1785_vm14 = vcmask 523264  }
  0x81   :  { %s249_s4 = scalar_lea.vmem %s4645_s13, %s3680_s11  ;;  %v247_v0 = vld [vmem:[%s246_s5] sm:$0x1]  ;;  %s4621_s13 = smov 96  }
  0x82   :  { %v250_v1 = vld [vmem:[%s249_s4] sm:$0x1]  ;;  %4209 = vmatpush3.bf16.msra.mxu0 %v4208_v19  ;;  %s214_s27 = scalar_select %p213_p1, %s4640_s9, 7 }
  0x83   :  { %v252_v2 = vrot.slane %v250_v1, 7  ;;  %3955 = vmatprep.subr.mxu0 %v4620_v18  ;;  %s5549_s26 = sld [smem:[#allocation32_spill]]  ;;  %s5550_s8 = sld [smem:[#allocation20_spill]] }
  0x84   :  { %s4898_s15 = sshll.u32 %s214_s27, 1  ;;  %s5551_s28 = sld [smem:[#allocation21_spill]] }
  0x85   :  { %v255_v4 = vsel %vm254_vm0, %v247_v0, %v252_v2  ;;  %s216_s18 = scalar_lea.vmem %s4805_s30, %s4898_s15  ;;  %s222_s14 = scalar_lea.vmem %s4810_s23, %s4898_s15 }
  0x86   :  { %v262_v5 = vadd.f32 %v3681_v3, %v255_v4  ;;  %s5543_s30 = sld [smem:[#allocation17_spill]]  ;;  %s5547_s23 = sld [smem:[#allocation31_spill]] }
  0x87   :  { %s5552_s12 = sld [smem:[#allocation22_spill]]  ;;  %s5553_s2 = sld [smem:[#allocation24_spill]] }
  0x88   :  { %v266_v6 = vsel %vm265_vm1, %v262_v5, 0.0  ;;  %s5554_s3 = sld [smem:[#allocation23_spill]]  ;;  %s5555_s7 = sld [smem:[#allocation25_spill]] }
  0x89   :  { %267 = vadd.xlane.f32.xlu0 %v266_v6  ;;  %s228_s19 = scalar_lea.vmem %s4815_s1, %s4898_s15  ;;  %s234_s1 = scalar_lea.vmem %s4820_s10, %s4898_s15 }
  0x8a   :  { %s5558_s10 = sld [smem:[#allocation28_spill]]  ;;  %s5559_s11 = sld [smem:[#allocation29_spill]] }
  0x8b   :  { %s4626_s0 = smov [#allocation11]  }
  0x8c   :  { %s3554_s5 = sshll.u32 %s4626_s0, 4  ;;  %s3555_s5 = int_to_ptr.vmem [resolvable:$true] %s3554_s5 }
  0x8d   :  { %s4545_s4 = scalar_lea.vmem %s3555_s5, 32  ;;  %p4550_p3 = scmp.lt.s32.totalorder %s3555_s5, %s3555_s5 }
  0x8e   :  { %p4546_p2 = scmp.ne.s32.totalorder %s3555_s5, %s4545_s4  ;;  %p4551_p4 = scmp.lt.s32.totalorder %s4545_s4, %s4545_s4 }
  0x90   :  { %p4552_p5 = por %p4551_p4, %p4550_p3 }
  0x92   :  { %p4553_p6 = pnand %p4552_p5, %p4546_p2 }
 0x116   :  { %v268_v7 = vpop.xlane.xlu0 %267 }
 0x117   :  { %v270_v8 = vmul.f32 0.03125, %v268_v7 }
 0x119   :  { %v271_v9 = vsub.f32 %v262_v5, %v270_v8 }
 0x11b   :  { %v272_v10 = vmul.f32 %v271_v9, %v271_v9 }
 0x11d   :  { %v273_v11 = vsel %vm265_vm1, %v272_v10, 0.0 }
 0x11e   :  { %274 = vadd.xlane.f32.xlu0 %v273_v11 }
 0x1ab   :  { %v275_v20 = vpop.xlane.xlu0 %274 }
 0x1ac   :  { %v276_v21 = vmul.f32 0.03125, %v275_v20 }
 0x1ae   :  { %v277_v22 = vadd.f32 1e-05, %v276_v21  ;;  %v4940_v21 = vpack.c.bf16 %v238_v16, %v237_v14 }
 0x1b0   :  { %4408 = vrsqrt.f32 %v277_v22  ;;  %v240_v22 = vld [vmem:[%s4740_s6 + $0x18] sm:$0xff]  ;;  %4212 = vmatpush3.bf16.msra.mxu1 %v4940_v21  ;;  %s5544_s6 = sld [smem:[#allocation18_spill]] }
 0x1b1   :  { %4213 = vmatprep.subr.bf16.mxu1 %v4618_v15 }
 0x1ba   :  { %v4409_v23 = vpop.eup %4408 }
 0x1bb   :  { %v279_v25 = vmul.f32 %v4409_v23, %v271_v9 }
 0x1bd   :  { %v284_v27 = vmul.f32 %v3682_v24, %v279_v25 }
 0x1bf   :  { %v4872_v28 = vadd.f32 %v3683_v26, %v284_v27  ;;  %v4946_v27 = vpack.c.bf16 %v240_v22, %v239_v17 }
 0x1c1   :  { %3926 = vmatmul.mubr.msk.f32.vlgmr.msra.gmra.mrb[0].mxu0 %vm307_vm3, %v4872_v28  ;;  %4215 = vmatpush3.bf16.msra.mxu1 %v4946_v27 }
 0x1c2   :  { %3957 = vmatprep.mubr.msk.f32.mxu0 %vm4619_vm2, %v4620_v18  ;;  %3939 = vmatprep.subr.mxu1 %v4620_v18 }
 0x294   :  { %v377_v32 = vpop.f32.mrb[0].mxu0 }
 0x295   :  { %v4881_v33 = vadd.f32 %v3684_v30, %v377_v32  ;;  %v3927_v34 = vpop.f32.mrb[1].mxu0 }
 0x297   :  { %383 = vrot.lane.b32.xlu1 %v4881_v33, %s4621_s13  ;;  %v4886_v35 = vmul.f32 0.35355338, %v4881_v33 }
 0x299   :  { %v475_v37 = vrot.slane %v4886_v35, %v4889_v36 }
 0x29b   :  { %477 = vrot.lane.b32.xlu0 %v475_v37, %s4622_s17 }
 0x29f   :  { %387 = vrot.lane.b32.xlu0 %v4881_v33, %s4623_s21 }
 0x309   :  { %v384_v38 = vpop.permute.xlu1 %383 }
 0x30a   :  { %386 = vst.msk [vmem:[%s216_s18] sm:$0x3] %vm265_vm1, %v384_v38 }
 0x30d   :  { %v4903_v39 = vpop.permute.xlu0 %477 }
 0x311   :  { %v388_v40 = vpop.permute.xlu0 %387  ;;  %v392_v41 = vld [vmem:[%s4780_s24 + $0x2] sm:$0x1]  ;;  %v393_v42 = vld [vmem:[%s4780_s24 + $0x4] sm:$0x1]  ;;  %v394_v43 = vld [vmem:[%s4780_s24 + $0x6] sm:$0x1] }
 0x312   :  { %390 = vst.msk [vmem:[%s222_s14] sm:$0x3] %vm265_vm1, %v388_v40  ;;  %v395_v44 = vld [vmem:[%s4780_s24 + $0x8] sm:$0x1]  ;;  %v413_v45 = vrot.slane %v392_v41, 7  ;;  %v416_v46 = vrot.slane %v393_v42, 6 }
 0x313   :  { %v391_v47 = vld [vmem:[%s4780_s24] sm:$0x1]  ;;  %v396_v48 = vld [vmem:[%s4780_s24 + $0xa] sm:$0x1]  ;;  %v397_v49 = vld [vmem:[%s4780_s24 + $0xc] sm:$0x1] }
 0x314   :  { %v415_v50 = vsel %vm414_vm4, %v413_v45, %v391_v47  ;;  %v419_v51 = vrot.slane %v394_v43, 5  ;;  %v398_v52 = vld [vmem:[%s4780_s24 + $0xe] sm:$0x1]  ;;  %v422_v54 = vrot.slane %v395_v44, 4  ;;  %v425_v57 = vrot.slane %v396_v48, 3 }
 0x315   :  { %v418_v53 = vsel %vm417_vm5, %v416_v46, %v415_v50  ;;  %v428_v59 = vrot.slane %v397_v49, 2  ;;  %v431_v61 = vrot.slane %v398_v52, 1  ;;  %v671_v32 = vld [vmem:[%s4780_s24 + $0x3] sm:$0x1]  ;;  %v672_v34 = vld [vmem:[%s4780_s24 + $0x5] sm:$0x1]  ;;  %v292_v43 = vstv %s4640_s9 }
 0x316   :  { %v421_v56 = vsel %vm420_vm6, %v419_v51, %v418_v53  ;;  %v690_v37 = vrot.slane %v671_v32, 7  ;;  %v670_v38 = vld [vmem:[%s4780_s24 + $0x1] sm:$0x1]  ;;  %v692_v40 = vrot.slane %v672_v34, 6  ;;  %v673_v42 = vld [vmem:[%s4780_s24 + $0x7] sm:$0x1]  ;;  %vm4963_vm11 = vcmp.eq.s32.totalorder %v4879_v31, %v292_v43 }
 0x317   :  { %v424_v58 = vsel %vm423_vm7, %v422_v54, %v421_v56  ;;  %v674_v45 = vld [vmem:[%s4780_s24 + $0x9] sm:$0x1]  ;;  %v694_v46 = vrot.slane %v673_v42, 5  ;;  %v4969_v48 = vrot.slane %v4881_v33, %v4889_v36  ;;  %v675_v51 = vld [vmem:[%s4780_s24 + $0xb] sm:$0x1]  ;;  %s5541_s9 = sld [smem:[#allocation30_spill]] }
 0x318   :  { %v427_v60 = vsel %vm426_vm8, %v425_v57, %v424_v58  ;;  %v691_v41 = vsel %vm414_vm4, %v690_v37, %v670_v38  ;;  %v696_v52 = vrot.slane %v674_v45, 4  ;;  %v4979_v57 = vsub.s32 1, %v4879_v31  ;;  %v676_v58 = vld [vmem:[%s4780_s24 + $0xd] sm:$0x1] }
 0x319   :  { %v709_v62 = vld [vmem:[%s4785_s16 + $0x3] sm:$0x1]  ;;  %v710_v63 = vld [vmem:[%s4785_s16 + $0x5] sm:$0x1]  ;;  %v430_v0 = vsel %vm429_vm9, %v428_v59, %v427_v60  ;;  %v711_v1 = vld [vmem:[%s4785_s16 + $0x7] sm:$0x1]  ;;  %v693_v44 = vsel %vm417_vm5, %v692_v40, %v691_v41 }
 0x31a   :  { %v433_v2 = vsel %vm432_vm10, %v431_v61, %v430_v0  ;;  %v712_v3 = vld [vmem:[%s4785_s16 + $0x9] sm:$0x1]  ;;  %v724_v4 = vrot.slane %v709_v62, 7  ;;  %v726_v5 = vrot.slane %v710_v63, 6  ;;  %v708_v6 = vld [vmem:[%s4785_s16 + $0x1] sm:$0x1]  ;;  %v695_v49 = vsel %vm420_vm6, %v694_v46, %v693_v44 }
 0x31b   :  { %434 = vrot.lane.b32.xlu1 %v433_v2, %s4622_s17  ;;  %v713_v7 = vld [vmem:[%s4785_s16 + $0xb] sm:$0x1]  ;;  %v714_v8 = vld [vmem:[%s4785_s16 + $0xd] sm:$0x1]  ;;  %v715_v9 = vld [vmem:[%s4785_s16 + $0xf] sm:$0x1]  ;;  %v697_v56 = vsel %vm423_vm7, %v696_v52, %v695_v49  ;;  %v681_v0 = vrot.slane %v4881_v33, %v4979_v57  ;;  %v745_v33 = vrot.slane %v4886_v35, %v4979_v57 }
 0x31c   :  { %v725_v10 = vsel %vm414_vm4, %v724_v4, %v708_v6  ;;  %v728_v11 = vrot.slane %v711_v1, 5  ;;  %v730_v13 = vrot.slane %v712_v3, 4  ;;  %v732_v20 = vrot.slane %v713_v7, 3  ;;  %v242_v60 = vld [vmem:[%s4750_s20] sm:$0xff]  ;;  %v677_v62 = vld [vmem:[%s4780_s24 + $0xf] sm:$0x1] }
 0x31d   :  { %v727_v12 = vsel %vm417_vm5, %v726_v5, %v725_v10  ;;  %v734_v24 = vrot.slane %v714_v8, 2  ;;  %v736_v26 = vrot.slane %v715_v9, 1  ;;  %v698_v59 = vrot.slane %v675_v51, 3  ;;  %v439_v7 = vld [vmem:[%s4785_s16 + $0x2] sm:$0x1]  ;;  %s5542_s24 = sld [smem:[#allocation16_spill]] }
 0x31e   :  { %v729_v19 = vsel %vm420_vm6, %v728_v11, %v727_v12  ;;  %v700_v63 = vrot.slane %v676_v58, 2  ;;  %v702_v3 = vrot.slane %v677_v62, 1  ;;  %v4625_v5 = vmov 1   ;;  %v440_v8 = vld [vmem:[%s4785_s16 + $0x4] sm:$0x1]  ;;  %s5545_s20 = sld [smem:[#allocation26_spill]] }
 0x31f   :  { %v731_v23 = vsel %vm423_vm7, %v730_v13, %v729_v19  ;;  %v699_v61 = vsel %vm426_vm8, %v698_v59, %v697_v56  ;;  %v454_v9 = vrot.slane %v439_v7, 7  ;;  %v438_v10 = vld [vmem:[%s4785_s16] sm:$0x1]  ;;  %v456_v11 = vrot.slane %v440_v8, 6  ;;  %v441_v13 = vld [vmem:[%s4785_s16 + $0x6] sm:$0x1] }
 0x320   :  { %v733_v25 = vsel %vm426_vm8, %v732_v20, %v731_v23  ;;  %v442_v17 = vld [vmem:[%s4785_s16 + $0x8] sm:$0x1]  ;;  %v458_v19 = vrot.slane %v441_v13, 5  ;;  %v443_v22 = vld [vmem:[%s4785_s16 + $0xa] sm:$0x1] }
 0x321   :  { %v735_v29 = vsel %vm429_vm9, %v734_v24, %v733_v25  ;;  %v455_v12 = vsel %vm414_vm4, %v454_v9, %v438_v10  ;;  %v460_v23 = vrot.slane %v442_v17, 4  ;;  %v462_v32 = vrot.slane %v443_v22, 3  ;;  %v445_v37 = vld [vmem:[%s4785_s16 + $0xe] sm:$0x1]  ;;  %v5024_v43 = vld [vmem:[%s5541_s9] sm:$0xf] }
 0x322   :  { %v737_v30 = vsel %vm432_vm10, %v736_v26, %v735_v29  ;;  %v457_v14 = vsel %vm417_vm5, %v456_v11, %v455_v12  ;;  %v466_v41 = vrot.slane %v445_v37, 1  ;;  %3956 = vmatpush3.msk.msra.mxu0 %vm584_vm12, %v5024_v43 }
 0x323   :  { %738 = vrot.lane.b32.xlu0 %v737_v30, %s4623_s21  ;;  %v459_v20 = vsel %vm420_vm6, %v458_v19, %v457_v14  ;;  %v444_v30 = vld [vmem:[%s4785_s16 + $0xc] sm:$0x1]  ;;  %4222 = vmatprep.subr.bf16.mxu0 %v4618_v15  ;;  %s5546_s16 = sld [smem:[#allocation27_spill]] }
 0x324   :  { %v461_v29 = vsel %vm423_vm7, %v460_v23, %v459_v20  ;;  %v464_v38 = vrot.slane %v444_v30, 2 }
 0x325   :  { %v463_v34 = vsel %vm426_vm8, %v462_v32, %v461_v29 }
 0x326   :  { %v465_v40 = vsel %vm429_vm9, %v464_v38, %v463_v34 }
 0x327   :  { %v467_v42 = vsel %vm432_vm10, %v466_v41, %v465_v40  ;;  %v935_v41 = vld [vmem:[%s5542_s24] sm:$0xff] }
 0x38d   :  { %v435_v50 = vpop.permute.xlu1 %434 }
 0x38e   :  { %v437_v53 = vsel %vm4963_vm11, %v4969_v48, %v435_v50 }
 0x38f   :  { %v480_v54 = vmul.f32 %v4903_v39, %v437_v53  ;;  %v701_v39 = vsel %vm429_vm9, %v700_v63, %v699_v61 }
 0x390   :  { %v703_v4 = vsel %vm432_vm10, %v702_v3, %v701_v39 }
 0x391   :  { %487 = vrot.lane.b32.xlu1 %v480_v54, %s4621_s13 }
 0x395   :  { %v739_v1 = vpop.permute.xlu0 %738  ;;  %483 = vperm.xlu1 %4402, %v242_v60  }
 0x396   :  { %v741_v2 = vsel %vm4963_vm11, %v681_v0, %v739_v1 }
 0x397   :  { %923 = vrot.lane.b32.xlu0 %v741_v2, %s4623_s21 }
 0x399   :  { %704 = vrot.lane.b32.xlu1 %v703_v4, %s4622_s17 }
 0x39a   :  { %4403 = vset.pattern.permute.xlu1 %v4625_v5 }
 0x39d   :  { %747 = vrot.lane.b32.xlu1 %v745_v33, %s4622_s17 }
 0x403   :  { %v488_v6 = vpop.permute.xlu1 %487 }
 0x404   :  { %3937 = vmatmul.mubr.msk.f32.vlgmr.msra.gmra.mrb[0].mxu1 %vm307_vm3, %v488_v6 }
 0x405   :  { %3941 = vmatprep.mubr.msk.f32.mxu1 %vm4619_vm2, %v4620_v18  ;;  %3940 = vmatpush3.msk.msra.mxu1 %vm584_vm12, %v5024_v43 }
 0x406   :  { %4216 = vmatprep.subr.bf16.mxu1 %v4618_v15 }
 0x414   :  { %v5004_v35 = vpop.permute.xlu1 %483 }
 0x418   :  { %v705_v16 = vpop.permute.xlu1 %704 }
 0x419   :  { %v707_v24 = vsel %vm4963_vm11, %v681_v0, %v705_v16 }
 0x41c   :  { %v748_v25 = vpop.permute.xlu1 %747 }
 0x41d   :  { %v750_v26 = vmul.f32 %v748_v25, %v707_v24 }
 0x41f   :  { %756 = vrot.lane.b32.xlu1 %v750_v26, %s4621_s13 }
 0x423   :  { %752 = vperm.xlu1 %4403, %v242_v60  }
 0x427   :  { %468 = vrot.lane.b32.xlu1 %v467_v42, %s4623_s21  ;;  %v936_v42 = vld [vmem:[%s5542_s24 + $0x8] sm:$0xff] }
 0x428   :  { %4405 = vset.pattern.permute.xlu1 %v4624_v55 }
 0x491   :  { %v757_v44 = vpop.permute.xlu1 %756 }
 0x4a2   :  { %v5032_v45 = vpop.permute.xlu1 %752 }
 0x4a6   :  { %v469_v46 = vpop.permute.xlu1 %468 }
 0x4a7   :  { %v471_v55 = vsel %vm4963_vm11, %v4969_v48, %v469_v46  ;;  %v4223_v46 = vpack.c.bf16 %v936_v42, %v935_v41 }
 0x4a8   :  { %659 = vrot.lane.b32.xlu1 %v471_v55, %s4623_s21  ;;  %v938_v55 = vld [vmem:[%s5542_s24 + $0x18] sm:$0xff] }
 0x4d7   :  { %v557_v49 = vpop.f32.mrb[0].mxu1 }
 0x4d8   :  { %v558_v50 = vadd.f32 %v557_v49, %v5004_v35  ;;  %v3938_v51 = vpop.f32.mrb[1].mxu1 }
 0x4da   :  { %v562_v52 = vsel %vm561_vm13, %v558_v50, -inf }
 0x4db   :  { %v563_v53 = vrot.slane %v562_v52, 4 }
 0x4dd   :  { %v564_v54 = vmax.f32 %v562_v52, %v563_v53 }
 0x4df   :  { %v565_v56 = vrot.slane %v564_v54, 2 }
 0x4e1   :  { %v566_v58 = vmax.f32 %v564_v54, %v565_v56  ;;  %v924_v56 = vpop.permute.xlu0 %923 }
 0x4e3   :  { %v567_v59 = vrot.slane %v566_v58, 1 }
 0x4e5   :  { %v568_v60 = vmax.f32 %v566_v58, %v567_v59 }
 0x4e7   :  { %v569_v61 = vsub.f32 %v558_v50, %v568_v60 }
 0x4e9   :  { %v570_v62 = vmul.f32 1.442695, %v569_v61 }
 0x4eb   :  { %4410 = vpow2.f32 %v570_v62 }
 0x4f5   :  { %v4411_v63 = vpop.eup %4410 }
 0x4f6   :  { %v572_v48 = vsel %vm561_vm13, %v4411_v63, 0.0 }
 0x4f7   :  { %v573_v0 = vrot.slane %v572_v48, 4 }
 0x4f9   :  { %v574_v1 = vadd.f32 %v573_v0, %v572_v48 }
 0x4fb   :  { %v575_v39 = vrot.slane %v574_v1, 2 }
 0x4fd   :  { %v576_v2 = vadd.f32 %v575_v39, %v574_v1 }
 0x4ff   :  { %v577_v3 = vrot.slane %v576_v2, 1 }
 0x501   :  { %v578_v4 = vadd.f32 %v577_v3, %v576_v2 }
 0x503   :  { %4412 = vrcp.f32 %v578_v4 }
 0x50d   :  { %v4413_v33 = vpop.eup %4412 }
 0x50e   :  { %v580_v6 = vmul.f32 %v4413_v33, %v4411_v63 }
 0x510   :  { %3942 = vmatmul.mubr.msk.f32.vlgmr.msra.gmra.mrb[2].mxu1 %vm561_vm13, %v580_v6 }
 0x511   :  { %4218 = vmatpush3.bf16.msra.mxu1 %v4940_v21  ;;  %3952 = vmatprep.mubr.msk.f32.mxu1 %vm4619_vm2, %v4620_v18 }
 0x512   :  { %4219 = vmatprep.subr.bf16.mxu1 %v4618_v15 }
 0x515   :  { %4221 = vmatpush3.bf16.msra.mxu1 %v4946_v27 }
 0x516   :  { %4228 = vmatprep.subr.bf16.mxu1 %v4618_v15 }
 0x518   :  { %3953 = vmatmul.mubr.msk.f32.vlgmr.msra.gmra.mrb[4].mxu1 %vm307_vm3, %v757_v44  ;;  %v937_v44 = vld [vmem:[%s5542_s24 + $0x10] sm:$0xff] }
 0x519   :  { %3979 = vmatprep.mubr.msk.f32.mxu1 %vm4619_vm2, %v4620_v18  ;;  %v4226_v49 = vpack.c.bf16 %v938_v55, %v937_v44  ;;  %v243_v55 = vld [vmem:[%s5547_s23] sm:$0xff] }
 0x51a   :  { %v660_v50 = vpop.permute.xlu1 %659 }
 0x5e3   :  { %v654_v7 = vpop.f32.mrb[2].mxu1 }
 0x5e4   :  { %v3943_v8 = vpop.f32.mrb[3].mxu1  ;;  %v662_v51 = vmul.f32 %v660_v50, %v654_v7  ;;  %v3692_v7 = vld [vmem:[%s5543_s30] ss:$0 sm:$0xff] }
 0x5e6   :  { %v663_v52 = vsel %vm307_vm3, %v662_v51, 0.0 }
 0x5e7   :  { %v664_v53 = vrot.slane %v663_v52, 4 }
 0x5e9   :  { %v665_v54 = vadd.f32 %v664_v53, %v663_v52 }
 0x5eb   :  { %v826_v9 = vpop.f32.mrb[4].mxu1  ;;  %v666_v61 = vrot.slane %v665_v54, 2 }
 0x5ec   :  { %v827_v10 = vadd.f32 %v826_v9, %v5032_v45  ;;  %v3954_v11 = vpop.f32.mrb[5].mxu1 }
 0x5ed   :  { %v667_v48 = vadd.f32 %v666_v61, %v665_v54  ;;  %v1128_v54 = vld [vmem:[%s5549_s26] sm:$0xff] }
 0x5ee   :  { %v830_v12 = vsel %vm561_vm13, %v827_v10, -inf }
 0x5ef   :  { %v831_v13 = vrot.slane %v830_v12, 4  ;;  %v668_v39 = vrot.slane %v667_v48, 1 }
 0x5f1   :  { %v832_v14 = vmax.f32 %v830_v12, %v831_v13  ;;  %v669_v4 = vadd.f32 %v668_v39, %v667_v48 }
 0x5f3   :  { %v833_v16 = vrot.slane %v832_v14, 2 }
 0x5f5   :  { %v834_v17 = vmax.f32 %v832_v14, %v833_v16 }
 0x5f7   :  { %v835_v19 = vrot.slane %v834_v17, 1 }
 0x5f9   :  { %v836_v20 = vmax.f32 %v834_v17, %v835_v19 }
 0x5fb   :  { %v837_v22 = vsub.f32 %v827_v10, %v836_v20  ;;  %v1043_v20 = vld [vmem:[%s5544_s6] sm:$0xff] }
 0x5fd   :  { %v838_v23 = vmul.f32 1.442695, %v837_v22  ;;  %v1044_v22 = vld [vmem:[%s5544_s6 + $0x8] sm:$0xff] }
 0x5ff   :  { %4414 = vpow2.f32 %v838_v23  ;;  %v1045_v23 = vld [vmem:[%s5544_s6 + $0x10] sm:$0xff] }
 0x609   :  { %v4415_v24 = vpop.eup %4414 }
 0x60a   :  { %v840_v25 = vsel %vm561_vm13, %v4415_v24, 0.0 }
 0x60b   :  { %v841_v26 = vrot.slane %v840_v25, 4 }
 0x60d   :  { %v842_v29 = vadd.f32 %v841_v26, %v840_v25  ;;  %v1046_v25 = vld [vmem:[%s5544_s6 + $0x18] sm:$0xff] }
 0x60e   :  { %v4232_v26 = vpack.c.bf16 %v1046_v25, %v1045_v23 }
 0x60f   :  { %v843_v30 = vrot.slane %v842_v29, 2 }
 0x611   :  { %v844_v32 = vadd.f32 %v843_v30, %v842_v29 }
 0x613   :  { %v845_v34 = vrot.slane %v844_v32, 1 }
 0x615   :  { %v846_v37 = vadd.f32 %v845_v34, %v844_v32  ;;  %v5084_v32 = vld [vmem:[%s5545_s20] sm:$0x7] }
 0x616   :  { %v5087_v34 = vld [vmem:[%s5546_s16] sm:$0x7] }
 0x617   :  { %4416 = vrcp.f32 %v846_v37  ;;  %v1036_v37 = vrot.slane %v5084_v32, %v4889_v36  ;;  %v1041_v41 = vrot.slane %v5087_v34, %v4889_v36 }
 0x621   :  { %v4417_v38 = vpop.eup %4416 }
 0x622   :  { %v848_v40 = vmul.f32 %v4417_v38, %v4415_v24  ;;  %v4229_v24 = vpack.c.bf16 %v1044_v22, %v1043_v20 }
 0x624   :  { %3958 = vmatmul.mubr.msk.f32.vlgmr.msra.gmra.mrb[2].mxu0 %vm561_vm13, %v848_v40  ;;  %4230 = vmatpush3.bf16.msra.mxu1 %v4229_v24 }
 0x625   :  { %3968 = vmatprep.mubr.msk.f32.mxu0 %vm4619_vm2, %v4620_v18  ;;  %4224 = vmatpush3.bf16.msra.mxu0 %v4223_v46  ;;  %v244_v46 = vld [vmem:[%s5547_s23 + $0x8] sm:$0xff] }
 0x626   :  { %4225 = vmatprep.subr.bf16.mxu0 %v4618_v15  ;;  %4231 = vmatprep.subr.bf16.mxu1 %v4618_v15 }
 0x628   :  { %4233 = vmatpush3.bf16.msra.mxu1 %v4232_v26 }
 0x629   :  { %4227 = vmatpush3.bf16.msra.mxu0 %v4226_v49  ;;  %3993 = vmatprep.subr.msk.mxu1 %vm584_vm12, %v5024_v43  ;;  %v3694_v49 = vld [vmem:[%s5548_s22] ss:$0 sm:$0xff] }
 0x62a   :  { %4235 = vmatprep.subr.bf16.mxu0 %v4940_v21 }
 0x6f7   :  { %v918_v58 = vpop.f32.mrb[2].mxu0 }
 0x6f8   :  { %v926_v59 = vmul.f32 %v924_v56, %v918_v58  ;;  %v3959_v60 = vpop.f32.mrb[3].mxu0  ;;  %v1129_v56 = vld [vmem:[%s5549_s26 + $0x8] sm:$0xff] }
 0x6fa   :  { %v927_v62 = vsel %vm307_vm3, %v926_v59, 0.0 }
 0x6fb   :  { %v928_v63 = vrot.slane %v927_v62, 4 }
 0x6fd   :  { %v929_v0 = vadd.f32 %v928_v63, %v927_v62 }
 0x6ff   :  { %v930_v1 = vrot.slane %v929_v0, 2 }
 0x701   :  { %v931_v2 = vadd.f32 %v930_v1, %v929_v0 }
 0x703   :  { %v932_v3 = vrot.slane %v931_v2, 1 }
 0x705   :  { %v933_v33 = vadd.f32 %v932_v3, %v931_v2 }
 0x707   :  { %v934_v6 = vsel %vm254_vm0, %v669_v4, %v933_v33 }
 0x708   :  { %3969 = vmatmul.mubr.msk.f32.vlgmr.msra.gmra.mrb[4].mxu0 %vm307_vm3, %v934_v6 }
 0x709   :  { %4237 = vmatpush3.bf16.msra.mxu0 %v4940_v21 }
 0x70a   :  { %4239 = vmatprep.subr.bf16.mxu0 %v4946_v27 }
 0x70d   :  { %4241 = vmatpush3.bf16.msra.mxu0 %v4946_v27 }
 0x70e   :  { %4009 = vmatprep.subr.msk.mxu0 %vm584_vm12, %v5024_v43 }
 0x7db   :  { %v1015_v8 = vpop.f32.mrb[4].mxu0 }
 0x7dc   :  { %v1016_v9 = vadd.f32 %v3692_v7, %v1015_v8  ;;  %v3970_v10 = vpop.f32.mrb[5].mxu0 }
 0x7de   :  { %v1019_v11 = vadd.f32 %v1016_v9, %v4872_v28 }
 0x7e0   :  { %v1020_v12 = vsel %vm265_vm1, %v1019_v11, 0.0 }
 0x7e1   :  { %1021 = vadd.xlane.f32.xlu1 %v1020_v12 }
 0x7f2   :  { %1145 = vperm.xlu1 %4405, %v244_v46  }
 0x7f6   :  { %4406 = vset.pattern.permute.xlu1 %v4625_v5 }
 0x7f7   :  { %1361 = vperm.xlu1 %4406, %v243_v55  }
 0x7fb   :  { %1365 = vperm.xlu1 %4406, %v244_v46   ;;  %v1131_v46 = vld [vmem:[#allocation5 + $0x8] sm:$0xff] }
 0x86e   :  { %v1022_v13 = vpop.xlane.xlu1 %1021 }
 0x86f   :  { %v1023_v14 = vmul.f32 0.03125, %v1022_v13 }
 0x871   :  { %v1024_v16 = vsub.f32 %v1019_v11, %v1023_v14 }
 0x873   :  { %v1025_v17 = vmul.f32 %v1024_v16, %v1024_v16 }
 0x875   :  { %v1026_v19 = vsel %vm265_vm1, %v1025_v17, 0.0 }
 0x876   :  { %1027 = vadd.xlane.f32.xlu0 %v1026_v19 }
 0x88c   :  { %1140 = vperm.xlu0 %4404, %v243_v55   ;;  %v1130_v55 = vld [vmem:[#allocation5] sm:$0xff] }
 0x890   :  { %4407 = vset.pattern.permute.xlu0 %v4625_v5  ;;  %v5113_v5 = vpop.permute.xlu1 %1145 }
 0x903   :  { %v1028_v28 = vpop.xlane.xlu0 %1027 }
 0x904   :  { %v1029_v29 = vmul.f32 0.03125, %v1028_v28 }
 0x906   :  { %v1030_v30 = vadd.f32 1e-05, %v1029_v29 }
 0x908   :  { %4418 = vrsqrt.f32 %v1030_v30  ;;  %v3701_v30 = vld [vmem:[%s5549_s26 + $0x10] sm:$0xff] }
 0x90b   :  { %v5115_v61 = vpop.permute.xlu0 %1140 }
 0x912   :  { %v4419_v38 = vpop.eup %4418 }
 0x913   :  { %v1032_v40 = vmul.f32 %v4419_v38, %v1024_v16 }
 0x915   :  { %v1037_v42 = vmul.f32 %v1036_v37, %v1032_v40 }
 0x917   :  { %v5093_v44 = vadd.f32 %v1041_v41, %v1037_v42  ;;  %v3702_v41 = vld [vmem:[%s5549_s26 + $0x18] sm:$0xff] }
 0x919   :  { %3980 = vmatmul.mubr.msk.f32.vlgmr.msra.gmra.mrb[6].mxu1 %vm307_vm3, %v5093_v44 }
 0x91a   :  { %3994 = vmatpush3.msk.msra.mxu1 %vm584_vm12, %v5024_v43 }
 0x91b   :  { %4243 = vmatprep.subr.bf16.mxu1 %v4940_v21 }
 0x9ec   :  { %v1123_v50 = vpop.f32.mrb[6].mxu1 }
 0x9ed   :  { %v1124_v51 = vadd.f32 %v3694_v49, %v1123_v50  ;;  %v3981_v52 = vpop.f32.mrb[7].mxu1 }
 0x9ee   :  { %v5136_v52 = vpop.permute.xlu1 %1361 }
 0x9ef   :  { %v1127_v53 = vmul.f32 0.35355338, %v1124_v51 }
 0x9f1   :  { %v1135_v58 = vrot.slane %v1127_v53, %v4889_v36  ;;  %v1357_v28 = vrot.slane %v1127_v53, %v4979_v57 }
 0x9f3   :  { %v1136_v59 = vmul.f32 %v1135_v58, %v1128_v54  ;;  %v1137_v60 = vmul.f32 %v1135_v58, %v1129_v56  ;;  %v1358_v40 = vmul.f32 %v3701_v30, %v1357_v28  ;;  %v1359_v42 = vmul.f32 %v3702_v41, %v1357_v28  ;;  %v1569_v30 = vld [vmem:[%s5550_s8] sm:$0xff]  ;;  %v1572_v41 = vld [vmem:[%s5550_s8 + $0x18] sm:$0xff] }
 0x9f5   :  { %3990 = vmatprep.mubr.msk.f32.mxu0 %vm307_vm3, %v1136_v59  ;;  %v5140_v59 = vpop.permute.xlu1 %1365 }
 0x9f6   :  { %3991 = vmatmul.mubr.msk.f32.vlgmr.msra.gmra.mrb[6].mxu0 %vm307_vm3, %v1137_v60 }
 0x9f7   :  { %4010 = vmatpush3.msk.msra.mxu0 %vm584_vm12, %v5024_v43 }
 0x9f8   :  { %4250 = vmatprep.subr.bf16.mxu0 %v4618_v15 }
 0xac9   :  { %v3992_v62 = vpop.f32.mrb[6].mxu0 }
 0xaca   :  { %v1226_v63 = vadd.f32 %v3992_v62, %v5113_v5  ;;  %v1220_v48 = vpop.f32.mrb[7].mxu0 }
 0xacb   :  { %v1221_v0 = vadd.f32 %v1220_v48, %v5115_v61 }
 0xacc   :  { %v1230_v1 = vsel %vm561_vm13, %v1226_v63, -inf }
 0xacd   :  { %v1229_v39 = vsel %vm561_vm13, %v1221_v0, -inf }
 0xace   :  { %v1231_v2 = vmax.f32 %v1229_v39, %v1230_v1 }
 0xad0   :  { %v1232_v3 = vrot.slane %v1231_v2, 4 }
 0xad2   :  { %v1233_v4 = vmax.f32 %v1231_v2, %v1232_v3 }
 0xad4   :  { %v1234_v33 = vrot.slane %v1233_v4, 2 }
 0xad6   :  { %v1235_v6 = vmax.f32 %v1233_v4, %v1234_v33 }
 0xad8   :  { %v1236_v7 = vrot.slane %v1235_v6, 1 }
 0xada   :  { %v1237_v8 = vmax.f32 %v1235_v6, %v1236_v7 }
 0xadc   :  { %v1238_v9 = vsub.f32 %v1221_v0, %v1237_v8  ;;  %v1239_v10 = vsub.f32 %v1226_v63, %v1237_v8 }
 0xade   :  { %v1240_v11 = vmul.f32 1.442695, %v1238_v9  ;;  %v1242_v12 = vmul.f32 1.442695, %v1239_v10 }
 0xae0   :  { %4420 = vpow2.f32 %v1240_v11 }
 0xae1   :  { %4422 = vpow2.f32 %v1242_v12 }
 0xaea   :  { %v4421_v13 = vpop.eup %4420 }
 0xaeb   :  { %v4423_v14 = vpop.eup %4422  ;;  %v1244_v16 = vsel %vm561_vm13, %v4421_v13, 0.0 }
 0xaec   :  { %v1245_v17 = vsel %vm561_vm13, %v4423_v14, 0.0 }
 0xaed   :  { %v1246_v19 = vadd.f32 %v1245_v17, %v1244_v16 }
 0xaef   :  { %v1247_v20 = vrot.slane %v1246_v19, 4 }
 0xaf1   :  { %v1248_v22 = vadd.f32 %v1247_v20, %v1246_v19 }
 0xaf3   :  { %v1249_v23 = vrot.slane %v1248_v22, 2 }
 0xaf5   :  { %v1250_v24 = vadd.f32 %v1249_v23, %v1248_v22 }
 0xaf7   :  { %v1251_v25 = vrot.slane %v1250_v24, 1 }
 0xaf9   :  { %v1252_v26 = vadd.f32 %v1251_v25, %v1250_v24 }
 0xafb   :  { %4424 = vrcp.f32 %v1252_v26 }
 0xb05   :  { %v4425_v29 = vpop.eup %4424 }
 0xb06   :  { %v1254_v37 = vmul.f32 %v4425_v29, %v4421_v13  ;;  %v1255_v38 = vmul.f32 %v4425_v29, %v4423_v14 }
 0xb08   :  { %3995 = vmatprep.mubr.msk.f32.mxu1 %vm561_vm13, %v1254_v37  ;;  %v1570_v37 = vld [vmem:[%s5550_s8 + $0x8] sm:$0xff] }
 0xb09   :  { %3996 = vmatmul.mubr.msk.f32.vlgmr.msra.gmra.mrb[8].mxu1 %vm561_vm13, %v1255_v38  ;;  %v1571_v38 = vld [vmem:[%s5550_s8 + $0x10] sm:$0xff] }
 0xb0a   :  { %4245 = vmatpush3.bf16.msra.mxu1 %v4940_v21  ;;  %4006 = vmatprep.mubr.msk.f32.mxu1 %vm307_vm3, %v1358_v40  ;;  %v4251_v40 = vpack.c.bf16 %v1570_v37, %v1569_v30  ;;  %v1670_v37 = vrot.slane %v5084_v32, %v4979_v57 }
 0xb0b   :  { %4247 = vmatprep.subr.bf16.mxu1 %v4946_v27 }
 0xb0e   :  { %4249 = vmatpush3.bf16.msra.mxu1 %v4946_v27 }
 0xb0f   :  { %4256 = vmatprep.subr.bf16.mxu1 %v4618_v15 }
 0xb11   :  { %4007 = vmatmul.mubr.msk.f32.vlgmr.msra.gmra.mrb[10].mxu1 %vm307_vm3, %v1359_v42  ;;  %v4254_v42 = vpack.c.bf16 %v1572_v41, %v1571_v38  ;;  %v1675_v41 = vrot.slane %v5087_v34, %v4979_v57 }
 0xb12   :  { %4033 = vmatprep.mubr.msk.f32.mxu1 %vm4619_vm2, %v4620_v18 }
 0xbdc   :  { %v3997_v49 = vpop.f32.mrb[8].mxu1 }
 0xbdd   :  { %v1338_v50 = vmul.f32 %v3997_v49, %v1131_v46  ;;  %v1328_v51 = vpop.f32.mrb[9].mxu1  ;;  %v1352_v49 = vld [vmem:[#allocation5 + $0x10] sm:$0xff] }
 0xbde   :  { %v1337_v53 = vmul.f32 %v1328_v51, %v1130_v55  ;;  %v1353_v55 = vld [vmem:[#allocation5 + $0x18] sm:$0xff] }
 0xbdf   :  { %v1340_v54 = vsel %vm307_vm3, %v1338_v50, 0.0 }
 0xbe0   :  { %v1339_v56 = vsel %vm307_vm3, %v1337_v53, 0.0 }
 0xbe1   :  { %v1341_v58 = vadd.f32 %v1340_v54, %v1339_v56 }
 0xbe3   :  { %v1342_v46 = vrot.slane %v1341_v58, 4 }
 0xbe4   :  { %v4008_v60 = vpop.f32.mrb[10].mxu1 }
 0xbe5   :  { %v1446_v62 = vadd.f32 %v4008_v60, %v5140_v59  ;;  %v1440_v63 = vpop.f32.mrb[11].mxu1  ;;  %v1343_v51 = vadd.f32 %v1342_v46, %v1341_v58 }
 0xbe6   :  { %v1441_v48 = vadd.f32 %v1440_v63, %v5136_v52 }
 0xbe7   :  { %v1450_v0 = vsel %vm561_vm13, %v1446_v62, -inf  ;;  %v1344_v63 = vrot.slane %v1343_v51, 2 }
 0xbe8   :  { %v1449_v1 = vsel %vm561_vm13, %v1441_v48, -inf }
 0xbe9   :  { %v1451_v39 = vmax.f32 %v1449_v1, %v1450_v0  ;;  %v1345_v1 = vadd.f32 %v1344_v63, %v1343_v51  ;;  %v1772_v51 = vld [vmem:[%s5553_s2 + $0x10] sm:$0xff] }
 0xbea   :  { %v1776_v63 = vld [vmem:[%s5553_s2 + $0x30] sm:$0xff] }
 0xbeb   :  { %v1452_v2 = vrot.slane %v1451_v39, 4 }
 0xbed   :  { %v1453_v3 = vmax.f32 %v1451_v39, %v1452_v2 }
 0xbef   :  { %v1454_v4 = vrot.slane %v1453_v3, 2 }
 0xbf1   :  { %v1455_v33 = vmax.f32 %v1453_v3, %v1454_v4  ;;  %v1346_v3 = vrot.slane %v1345_v1, 1 }
 0xbf3   :  { %v1456_v6 = vrot.slane %v1455_v33, 1 }
 0xbf5   :  { %v1457_v7 = vmax.f32 %v1455_v33, %v1456_v6  ;;  %v1347_v6 = vadd.f32 %v1346_v3, %v1345_v1  ;;  %v3710_v1 = vld [vmem:[%s5554_s3] ss:$0 sm:$0xff] }
 0xbf7   :  { %v1458_v8 = vsub.f32 %v1441_v48, %v1457_v7  ;;  %v1459_v9 = vsub.f32 %v1446_v62, %v1457_v7 }
 0xbf9   :  { %v1460_v10 = vmul.f32 1.442695, %v1458_v8  ;;  %v1462_v11 = vmul.f32 1.442695, %v1459_v9  ;;  %v3708_v8 = vld [vmem:[%s5551_s28] ss:$0 sm:$0xff] }
 0xbfb   :  { %4426 = vpow2.f32 %v1460_v10 }
 0xbfc   :  { %4428 = vpow2.f32 %v1462_v11 }
 0xc05   :  { %v4427_v12 = vpop.eup %4426 }
 0xc06   :  { %v4429_v13 = vpop.eup %4428  ;;  %v1464_v14 = vsel %vm561_vm13, %v4427_v12, 0.0 }
 0xc07   :  { %v1465_v16 = vsel %vm561_vm13, %v4429_v13, 0.0 }
 0xc08   :  { %v1466_v17 = vadd.f32 %v1465_v16, %v1464_v14 }
 0xc0a   :  { %v1467_v19 = vrot.slane %v1466_v17, 4 }
 0xc0c   :  { %v1468_v20 = vadd.f32 %v1467_v19, %v1466_v17 }
 0xc0e   :  { %v1469_v22 = vrot.slane %v1468_v20, 2 }
 0xc10   :  { %v1470_v23 = vadd.f32 %v1469_v22, %v1468_v20  ;;  %v1677_v22 = vld [vmem:[%s5552_s12] sm:$0xff] }
 0xc12   :  { %v1471_v24 = vrot.slane %v1470_v23, 1 }
 0xc14   :  { %v1472_v25 = vadd.f32 %v1471_v24, %v1470_v23  ;;  %v1678_v23 = vld [vmem:[%s5552_s12 + $0x8] sm:$0xff]  ;;  %v1679_v24 = vld [vmem:[%s5552_s12 + $0x10] sm:$0xff] }
 0xc16   :  { %4430 = vrcp.f32 %v1472_v25  ;;  %v4257_v25 = vpack.c.bf16 %v1678_v23, %v1677_v22 }
 0xc18   :  { %4258 = vmatpush3.bf16.msra.mxu1 %v4257_v25  ;;  %v3716_v25 = vld [vmem:[%s4660_s25 + $0x20] sm:$0xff] }
 0xc19   :  { %4259 = vmatprep.subr.bf16.mxu1 %v4618_v15 }
 0xc20   :  { %v4431_v26 = vpop.eup %4430 }
 0xc21   :  { %v1474_v28 = vmul.f32 %v4431_v26, %v4427_v12  ;;  %v1475_v29 = vmul.f32 %v4431_v26, %v4429_v13  ;;  %v1680_v26 = vld [vmem:[%s5552_s12 + $0x18] sm:$0xff] }
 0xc23   :  { %4011 = vmatprep.mubr.msk.f32.mxu0 %vm561_vm13, %v1474_v28  ;;  %v4260_v28 = vpack.c.bf16 %v1680_v26, %v1679_v24  ;;  %v3717_v26 = vld [vmem:[%s4660_s25 + $0x28] sm:$0xff] }
 0xc24   :  { %4012 = vmatmul.mubr.msk.f32.vlgmr.msra.gmra.mrb[8].mxu0 %vm561_vm13, %v1475_v29 }
 0xc25   :  { %4022 = vmatprep.mubr.msk.f32.mxu0 %vm4619_vm2, %v4620_v18  ;;  %4252 = vmatpush3.bf16.msra.mxu0 %v4251_v40 }
 0xc26   :  { %4253 = vmatprep.subr.bf16.mxu0 %v4618_v15  ;;  %4261 = vmatpush3.bf16.msra.mxu1 %v4260_v28  ;;  %v3718_v28 = vld [vmem:[%s4660_s25 + $0x30] sm:$0xff] }
 0xc27   :  { %4274 = vmatprep.subr.bf16.mxu1 %v4618_v15 }
 0xc29   :  { %4255 = vmatpush3.bf16.msra.mxu0 %v4254_v42 }
 0xc2a   :  { %4262 = vmatprep.subr.bf16.mxu0 %v4618_v15 }
 0xcf7   :  { %v4013_v50 = vpop.f32.mrb[8].mxu0 }
 0xcf8   :  { %v1558_v53 = vmul.f32 %v4013_v50, %v1353_v55  ;;  %v1548_v54 = vpop.f32.mrb[9].mxu0  ;;  %v1770_v55 = vld [vmem:[%s5553_s2] sm:$0xff] }
 0xcf9   :  { %v1557_v56 = vmul.f32 %v1548_v54, %v1352_v49  ;;  %v1771_v49 = vld [vmem:[%s5553_s2 + $0x8] sm:$0xff] }
 0xcfa   :  { %v1560_v60 = vsel %vm307_vm3, %v1558_v53, 0.0  ;;  %v4263_v50 = vpack.c.bf16 %v1771_v49, %v1770_v55  ;;  %v1773_v53 = vld [vmem:[%s5553_s2 + $0x18] sm:$0xff] }
 0xcfb   :  { %v1559_v62 = vsel %vm307_vm3, %v1557_v56, 0.0  ;;  %v4266_v54 = vpack.c.bf16 %v1773_v53, %v1772_v51  ;;  %v1774_v56 = vld [vmem:[%s5553_s2 + $0x20] sm:$0xff] }
 0xcfc   :  { %v1561_v48 = vadd.f32 %v1560_v60, %v1559_v62  ;;  %v1775_v60 = vld [vmem:[%s5553_s2 + $0x28] sm:$0xff] }
 0xcfd   :  { %v4269_v62 = vpack.c.bf16 %v1775_v60, %v1774_v56 }
 0xcfe   :  { %v1562_v0 = vrot.slane %v1561_v48, 4 }
 0xd00   :  { %v1563_v39 = vadd.f32 %v1562_v0, %v1561_v48  ;;  %v1777_v48 = vld [vmem:[%s5553_s2 + $0x38] sm:$0xff] }
 0xd01   :  { %v4272_v0 = vpack.c.bf16 %v1777_v48, %v1776_v63 }
 0xd02   :  { %v1564_v2 = vrot.slane %v1563_v39, 2 }
 0xd04   :  { %v1565_v4 = vadd.f32 %v1564_v2, %v1563_v39 }
 0xd06   :  { %v1566_v33 = vrot.slane %v1565_v4, 1 }
 0xd08   :  { %v1567_v7 = vadd.f32 %v1566_v33, %v1565_v4 }
 0xd0a   :  { %v1568_v58 = vsel %vm254_vm0, %v1347_v6, %v1567_v7 }
 0xd0b   :  { %4023 = vmatmul.mubr.msk.f32.vlgmr.msra.gmra.mrb[10].mxu0 %vm307_vm3, %v1568_v58 }
 0xd0c   :  { %4052 = vmatprep.mubr.msk.f32.mxu0 %vm4619_vm2, %v4620_v18  ;;  %4264 = vmatpush3.bf16.msra.mxu0 %v4263_v50 }
 0xd0d   :  { %4265 = vmatprep.subr.bf16.mxu0 %v4618_v15 }
 0xd10   :  { %4267 = vmatpush3.bf16.msra.mxu0 %v4266_v54 }
 0xd11   :  { %4268 = vmatprep.subr.bf16.mxu0 %v4618_v15 }
 0xd14   :  { %4270 = vmatpush3.bf16.msra.mxu0 %v4269_v62 }
 0xd15   :  { %4271 = vmatprep.subr.bf16.mxu0 %v4618_v15 }
 0xd18   :  { %4273 = vmatpush3.bf16.msra.mxu0 %v4272_v0 }
 0xd19   :  { %4077 = vmatprep.subr.mxu0 %v4620_v18 }
 0xdde   :  { %v1649_v9 = vpop.f32.mrb[10].mxu0 }
 0xddf   :  { %v1650_v10 = vadd.f32 %v3708_v8, %v1649_v9  ;;  %v4024_v11 = vpop.f32.mrb[11].mxu0 }
 0xde1   :  { %v1653_v12 = vadd.f32 %v1650_v10, %v5093_v44 }
 0xde3   :  { %v1654_v13 = vsel %vm265_vm1, %v1653_v12, 0.0 }
 0xde4   :  { %1655 = vadd.xlane.f32.xlu1 %v1654_v13 }
 0xe71   :  { %v1656_v14 = vpop.xlane.xlu1 %1655 }
 0xe72   :  { %v1657_v16 = vmul.f32 0.03125, %v1656_v14 }
 0xe74   :  { %v1658_v17 = vsub.f32 %v1653_v12, %v1657_v16  ;;  %v3712_v12 = vld [vmem:[%s5555_s7] ss:$0 sm:$0xff] }
 0xe76   :  { %v1659_v19 = vmul.f32 %v1658_v17, %v1658_v17 }
 0xe78   :  { %v1660_v20 = vsel %vm265_vm1, %v1659_v19, 0.0 }
 0xe79   :  { %1661 = vadd.xlane.f32.xlu0 %v1660_v20 }
 0xf06   :  { %v1662_v44 = vpop.xlane.xlu0 %1661 }
 0xf07   :  { %v1663_v29 = vmul.f32 0.03125, %v1662_v44  ;;  %v4275_v44 = vpack.c.bf16 %v3717_v26, %v3716_v25 }
 0xf09   :  { %v1664_v30 = vadd.f32 1e-05, %v1663_v29  ;;  %v3719_v29 = vld [vmem:[%s4660_s25 + $0x38] sm:$0xff]  ;;  %s5556_s25 = sld [smem:[#allocation33_spill]] }
 0xf0b   :  { %4432 = vrsqrt.f32 %v1664_v30  ;;  %v4278_v30 = vpack.c.bf16 %v3719_v29, %v3718_v28 }
 0xf15   :  { %v4433_v38 = vpop.eup %4432 }
 0xf16   :  { %v1666_v40 = vmul.f32 %v4433_v38, %v1658_v17 }
 0xf18   :  { %v1671_v42 = vmul.f32 %v1670_v37, %v1666_v40 }
 0xf1a   :  { %v1676_v46 = vadd.f32 %v1675_v41, %v1671_v42  ;;  %v5210_v41 = vsub.s32 2, %v4879_v31  ;;  %v3721_v31 = vld [vmem:[%s4665_s29 + $0x1] ss:$0 sm:$0xff]  ;;  %s5557_s29 = sld [smem:[#allocation34_spill]] }
 0xf1c   :  { %4034 = vmatmul.mubr.msk.f32.vlgmr.msra.gmra.mrb[12].mxu1 %vm307_vm3, %v1676_v46  ;;  %v1876_v42 = vrot.slane %v5084_v32, %v5210_v41  ;;  %v1881_v49 = vrot.slane %v5087_v34, %v5210_v41 }
 0xf1d   :  { %4063 = vmatprep.mubr.msk.f32.mxu1 %vm4619_vm2, %v4620_v18  ;;  %4276 = vmatpush3.bf16.msra.mxu1 %v4275_v44 }
 0xf1e   :  { %4277 = vmatprep.subr.bf16.mxu1 %v4618_v15 }
 0xf21   :  { %4279 = vmatpush3.bf16.msra.mxu1 %v4278_v30 }
 0xf22   :  { %4280 = vmatprep.subr.bf16.mxu1 %v4618_v15 }
 0xfef   :  { %v1757_v39 = vpop.f32.mrb[12].mxu1 }
 0xff0   :  { %v1758_v2 = vadd.f32 %v3710_v1, %v1757_v39  ;;  %v4035_v3 = vpop.f32.mrb[13].mxu1 }
 0xff2   :  { %v1761_v4 = vmul.f32 %v1758_v2, %v1758_v2 }
 0xff4   :  { %v1762_v33 = vmul.f32 %v1761_v4, %v1758_v2 }
 0xff6   :  { %v1763_v6 = vmul.f32 0.044715, %v1762_v33 }
 0xff8   :  { %v1764_v7 = vadd.f32 %v1763_v6, %v1758_v2 }
 0xffa   :  { %v1765_v58 = vmul.f32 0.7978846, %v1764_v7 }
 0xffc   :  { %4434 = vtanh.f32 %v1765_v58 }
0x1006   :  { %v4435_v8 = vpop.eup %4434 }
0x1007   :  { %v1767_v9 = vadd.f32 1.0, %v4435_v8 }
0x1009   :  { %v1768_v10 = vmul.f32 0.5, %v1767_v9 }
0x100b   :  { %v1769_v11 = vmul.f32 %v1768_v10, %v1758_v2 }
0x100d   :  { %4053 = vmatmul.mubr.msk.f32.vlgmr.msra.gmra.mrb[12].mxu0 %vm1785_vm14, %v1769_v11 }
0x100e   :  { %4078 = vmatpush3.msk.msra.mxu0 %vm584_vm12, %v5024_v43  ;;  %4079 = vmatprep.mubr.msk.f32.mxu0 %vm4619_vm2, %v4620_v18 }
0x100f   :  { %4093 = vmatprep.subr.mxu0 %v4620_v18 }
0x10e0   :  { %v1855_v13 = vpop.f32.mrb[12].mxu0 }
0x10e1   :  { %v1856_v14 = vadd.f32 %v3712_v12, %v1855_v13  ;;  %v4054_v16 = vpop.f32.mrb[13].mxu0 }
0x10e3   :  { %v1859_v17 = vadd.f32 %v1856_v14, %v1676_v46 }
0x10e5   :  { %v1860_v19 = vsel %vm265_vm1, %v1859_v17, 0.0 }
0x10e6   :  { %1861 = vadd.xlane.f32.xlu1 %v1860_v19 }
0x1173   :  { %v1862_v20 = vpop.xlane.xlu1 %1861 }
0x1174   :  { %v1863_v22 = vmul.f32 0.03125, %v1862_v20 }
0x1176   :  { %v1864_v43 = vsub.f32 %v1859_v17, %v1863_v22 }
0x1178   :  { %v1865_v23 = vmul.f32 %v1864_v43, %v1864_v43 }
0x117a   :  { %v1866_v24 = vsel %vm265_vm1, %v1865_v23, 0.0 }
0x117b   :  { %1867 = vadd.xlane.f32.xlu1 %v1866_v24 }
0x1208   :  { %v1868_v37 = vpop.xlane.xlu1 %1867 }
0x1209   :  { %v1869_v38 = vmul.f32 0.03125, %v1868_v37 }
0x120b   :  { %v1870_v40 = vadd.f32 1e-05, %v1869_v38 }
0x120d   :  { %4436 = vrsqrt.f32 %v1870_v40 }
0x1217   :  { %v4437_v46 = vpop.eup %4436 }
0x1218   :  { %v1872_v55 = vmul.f32 %v4437_v46, %v1864_v43 }
0x121a   :  { %v1877_v50 = vmul.f32 %v1876_v42, %v1872_v55 }
0x121c   :  { %v5216_v51 = vadd.f32 %v1881_v49, %v1877_v50 }
0x121e   :  { %4064 = vmatmul.mubr.msk.f32.vlgmr.msra.gmra.mrb[14].mxu1 %vm307_vm3, %v5216_v51 }
0x121f   :  { %4282 = vmatpush3.bf16.msra.mxu1 %v4940_v21  ;;  %4074 = vmatprep.mubr.msk.f32.mxu1 %vm4619_vm2, %v4620_v18 }
0x1220   :  { %4283 = vmatprep.subr.bf16.mxu1 %v4618_v15 }
0x1223   :  { %4285 = vmatpush3.bf16.msra.mxu1 %v4946_v27 }
0x1224   :  { %4286 = vmatprep.subr.bf16.mxu1 %v4618_v15 }
0x12f1   :  { %v1969_v32 = vpop.f32.mrb[14].mxu1 }
0x12f2   :  { %v5227_v34 = vadd.f32 %v3721_v31, %v1969_v32  ;;  %v4065_v53 = vpop.f32.mrb[15].mxu1 }
0x12f4   :  { %1975 = vrot.lane.b32.xlu1 %v5227_v34, %s4621_s13  ;;  %v1973_v54 = vmul.f32 0.35355338, %v5227_v34 }
0x12f6   :  { %v2058_v56 = vrot.slane %v1973_v54, %v4889_v36  ;;  %v2318_v32 = vrot.slane %v1973_v54, %v4979_v57  ;;  %v5280_v54 = vrot.slane %v5227_v34, %v4979_v57 }
0x12f8   :  { %2060 = vrot.lane.b32.xlu1 %v2058_v56, %s4622_s17  ;;  %v5273_v56 = vrot.slane %v5227_v34, %v4889_v36 }
0x1366   :  { %v1976_v60 = vpop.permute.xlu1 %1975 }
0x1367   :  { %1978 = vst.msk [vmem:[%s228_s19] sm:$0x3] %vm265_vm1, %v1976_v60 }
0x136a   :  { %v2061_v60 = vpop.permute.xlu1 %2060 }
0x136e   :  { %v1984_v62 = vld [vmem:[%s5556_s25 + $0x2] sm:$0x1]  ;;  %v1985_v63 = vld [vmem:[%s5556_s25 + $0x4] sm:$0x1]  ;;  %v1986_v48 = vld [vmem:[%s5556_s25 + $0x6] sm:$0x1] }
0x136f   :  { %v1987_v0 = vld [vmem:[%s5556_s25 + $0x8] sm:$0x1]  ;;  %v2003_v1 = vrot.slane %v1984_v62, 7  ;;  %v2005_v39 = vrot.slane %v1985_v63, 6  ;;  %v1983_v2 = vld [vmem:[%s5556_s25] sm:$0x1] }
0x1370   :  { %v1988_v3 = vld [vmem:[%s5556_s25 + $0xa] sm:$0x1]  ;;  %v1989_v4 = vld [vmem:[%s5556_s25 + $0xc] sm:$0x1]  ;;  %v2007_v6 = vrot.slane %v1986_v48, 5  ;;  %v2009_v10 = vrot.slane %v1987_v0, 4 }
0x1371   :  { %v2004_v33 = vsel %vm414_vm4, %v2003_v1, %v1983_v2  ;;  %v2244_v7 = vld [vmem:[%s5556_s25 + $0x3] sm:$0x1]  ;;  %v2245_v58 = vld [vmem:[%s5556_s25 + $0x5] sm:$0x1]  ;;  %v1990_v8 = vld [vmem:[%s5556_s25 + $0xe] sm:$0x1] }
0x1372   :  { %v2006_v9 = vsel %vm417_vm5, %v2005_v39, %v2004_v33  ;;  %v2246_v11 = vld [vmem:[%s5556_s25 + $0x7] sm:$0x1]  ;;  %v2011_v13 = vrot.slane %v1988_v3, 3  ;;  %v2247_v14 = vld [vmem:[%s5556_s25 + $0x9] sm:$0x1]  ;;  %v2263_v16 = vrot.slane %v2244_v7, 7 }
0x1373   :  { %v2008_v12 = vsel %vm420_vm6, %v2007_v6, %v2006_v9  ;;  %v2265_v17 = vrot.slane %v2245_v58, 6  ;;  %v2013_v20 = vrot.slane %v1989_v4, 2  ;;  %v2243_v22 = vld [vmem:[%s5556_s25 + $0x1] sm:$0x1]  ;;  %v2248_v43 = vld [vmem:[%s5556_s25 + $0xb] sm:$0x1] }
0x1374   :  { %v2010_v19 = vsel %vm423_vm7, %v2009_v10, %v2008_v12  ;;  %v2015_v24 = vrot.slane %v1990_v8, 1  ;;  %v2249_v25 = vld [vmem:[%s5556_s25 + $0xd] sm:$0x1]  ;;  %v2264_v26 = vsel %vm414_vm4, %v2263_v16, %v2243_v22  ;;  %v2267_v28 = vrot.slane %v2246_v11, 5  ;;  %v2250_v29 = vld [vmem:[%s5556_s25 + $0xf] sm:$0x1] }
0x1375   :  { %v2012_v23 = vsel %vm426_vm8, %v2011_v13, %v2010_v19  ;;  %v2266_v30 = vsel %vm417_vm5, %v2265_v17, %v2264_v26  ;;  %v2269_v37 = vrot.slane %v2247_v14, 4  ;;  %v2271_v42 = vrot.slane %v2248_v43, 3 }
0x1376   :  { %v2014_v44 = vsel %vm429_vm9, %v2013_v20, %v2012_v23  ;;  %v2268_v40 = vsel %vm420_vm6, %v2267_v28, %v2266_v30  ;;  %v2273_v55 = vrot.slane %v2249_v25, 2  ;;  %v2275_v50 = vrot.slane %v2250_v29, 1 }
0x1377   :  { %v2016_v38 = vsel %vm432_vm10, %v2015_v24, %v2014_v44  ;;  %v2270_v46 = vsel %vm423_vm7, %v2269_v37, %v2268_v40 }
0x1378   :  { %2017 = vrot.lane.b32.xlu0 %v2016_v38, %s4622_s17  ;;  %v2272_v49 = vsel %vm426_vm8, %v2271_v42, %v2270_v46 }
0x1379   :  { %v2274_v31 = vsel %vm429_vm9, %v2273_v55, %v2272_v49 }
0x137a   :  { %v2276_v53 = vsel %vm432_vm10, %v2275_v50, %v2274_v31 }
0x137b   :  { %2277 = vrot.lane.b32.xlu1 %v2276_v53, %s4622_s17 }
0x137c   :  { %2320 = vrot.lane.b32.xlu0 %v2318_v32, %s4622_s17 }
0x13ea   :  { %v2018_v62 = vpop.permute.xlu0 %2017 }
0x13eb   :  { %v2020_v63 = vsel %vm4963_vm11, %v5273_v56, %v2018_v62 }
0x13ec   :  { %v2063_v48 = vmul.f32 %v2061_v60, %v2020_v63 }
0x13ed   :  { %v2278_v0 = vpop.permute.xlu1 %2277 }
0x13ee   :  { %v2321_v1 = vpop.permute.xlu0 %2320  ;;  %2065 = vrot.lane.b32.xlu1 %v2063_v48, %s4621_s13  ;;  %v2280_v39 = vsel %vm4963_vm11, %v5280_v54, %v2278_v0 }
0x13ef   :  { %v2323_v2 = vmul.f32 %v2321_v1, %v2280_v39 }
0x13f1   :  { %2325 = vrot.lane.b32.xlu0 %v2323_v2, %s4621_s13 }
0x13f2   :  { %1979 = vrot.lane.b32.xlu1 %v5227_v34, %s4623_s21 }
0x1460   :  { %v2066_v3 = vpop.permute.xlu1 %2065 }
0x1461   :  { %4075 = vmatmul.mubr.msk.f32.vlgmr.msra.gmra.mrb[16].mxu1 %vm307_vm3, %v2066_v3 }
0x1462   :  { %4288 = vmatpush3.bf16.msra.mxu1 %v4940_v21  ;;  %4090 = vmatprep.mubr.msk.f32.mxu1 %vm4619_vm2, %v4620_v18 }
0x1463   :  { %4289 = vmatprep.subr.bf16.mxu1 %v4618_v15  ;;  %v2326_v34 = vpop.permute.xlu0 %2325 }
0x1464   :  { %v1980_v4 = vpop.permute.xlu1 %1979 }
0x1465   :  { %1982 = vst.msk [vmem:[%s234_s1] sm:$0x3] %vm265_vm1, %v1980_v4 }
0x1466   :  { %4291 = vmatpush3.bf16.msra.mxu1 %v4946_v27 }
0x1467   :  { %4298 = vmatprep.subr.bf16.mxu1 %v4618_v15 }
0x1469   :  { %4091 = vmatmul.mubr.msk.f32.vlgmr.msra.gmra.mrb[18].mxu1 %vm307_vm3, %v2326_v34 }
0x146a   :  { %4117 = vmatprep.mubr.msk.f32.mxu1 %vm4619_vm2, %v4620_v18 }
0x146c   :  { %v2282_v33 = vld [vmem:[%s5557_s29 + $0x3] sm:$0x1]  ;;  %v2283_v6 = vld [vmem:[%s5557_s29 + $0x5] sm:$0x1]  ;;  %v2284_v7 = vld [vmem:[%s5557_s29 + $0x7] sm:$0x1] }
0x146d   :  { %v2285_v58 = vld [vmem:[%s5557_s29 + $0x9] sm:$0x1]  ;;  %v2297_v8 = vrot.slane %v2282_v33, 7  ;;  %v2299_v9 = vrot.slane %v2283_v6, 6  ;;  %v2281_v10 = vld [vmem:[%s5557_s29 + $0x1] sm:$0x1] }
0x146e   :  { %v2286_v11 = vld [vmem:[%s5557_s29 + $0xb] sm:$0x1]  ;;  %v2287_v12 = vld [vmem:[%s5557_s29 + $0xd] sm:$0x1]  ;;  %v2301_v14 = vrot.slane %v2284_v7, 5  ;;  %v2303_v22 = vrot.slane %v2285_v58, 4 }
0x146f   :  { %v2298_v13 = vsel %vm414_vm4, %v2297_v8, %v2281_v10  ;;  %v2022_v16 = vld [vmem:[%s5557_s29 + $0x2] sm:$0x1]  ;;  %v2023_v17 = vld [vmem:[%s5557_s29 + $0x4] sm:$0x1]  ;;  %v2288_v19 = vld [vmem:[%s5557_s29 + $0xf] sm:$0x1] }
0x1470   :  { %v2300_v20 = vsel %vm417_vm5, %v2299_v9, %v2298_v13  ;;  %v2024_v43 = vld [vmem:[%s5557_s29 + $0x6] sm:$0x1]  ;;  %v2305_v24 = vrot.slane %v2286_v11, 3  ;;  %v2025_v25 = vld [vmem:[%s5557_s29 + $0x8] sm:$0x1]  ;;  %v2037_v26 = vrot.slane %v2022_v16, 7 }
0x1471   :  { %v2302_v23 = vsel %vm420_vm6, %v2301_v14, %v2300_v20  ;;  %v2039_v28 = vrot.slane %v2023_v17, 6  ;;  %v2307_v29 = vrot.slane %v2287_v12, 2  ;;  %v2021_v30 = vld [vmem:[%s5557_s29] sm:$0x1]  ;;  %v2026_v37 = vld [vmem:[%s5557_s29 + $0xa] sm:$0x1] }
0x1472   :  { %v2304_v44 = vsel %vm423_vm7, %v2303_v22, %v2302_v23  ;;  %v2309_v40 = vrot.slane %v2288_v19, 1  ;;  %v2027_v42 = vld [vmem:[%s5557_s29 + $0xc] sm:$0x1]  ;;  %v2038_v46 = vsel %vm414_vm4, %v2037_v26, %v2021_v30  ;;  %v2041_v55 = vrot.slane %v2024_v43, 5  ;;  %v2028_v50 = vld [vmem:[%s5557_s29 + $0xe] sm:$0x1] }
0x1473   :  { %v2306_v38 = vsel %vm426_vm8, %v2305_v24, %v2304_v44  ;;  %v2040_v31 = vsel %vm417_vm5, %v2039_v28, %v2038_v46  ;;  %v2043_v32 = vrot.slane %v2025_v25, 4  ;;  %v2045_v62 = vrot.slane %v2026_v37, 3 }
0x1474   :  { %v2308_v49 = vsel %vm429_vm9, %v2307_v29, %v2306_v38  ;;  %v2042_v60 = vsel %vm420_vm6, %v2041_v55, %v2040_v31  ;;  %v2047_v48 = vrot.slane %v2027_v42, 2  ;;  %v2049_v1 = vrot.slane %v2028_v50, 1 }
0x1475   :  { %v2310_v53 = vsel %vm432_vm10, %v2309_v40, %v2308_v49  ;;  %v2044_v63 = vsel %vm423_vm7, %v2043_v32, %v2042_v60 }
0x1476   :  { %2311 = vrot.lane.b32.xlu1 %v2310_v53, %s4623_s21  ;;  %v2046_v0 = vsel %vm426_vm8, %v2045_v62, %v2044_v63  ;;  %v5350_v63 = vld [vmem:[%s5541_s9] sm:$0xf] }
0x1477   :  { %v2048_v39 = vsel %vm429_vm9, %v2047_v48, %v2046_v0 }
0x1478   :  { %v2050_v2 = vsel %vm432_vm10, %v2049_v1, %v2048_v39  ;;  %v3729_v1 = vld [vmem:[%s5542_s24 + $0x20] sm:$0xff]  ;;  %v3730_v39 = vld [vmem:[%s5542_s24 + $0x28] sm:$0xff] }
0x1479   :  { %2051 = vrot.lane.b32.xlu0 %v2050_v2, %s4623_s21  ;;  %v4293_v2 = vpack.c.bf16 %v3730_v39, %v3729_v1 }
0x14e8   :  { %v2312_v3 = vpop.permute.xlu1 %2311 }
0x14e9   :  { %v2314_v4 = vsel %vm4963_vm11, %v5280_v54, %v2312_v3  ;;  %v3731_v3 = vld [vmem:[%s5542_s24 + $0x30] sm:$0xff] }
0x14ea   :  { %2492 = vrot.lane.b32.xlu1 %v2314_v4, %s4623_s21  ;;  %v3732_v4 = vld [vmem:[%s5542_s24 + $0x38] sm:$0xff] }
0x14eb   :  { %v2052_v34 = vpop.permute.xlu0 %2051 }
0x14ec   :  { %v2054_v33 = vsel %vm4963_vm11, %v5273_v56, %v2052_v34  ;;  %v4296_v34 = vpack.c.bf16 %v3732_v4, %v3731_v3 }
0x14ed   :  { %2232 = vrot.lane.b32.xlu0 %v2054_v33, %s4623_s21 }
0x1534   :  { %v2135_v6 = vpop.f32.mrb[16].mxu1 }
0x1535   :  { %v2136_v7 = vadd.f32 %v2135_v6, %v5004_v35  ;;  %v4076_v58 = vpop.f32.mrb[17].mxu1 }
0x1537   :  { %v2139_v8 = vsel %vm561_vm13, %v2136_v7, -inf }
0x1538   :  { %v2140_v9 = vrot.slane %v2139_v8, 4 }
0x153a   :  { %v2141_v10 = vmax.f32 %v2139_v8, %v2140_v9 }
0x153c   :  { %v2142_v11 = vrot.slane %v2141_v10, 2  ;;  %v2395_v12 = vpop.f32.mrb[18].mxu1 }
0x153d   :  { %v2396_v54 = vadd.f32 %v2395_v12, %v5032_v45  ;;  %v4092_v13 = vpop.f32.mrb[19].mxu1 }
0x153e   :  { %v2143_v14 = vmax.f32 %v2141_v10, %v2142_v11 }
0x153f   :  { %v2399_v16 = vsel %vm561_vm13, %v2396_v54, -inf }
0x1540   :  { %v2144_v47 = vrot.slane %v2143_v14, 1  ;;  %v2400_v56 = vrot.slane %v2399_v16, 4 }
0x1542   :  { %v2145_v17 = vmax.f32 %v2143_v14, %v2144_v47  ;;  %v2401_v19 = vmax.f32 %v2399_v16, %v2400_v56 }
0x1544   :  { %v2146_v20 = vsub.f32 %v2136_v7, %v2145_v17  ;;  %v2402_v22 = vrot.slane %v2401_v19, 2 }
0x1546   :  { %v2147_v35 = vmul.f32 1.442695, %v2146_v20  ;;  %v2403_v43 = vmax.f32 %v2401_v19, %v2402_v22 }
0x1548   :  { %4438 = vpow2.f32 %v2147_v35  ;;  %v2404_v23 = vrot.slane %v2403_v43, 1 }
0x154a   :  { %v2405_v24 = vmax.f32 %v2403_v43, %v2404_v23 }
0x154c   :  { %v2406_v25 = vsub.f32 %v2396_v54, %v2405_v24 }
0x154e   :  { %v2407_v26 = vmul.f32 1.442695, %v2406_v25  ;;  %v3734_v25 = vld [vmem:[%s5543_s30 + $0x1] ss:$0 sm:$0xff] }
0x1550   :  { %4440 = vpow2.f32 %v2407_v26 }
0x1552   :  { %v4439_v28 = vpop.eup %4438 }
0x1553   :  { %v2149_v45 = vsel %vm561_vm13, %v4439_v28, 0.0 }
0x1554   :  { %v2150_v44 = vrot.slane %v2149_v45, 4 }
0x1556   :  { %v2151_v29 = vadd.f32 %v2150_v44, %v2149_v45 }
0x1558   :  { %v2152_v30 = vrot.slane %v2151_v29, 2 }
0x155a   :  { %v4441_v37 = vpop.eup %4440  ;;  %v2153_v38 = vadd.f32 %v2152_v30, %v2151_v29 }
0x155b   :  { %v2409_v40 = vsel %vm561_vm13, %v4441_v37, 0.0 }
0x155c   :  { %v2154_v42 = vrot.slane %v2153_v38, 1  ;;  %v2410_v46 = vrot.slane %v2409_v40, 4  ;;  %v2493_v11 = vpop.permute.xlu1 %2492 }
0x155e   :  { %v2155_v55 = vadd.f32 %v2154_v42, %v2153_v38  ;;  %v2411_v49 = vadd.f32 %v2410_v46, %v2409_v40  ;;  %v3736_v46 = vld [vmem:[%s5544_s6 + $0x20] sm:$0xff] }
0x155f   :  { %v2233_v33 = vpop.permute.xlu0 %2232 }
0x1560   :  { %4442 = vrcp.f32 %v2155_v55  ;;  %v2412_v50 = vrot.slane %v2411_v49, 2  ;;  %v3737_v55 = vld [vmem:[%s5544_s6 + $0x28] sm:$0xff] }
0x1562   :  { %v2413_v31 = vadd.f32 %v2412_v50, %v2411_v49  ;;  %v3738_v49 = vld [vmem:[%s5544_s6 + $0x30] sm:$0xff]  ;;  %v4299_v50 = vpack.c.bf16 %v3737_v55, %v3736_v46 }
0x1563   :  { %v2912_v55 = vld [vmem:[#allocation8 + $0x10] sm:$0xff] }
0x1564   :  { %v2414_v32 = vrot.slane %v2413_v31, 1  ;;  %4300 = vmatpush3.bf16.msra.mxu1 %v4299_v50 }
0x1565   :  { %4301 = vmatprep.subr.bf16.mxu1 %v4618_v15 }
0x1566   :  { %v2415_v53 = vadd.f32 %v2414_v32, %v2413_v31  ;;  %v3739_v31 = vld [vmem:[%s5544_s6 + $0x38] sm:$0xff] }
0x1567   :  { %v4302_v32 = vpack.c.bf16 %v3739_v31, %v3738_v49 }
0x1568   :  { %4444 = vrcp.f32 %v2415_v53 }
0x1569   :  { %4303 = vmatpush3.bf16.msra.mxu1 %v4302_v32  ;;  %v2913_v32 = vld [vmem:[#allocation8 + $0x18] sm:$0xff] }
0x156a   :  { %v4443_v60 = vpop.eup %4442  ;;  %4131 = vmatprep.subr.msk.mxu1 %vm584_vm12, %v5350_v63 }
0x156b   :  { %v2157_v62 = vmul.f32 %v4443_v60, %v4439_v28 }
0x156d   :  { %4080 = vmatmul.mubr.msk.f32.vlgmr.msra.gmra.mrb[14].mxu0 %vm561_vm13, %v2157_v62  ;;  %v5387_v62 = vld [vmem:[%s5545_s20 + $0x4] sm:$0x7] }
0x156e   :  { %4094 = vmatpush3.msk.msra.mxu0 %vm584_vm12, %v5350_v63  ;;  %4095 = vmatprep.mubr.msk.f32.mxu0 %vm4619_vm2, %v4620_v18 }
0x156f   :  { %4292 = vmatprep.subr.bf16.mxu0 %v4618_v15 }
0x1572   :  { %v4445_v48 = vpop.eup %4444 }
0x1573   :  { %v2417_v0 = vmul.f32 %v4445_v48, %v4441_v37  ;;  %v5390_v48 = vld [vmem:[%s5546_s16 + $0x4] sm:$0x7] }
0x1575   :  { %4096 = vmatmul.mubr.msk.f32.vlgmr.msra.gmra.mrb[16].mxu0 %vm561_vm13, %v2417_v0  ;;  %v2607_v0 = vrot.slane %v5387_v62, %v4889_v36 }
0x1576   :  { %4106 = vmatprep.mubr.msk.f32.mxu0 %vm4619_vm2, %v4620_v18  ;;  %4294 = vmatpush3.bf16.msra.mxu0 %v4293_v2  ;;  %v2612_v2 = vrot.slane %v5390_v48, %v4889_v36 }
0x1577   :  { %4295 = vmatprep.subr.bf16.mxu0 %v4618_v15 }
0x157a   :  { %4297 = vmatpush3.bf16.msra.mxu0 %v4296_v34  ;;  %v3741_v34 = vld [vmem:[%s5548_s22 + $0x1] ss:$0 sm:$0xff] }
0x157b   :  { %4305 = vmatprep.subr.bf16.mxu0 %v4940_v21 }
0x1640   :  { %v2227_v6 = vpop.f32.mrb[14].mxu0 }
0x1641   :  { %v2235_v7 = vmul.f32 %v2233_v33, %v2227_v6  ;;  %v4081_v58 = vpop.f32.mrb[15].mxu0 }
0x1643   :  { %v2236_v8 = vsel %vm307_vm3, %v2235_v7, 0.0 }
0x1644   :  { %v2237_v9 = vrot.slane %v2236_v8, 4 }
0x1646   :  { %v2238_v10 = vadd.f32 %v2237_v9, %v2236_v8  ;;  %v2701_v8 = vld [vmem:[#allocation8] sm:$0xff]  ;;  %v2702_v9 = vld [vmem:[#allocation8 + $0x8] sm:$0xff] }
0x1648   :  { %v2487_v12 = vpop.f32.mrb[16].mxu0  ;;  %v2239_v14 = vrot.slane %v2238_v10, 2 }
0x1649   :  { %v2495_v54 = vmul.f32 %v2493_v11, %v2487_v12  ;;  %v4097_v13 = vpop.f32.mrb[17].mxu0 }
0x164a   :  { %v2240_v56 = vadd.f32 %v2239_v14, %v2238_v10 }
0x164b   :  { %v2496_v16 = vsel %vm307_vm3, %v2495_v54, 0.0 }
0x164c   :  { %v2497_v47 = vrot.slane %v2496_v16, 4  ;;  %v2241_v20 = vrot.slane %v2240_v56, 1 }
0x164e   :  { %v2498_v17 = vadd.f32 %v2497_v47, %v2496_v16  ;;  %v2242_v43 = vadd.f32 %v2241_v20, %v2240_v56 }
0x1650   :  { %v2499_v19 = vrot.slane %v2498_v17, 2 }
0x1652   :  { %v2500_v22 = vadd.f32 %v2499_v19, %v2498_v17 }
0x1654   :  { %v2501_v35 = vrot.slane %v2500_v22, 1 }
0x1656   :  { %v2502_v23 = vadd.f32 %v2501_v35, %v2500_v22 }
0x1658   :  { %v2503_v24 = vsel %vm254_vm0, %v2242_v43, %v2502_v23 }
0x1659   :  { %4107 = vmatmul.mubr.msk.f32.vlgmr.msra.gmra.mrb[18].mxu0 %vm307_vm3, %v2503_v24 }
0x165a   :  { %4307 = vmatpush3.bf16.msra.mxu0 %v4940_v21 }
0x165b   :  { %4309 = vmatprep.subr.bf16.mxu0 %v4946_v27 }
0x165e   :  { %4311 = vmatpush3.bf16.msra.mxu0 %v4946_v27 }
0x165f   :  { %4147 = vmatprep.subr.msk.mxu0 %vm584_vm12, %v5350_v63 }
0x172c   :  { %v2586_v26 = vpop.f32.mrb[18].mxu0 }
0x172d   :  { %v2587_v28 = vadd.f32 %v3734_v25, %v2586_v26  ;;  %v4108_v45 = vpop.f32.mrb[19].mxu0 }
0x172f   :  { %v2590_v44 = vadd.f32 %v2587_v28, %v5216_v51 }
0x1731   :  { %v2591_v29 = vsel %vm265_vm1, %v2590_v44, 0.0 }
0x1732   :  { %2592 = vadd.xlane.f32.xlu0 %v2591_v29 }
0x17bf   :  { %v2593_v30 = vpop.xlane.xlu0 %2592 }
0x17c0   :  { %v2594_v37 = vmul.f32 0.03125, %v2593_v30 }
0x17c2   :  { %v2595_v38 = vsub.f32 %v2590_v44, %v2594_v37 }
0x17c4   :  { %v2596_v40 = vmul.f32 %v2595_v38, %v2595_v38 }
0x17c6   :  { %v2597_v42 = vsel %vm265_vm1, %v2596_v40, 0.0 }
0x17c7   :  { %2598 = vadd.xlane.f32.xlu1 %v2597_v42 }
0x1854   :  { %v2599_v51 = vpop.xlane.xlu1 %2598 }
0x1855   :  { %v2600_v53 = vmul.f32 0.03125, %v2599_v51 }
0x1857   :  { %v2601_v60 = vadd.f32 1e-05, %v2600_v53  ;;  %v2704_v53 = vld [vmem:[#allocation10 + $0x8] sm:$0xff] }
0x1859   :  { %4446 = vrsqrt.f32 %v2601_v60  ;;  %v2703_v60 = vld [vmem:[#allocation10] sm:$0xff] }
0x1863   :  { %v4447_v1 = vpop.eup %4446 }
0x1864   :  { %v2603_v39 = vmul.f32 %v4447_v1, %v2595_v38 }
0x1866   :  { %v2608_v3 = vmul.f32 %v2607_v0, %v2603_v39 }
0x1868   :  { %v5396_v4 = vadd.f32 %v2612_v2, %v2608_v3 }
0x186a   :  { %4118 = vmatmul.mubr.msk.f32.vlgmr.msra.gmra.mrb[20].mxu1 %vm307_vm3, %v5396_v4 }
0x186b   :  { %4132 = vmatpush3.msk.msra.mxu1 %vm584_vm12, %v5350_v63 }
0x186c   :  { %4313 = vmatprep.subr.bf16.mxu1 %v4940_v21 }
0x193d   :  { %v2696_v33 = vpop.f32.mrb[20].mxu1 }
0x193e   :  { %v2697_v6 = vadd.f32 %v3741_v34, %v2696_v33  ;;  %v4119_v7 = vpop.f32.mrb[21].mxu1 }
0x1940   :  { %v2700_v58 = vmul.f32 0.35355338, %v2697_v6 }
0x1942   :  { %v2708_v10 = vrot.slane %v2700_v58, %v4889_v36  ;;  %v2920_v42 = vrot.slane %v2700_v58, %v4979_v57 }
0x1944   :  { %v2709_v11 = vmul.f32 %v2708_v10, %v2701_v8  ;;  %v2710_v12 = vmul.f32 %v2708_v10, %v2702_v9  ;;  %v2921_v31 = vmul.f32 %v2920_v42, %v2912_v55  ;;  %v2922_v51 = vmul.f32 %v2920_v42, %v2913_v32 }
0x1946   :  { %4128 = vmatprep.mubr.msk.f32.mxu0 %vm307_vm3, %v2709_v11 }
0x1947   :  { %4129 = vmatmul.mubr.msk.f32.vlgmr.msra.gmra.mrb[20].mxu0 %vm307_vm3, %v2710_v12 }
0x1948   :  { %4148 = vmatpush3.msk.msra.mxu0 %vm584_vm12, %v5350_v63 }
0x1949   :  { %4320 = vmatprep.subr.bf16.mxu0 %v4618_v15 }
0x1a1a   :  { %v4130_v54 = vpop.f32.mrb[20].mxu0 }
0x1a1b   :  { %v2789_v13 = vadd.f32 %v4130_v54, %v5113_v5  ;;  %v2783_v14 = vpop.f32.mrb[21].mxu0 }
0x1a1c   :  { %v2784_v16 = vadd.f32 %v2783_v14, %v5115_v61 }
0x1a1d   :  { %v2793_v47 = vsel %vm561_vm13, %v2789_v13, -inf }
0x1a1e   :  { %v2792_v36 = vsel %vm561_vm13, %v2784_v16, -inf }
0x1a1f   :  { %v2794_v56 = vmax.f32 %v2792_v36, %v2793_v47 }
0x1a21   :  { %v2795_v17 = vrot.slane %v2794_v56, 4 }
0x1a23   :  { %v2796_v19 = vmax.f32 %v2794_v56, %v2795_v17 }
0x1a25   :  { %v2797_v20 = vrot.slane %v2796_v19, 2 }
0x1a27   :  { %v2798_v22 = vmax.f32 %v2796_v19, %v2797_v20 }
0x1a29   :  { %v2799_v35 = vrot.slane %v2798_v22, 1 }
0x1a2b   :  { %v2800_v43 = vmax.f32 %v2798_v22, %v2799_v35 }
0x1a2d   :  { %v2801_v63 = vsub.f32 %v2784_v16, %v2800_v43  ;;  %v2802_v23 = vsub.f32 %v2789_v13, %v2800_v43 }
0x1a2f   :  { %v2803_v24 = vmul.f32 1.442695, %v2801_v63  ;;  %v2805_v25 = vmul.f32 1.442695, %v2802_v23 }
0x1a31   :  { %4448 = vpow2.f32 %v2803_v24 }
0x1a32   :  { %4450 = vpow2.f32 %v2805_v25 }
0x1a3b   :  { %v4449_v5 = vpop.eup %4448 }
0x1a3c   :  { %v4451_v26 = vpop.eup %4450  ;;  %v2807_v61 = vsel %vm561_vm13, %v4449_v5, 0.0 }
0x1a3d   :  { %v2808_v28 = vsel %vm561_vm13, %v4451_v26, 0.0 }
0x1a3e   :  { %v2809_v45 = vadd.f32 %v2808_v28, %v2807_v61  ;;  %v3753_v61 = vld [vmem:[%s5550_s8 + $0x20] sm:$0xff]  ;;  %v3754_v28 = vld [vmem:[%s5550_s8 + $0x28] sm:$0xff] }
0x1a40   :  { %v2810_v44 = vrot.slane %v2809_v45, 4 }
0x1a42   :  { %v2811_v29 = vadd.f32 %v2810_v44, %v2809_v45  ;;  %v4321_v45 = vpack.c.bf16 %v3754_v28, %v3753_v61  ;;  %v3755_v44 = vld [vmem:[%s5550_s8 + $0x30] sm:$0xff]  ;;  %v3770_v61 = vld [vmem:[%s5553_s2 + $0x58] sm:$0xff]  ;;  %v3771_v28 = vld [vmem:[%s5553_s2 + $0x60] sm:$0xff] }
0x1a44   :  { %v2812_v30 = vrot.slane %v2811_v29, 2 }
0x1a46   :  { %v2813_v37 = vadd.f32 %v2812_v30, %v2811_v29  ;;  %v3756_v29 = vld [vmem:[%s5550_s8 + $0x38] sm:$0xff] }
0x1a47   :  { %v4324_v30 = vpack.c.bf16 %v3756_v29, %v3755_v44  ;;  %v3774_v29 = vld [vmem:[%s5553_s2 + $0x78] sm:$0xff] }
0x1a48   :  { %v2814_v38 = vrot.slane %v2813_v37, 1 }
0x1a4a   :  { %v2815_v40 = vadd.f32 %v2814_v38, %v2813_v37  ;;  %v2916_v38 = vld [vmem:[#allocation10 + $0x18] sm:$0xff] }
0x1a4c   :  { %4452 = vrcp.f32 %v2815_v40  ;;  %v2915_v40 = vld [vmem:[#allocation10 + $0x10] sm:$0xff] }
0x1a56   :  { %v4453_v46 = vpop.eup %4452 }
0x1a57   :  { %v2817_v49 = vmul.f32 %v4453_v46, %v4449_v5  ;;  %v2818_v50 = vmul.f32 %v4453_v46, %v4451_v26 }
0x1a59   :  { %4133 = vmatprep.mubr.msk.f32.mxu1 %vm561_vm13, %v2817_v49 }
0x1a5a   :  { %4134 = vmatmul.mubr.msk.f32.vlgmr.msra.gmra.mrb[22].mxu1 %vm561_vm13, %v2818_v50 }
0x1a5b   :  { %4315 = vmatpush3.bf16.msra.mxu1 %v4940_v21  ;;  %4144 = vmatprep.mubr.msk.f32.mxu1 %vm307_vm3, %v2921_v31 }
0x1a5c   :  { %4317 = vmatprep.subr.bf16.mxu1 %v4946_v27 }
0x1a5f   :  { %4319 = vmatpush3.bf16.msra.mxu1 %v4946_v27 }
0x1a60   :  { %4326 = vmatprep.subr.bf16.mxu1 %v4618_v15 }
0x1a62   :  { %4145 = vmatmul.mubr.msk.f32.vlgmr.msra.gmra.mrb[24].mxu1 %vm307_vm3, %v2922_v51 }
0x1a63   :  { %4171 = vmatprep.mubr.msk.f32.mxu1 %vm4619_vm2, %v4620_v18 }
0x1b2d   :  { %v4135_v0 = vpop.f32.mrb[22].mxu1 }
0x1b2e   :  { %v2901_v1 = vmul.f32 %v4135_v0, %v2704_v53  ;;  %v2891_v21 = vpop.f32.mrb[23].mxu1 }
0x1b2f   :  { %v2900_v39 = vmul.f32 %v2891_v21, %v2703_v60 }
0x1b30   :  { %v2903_v2 = vsel %vm307_vm3, %v2901_v1, 0.0 }
0x1b31   :  { %v2902_v3 = vsel %vm307_vm3, %v2900_v39, 0.0 }
0x1b32   :  { %v2904_v34 = vadd.f32 %v2903_v2, %v2902_v3 }
0x1b34   :  { %v2905_v37 = vrot.slane %v2904_v34, 4 }
0x1b35   :  { %v4146_v27 = vpop.f32.mrb[24].mxu1 }
0x1b36   :  { %v3001_v33 = vadd.f32 %v4146_v27, %v5140_v59  ;;  %v2995_v6 = vpop.f32.mrb[25].mxu1  ;;  %v2906_v46 = vadd.f32 %v2905_v37, %v2904_v34  ;;  %v3765_v37 = vld [vmem:[%s5554_s3 + $0x1] ss:$0 sm:$0xff] }
0x1b37   :  { %v2996_v7 = vadd.f32 %v2995_v6, %v5136_v52  ;;  %v3758_v6 = vld [vmem:[%s5551_s28 + $0x1] ss:$0 sm:$0xff] }
0x1b38   :  { %v3005_v58 = vsel %vm561_vm13, %v3001_v33, -inf  ;;  %v2907_v51 = vrot.slane %v2906_v46, 2 }
0x1b39   :  { %v3004_v8 = vsel %vm561_vm13, %v2996_v7, -inf }
0x1b3a   :  { %v3006_v9 = vmax.f32 %v3004_v8, %v3005_v58  ;;  %v2908_v0 = vadd.f32 %v2907_v51, %v2906_v46 }
0x1b3c   :  { %v3007_v10 = vrot.slane %v3006_v9, 4  ;;  %v2909_v39 = vrot.slane %v2908_v0, 1 }
0x1b3e   :  { %v3008_v11 = vmax.f32 %v3006_v9, %v3007_v10  ;;  %v2910_v27 = vadd.f32 %v2909_v39, %v2908_v0  ;;  %v3776_v0 = vld [vmem:[%s5555_s7 + $0x1] ss:$0 sm:$0xff] }
0x1b40   :  { %v3009_v12 = vrot.slane %v3008_v11, 2 }
0x1b42   :  { %v3010_v54 = vmax.f32 %v3008_v11, %v3009_v12 }
0x1b44   :  { %v3011_v13 = vrot.slane %v3010_v54, 1 }
0x1b46   :  { %v3012_v14 = vmax.f32 %v3010_v54, %v3011_v13 }
0x1b48   :  { %v3013_v16 = vsub.f32 %v2996_v7, %v3012_v14  ;;  %v3014_v47 = vsub.f32 %v3001_v33, %v3012_v14 }
0x1b4a   :  { %v3015_v36 = vmul.f32 1.442695, %v3013_v16  ;;  %v3017_v56 = vmul.f32 1.442695, %v3014_v47  ;;  %v3760_v16 = vld [vmem:[%s5552_s12 + $0x20] sm:$0xff]  ;;  %v3761_v47 = vld [vmem:[%s5552_s12 + $0x28] sm:$0xff] }
0x1b4c   :  { %4454 = vpow2.f32 %v3015_v36  ;;  %v4327_v36 = vpack.c.bf16 %v3761_v47, %v3760_v16  ;;  %v3436_v16 = vrot.slane %v5387_v62, %v5210_v41 }
0x1b4d   :  { %4456 = vpow2.f32 %v3017_v56  ;;  %v3762_v56 = vld [vmem:[%s5552_s12 + $0x30] sm:$0xff] }
0x1b4e   :  { %4328 = vmatpush3.bf16.msra.mxu1 %v4327_v36 }
0x1b4f   :  { %4329 = vmatprep.subr.bf16.mxu1 %v4618_v15 }
0x1b56   :  { %v4455_v59 = vpop.eup %4454 }
0x1b57   :  { %v4457_v17 = vpop.eup %4456  ;;  %v3019_v52 = vsel %vm561_vm13, %v4455_v59, 0.0 }
0x1b58   :  { %v3020_v19 = vsel %vm561_vm13, %v4457_v17, 0.0 }
0x1b59   :  { %v3021_v20 = vadd.f32 %v3020_v19, %v3019_v52 }
0x1b5b   :  { %v3022_v22 = vrot.slane %v3021_v20, 4 }
0x1b5d   :  { %v3023_v35 = vadd.f32 %v3022_v22, %v3021_v20  ;;  %v3227_v20 = vrot.slane %v5387_v62, %v4979_v57 }
0x1b5f   :  { %v3024_v43 = vrot.slane %v3023_v35, 2 }
0x1b61   :  { %v3025_v63 = vadd.f32 %v3024_v43, %v3023_v35  ;;  %v3232_v43 = vrot.slane %v5390_v48, %v4979_v57 }
0x1b63   :  { %v3026_v23 = vrot.slane %v3025_v63, 1 }
0x1b65   :  { %v3027_v24 = vadd.f32 %v3026_v23, %v3025_v63 }
0x1b67   :  { %4458 = vrcp.f32 %v3027_v24  ;;  %v3767_v24 = vld [vmem:[%s5553_s2 + $0x40] sm:$0xff] }
0x1b71   :  { %v4459_v25 = vpop.eup %4458 }
0x1b72   :  { %v3029_v5 = vmul.f32 %v4459_v25, %v4455_v59  ;;  %v3030_v26 = vmul.f32 %v4459_v25, %v4457_v17  ;;  %v3763_v59 = vld [vmem:[%s5552_s12 + $0x38] sm:$0xff]  ;;  %v3768_v25 = vld [vmem:[%s5553_s2 + $0x48] sm:$0xff] }
0x1b73   :  { %v4330_v17 = vpack.c.bf16 %v3763_v59, %v3762_v56  ;;  %v3441_v56 = vrot.slane %v5390_v48, %v5210_v41 }
0x1b74   :  { %4149 = vmatprep.mubr.msk.f32.mxu0 %vm561_vm13, %v3029_v5  ;;  %v4333_v5 = vpack.c.bf16 %v3768_v25, %v3767_v24 }
0x1b75   :  { %4150 = vmatmul.mubr.msk.f32.vlgmr.msra.gmra.mrb[22].mxu0 %vm561_vm13, %v3030_v26  ;;  %4331 = vmatpush3.bf16.msra.mxu1 %v4330_v17  ;;  %v3769_v26 = vld [vmem:[%s5553_s2 + $0x50] sm:$0xff] }
0x1b76   :  { %4160 = vmatprep.mubr.msk.f32.mxu0 %vm4619_vm2, %v4620_v18  ;;  %4322 = vmatpush3.bf16.msra.mxu0 %v4321_v45  ;;  %v4336_v57 = vpack.c.bf16 %v3770_v61, %v3769_v26  ;;  %v3772_v45 = vld [vmem:[%s5553_s2 + $0x68] sm:$0xff] }
0x1b77   :  { %4323 = vmatprep.subr.bf16.mxu0 %v4618_v15  ;;  %4344 = vmatprep.subr.bf16.mxu1 %v4618_v15  ;;  %v4339_v44 = vpack.c.bf16 %v3772_v45, %v3771_v28 }
0x1b7a   :  { %4325 = vmatpush3.bf16.msra.mxu0 %v4324_v30 }
0x1b7b   :  { %4332 = vmatprep.subr.bf16.mxu0 %v4618_v15 }
0x1c48   :  { %v4151_v42 = vpop.f32.mrb[22].mxu0 }
0x1c49   :  { %v3113_v55 = vmul.f32 %v4151_v42, %v2916_v38  ;;  %v3103_v49 = vpop.f32.mrb[23].mxu0 }
0x1c4a   :  { %v3112_v50 = vmul.f32 %v3103_v49, %v2915_v40 }
0x1c4b   :  { %v3115_v31 = vsel %vm307_vm3, %v3113_v55, 0.0 }
0x1c4c   :  { %v3114_v32 = vsel %vm307_vm3, %v3112_v50, 0.0 }
0x1c4d   :  { %v3116_v53 = vadd.f32 %v3115_v31, %v3114_v32 }
0x1c4f   :  { %v3117_v60 = vrot.slane %v3116_v53, 4 }
0x1c51   :  { %v3118_v1 = vadd.f32 %v3117_v60, %v3116_v53 }
0x1c53   :  { %v3119_v21 = vrot.slane %v3118_v1, 2 }
0x1c55   :  { %v3120_v2 = vadd.f32 %v3119_v21, %v3118_v1 }
0x1c57   :  { %v3121_v3 = vrot.slane %v3120_v2, 1 }
0x1c59   :  { %v3122_v33 = vadd.f32 %v3121_v3, %v3120_v2 }
0x1c5b   :  { %v3123_v34 = vsel %vm254_vm0, %v2910_v27, %v3122_v33 }
0x1c5c   :  { %4161 = vmatmul.mubr.msk.f32.vlgmr.msra.gmra.mrb[24].mxu0 %vm307_vm3, %v3123_v34 }
0x1c5d   :  { %4190 = vmatprep.mubr.msk.f32.mxu0 %vm4619_vm2, %v4620_v18  ;;  %4334 = vmatpush3.bf16.msra.mxu0 %v4333_v5 }
0x1c5e   :  { %4335 = vmatprep.subr.bf16.mxu0 %v4618_v15 }
0x1c61   :  { %4337 = vmatpush3.bf16.msra.mxu0 %v4336_v57 }
0x1c62   :  { %4338 = vmatprep.subr.bf16.mxu0 %v4618_v15 }
0x1c65   :  { %4340 = vmatpush3.bf16.msra.mxu0 %v4339_v44 }
0x1c66   :  { %4341 = vmatprep.subr.bf16.mxu0 %v4618_v15 }
0x1d2f   :  { %v3206_v7 = vpop.f32.mrb[24].mxu0 }
0x1d30   :  { %v3207_v58 = vadd.f32 %v3758_v6, %v3206_v7  ;;  %v4162_v8 = vpop.f32.mrb[25].mxu0 }
0x1d31   :  { %v3444_v8 = vld [vmem:[%s5558_s10 + $0x8] sm:$0xff] }
0x1d32   :  { %v3210_v9 = vadd.f32 %v3207_v58, %v5396_v4  ;;  %v3443_v58 = vld [vmem:[%s5558_s10] sm:$0xff] }
0x1d34   :  { %v3211_v10 = vsel %vm265_vm1, %v3210_v9, 0.0 }
0x1d35   :  { %3212 = vadd.xlane.f32.xlu0 %v3211_v10  ;;  %v3445_v10 = vld [vmem:[%s5558_s10 + $0x10] sm:$0xff] }
0x1dc2   :  { %v3213_v11 = vpop.xlane.xlu0 %3212 }
0x1dc3   :  { %v3214_v12 = vmul.f32 0.03125, %v3213_v11  ;;  %v3446_v11 = vld [vmem:[%s5558_s10 + $0x18] sm:$0xff] }
0x1dc5   :  { %v3215_v54 = vsub.f32 %v3210_v9, %v3214_v12  ;;  %v4345_v9 = vpack.c.bf16 %v3444_v8, %v3443_v58  ;;  %v4348_v12 = vpack.c.bf16 %v3446_v11, %v3445_v10 }
0x1dc7   :  { %v3216_v13 = vmul.f32 %v3215_v54, %v3215_v54 }
0x1dc9   :  { %v3217_v14 = vsel %vm265_vm1, %v3216_v13, 0.0 }
0x1dca   :  { %3218 = vadd.xlane.f32.xlu0 %v3217_v14 }
0x1e57   :  { %v3219_v4 = vpop.xlane.xlu0 %3218 }
0x1e58   :  { %v3220_v52 = vmul.f32 0.03125, %v3219_v4  ;;  %v3778_v4 = vld [vmem:[%s5559_s11] ss:$0 sm:$0xff] }
0x1e5a   :  { %v3221_v19 = vadd.f32 1e-05, %v3220_v52 }
0x1e5c   :  { %4460 = vrsqrt.f32 %v3221_v19 }
0x1e66   :  { %v4461_v22 = vpop.eup %4460 }
0x1e67   :  { %v3223_v35 = vmul.f32 %v4461_v22, %v3215_v54 }
0x1e69   :  { %v3228_v63 = vmul.f32 %v3227_v20, %v3223_v35 }
0x1e6b   :  { %v3233_v23 = vadd.f32 %v3232_v43, %v3228_v63 }
0x1e6d   :  { %4172 = vmatmul.mubr.msk.f32.vlgmr.msra.gmra.mrb[26].mxu1 %vm307_vm3, %v3233_v23 }
0x1e6e   :  { %4201 = vmatprep.mubr.msk.f32.mxu1 %vm4619_vm2, %v4620_v18  ;;  %v3773_v18 = vld [vmem:[%s5553_s2 + $0x70] sm:$0xff]  ;;  %4346 = vmatpush3.bf16.msra.mxu1 %v4345_v9 }
0x1e6f   :  { %v4342_v30 = vpack.c.bf16 %v3774_v29, %v3773_v18  ;;  %4347 = vmatprep.subr.bf16.mxu1 %v4618_v15 }
0x1e71   :  { %4343 = vmatpush3.bf16.msra.mxu0 %v4342_v30 }
0x1e72   :  { %4349 = vmatpush3.bf16.msra.mxu1 %v4348_v12 }
0x1f40   :  { %v3316_v38 = vpop.f32.mrb[26].mxu1 }
0x1f41   :  { %v3317_v40 = vadd.f32 %v3765_v37, %v3316_v38  ;;  %v4173_v42 = vpop.f32.mrb[27].mxu1 }
0x1f43   :  { %v3320_v46 = vmul.f32 %v3317_v40, %v3317_v40 }
0x1f45   :  { %v3321_v55 = vmul.f32 %v3320_v46, %v3317_v40 }
0x1f47   :  { %v3322_v49 = vmul.f32 0.044715, %v3321_v55 }
0x1f49   :  { %v3323_v50 = vadd.f32 %v3322_v49, %v3317_v40 }
0x1f4b   :  { %v3324_v31 = vmul.f32 0.7978846, %v3323_v50 }
0x1f4d   :  { %4462 = vtanh.f32 %v3324_v31 }
0x1f57   :  { %v4463_v32 = vpop.eup %4462 }
0x1f58   :  { %v3326_v51 = vadd.f32 1.0, %v4463_v32 }
0x1f5a   :  { %v3327_v53 = vmul.f32 0.5, %v3326_v51 }
0x1f5c   :  { %v3328_v60 = vmul.f32 %v3327_v53, %v3317_v40 }
0x1f5e   :  { %4191 = vmatmul.mubr.msk.f32.vlgmr.msra.gmra.mrb[26].mxu0 %vm1785_vm14, %v3328_v60 }
0x2031   :  { %v3415_v1 = vpop.f32.mrb[26].mxu0 }
0x2032   :  { %v3416_v21 = vadd.f32 %v3776_v0, %v3415_v1  ;;  %v4192_v39 = vpop.f32.mrb[27].mxu0 }
0x2034   :  { %v3419_v2 = vadd.f32 %v3416_v21, %v3233_v23 }
0x2036   :  { %v3420_v3 = vsel %vm265_vm1, %v3419_v2, 0.0 }
0x2037   :  { %3421 = vadd.xlane.f32.xlu1 %v3420_v3 }
0x20c4   :  { %v3422_v27 = vpop.xlane.xlu1 %3421 }
0x20c5   :  { %v3423_v33 = vmul.f32 0.03125, %v3422_v27 }
0x20c7   :  { %v3424_v34 = vsub.f32 %v3419_v2, %v3423_v33 }
0x20c9   :  { %v3425_v6 = vmul.f32 %v3424_v34, %v3424_v34 }
0x20cb   :  { %v3426_v7 = vsel %vm265_vm1, %v3425_v6, 0.0 }
0x20cc   :  { %3427 = vadd.xlane.f32.xlu0 %v3426_v7 }
0x2159   :  { %v3428_v54 = vpop.xlane.xlu0 %3427 }
0x215a   :  { %v3429_v13 = vmul.f32 0.03125, %v3428_v54 }
0x215c   :  { %v3430_v14 = vadd.f32 1e-05, %v3429_v13 }
0x215e   :  { %4464 = vrsqrt.f32 %v3430_v14 }
0x2168   :  { %v4465_v47 = vpop.eup %4464 }
0x2169   :  { %v3432_v36 = vmul.f32 %v4465_v47, %v3424_v34 }
0x216b   :  { %v3437_v59 = vmul.f32 %v3436_v16, %v3432_v36 }
0x216d   :  { %v3442_v17 = vadd.f32 %v3441_v56, %v3437_v59 }
0x216f   :  { %4202 = vmatmul.mubr.msk.f32.vlgmr.msra.gmra.mrb[28].mxu1 %vm307_vm3, %v3442_v17 }
0x2242   :  { %v3523_v15 = vpop.f32.mrb[28].mxu1 }
0x2243   :  { %v3524_v52 = vadd.f32 %v3778_v4, %v3523_v15  ;;  %v4203_v19 = vpop.f32.mrb[29].mxu1 }
0x2245   :  { %3527 = vst [vmem:[#allocation11] sm:$0x3] %v3524_v52 }
0x2246   :  { %4556 = shalt.err (!%p4553_p6)
}
0x2247   :  { %s5560_s13 = sld [smem:[#allocation35_spill]] }
0x224d   :  { %s4557_s17 = scalar_lea.hbm %s5560_s13, 32 }
0x224e   :  { %p4558_p7 = scmp.ne.s32.totalorder %s5560_s13, %s4557_s17  ;;  %p4561_p8 = scmp.lt.u32.totalorder %s4557_s17, %s5560_s13 }
0x2250   :  { %p4563_p9 = pnand %p4561_p8, %p4558_p7 }
0x2252   :  { %4566 = shalt.err (!%p4563_p9)
}
0x2253   :  { %3557 = dma.vmem_to_hbm [thread:$0]  %s3555_s5, 32, %s5560_s13, [#allocation7]  }
0x2254   :  { %4573 = dma.done.wait [#allocation7], 32  }
0x2255   :  { %4574 = vsyncadd [#allocation7], 4294967264 }
0x2256   :  { %3601 = vsyncpa [#allocation6], 1 }
0x2257   :  { %3602 = vsyncpa [#allocation9], 1 }
0x2258   :  { %3603 = vsyncpa [#allocation7], 1 }

</bundles_post_ra>
